<compile_context>
chip_gen: v7x
topology: tpu7x:2x2x1
jax: 0.10.0
libtpu: 0.0.40
codegen_flags: <defaults>
</compile_context>

<pallas_src>
import functools

import jax
import jax.numpy as jnp
from jax.experimental import pallas as pl
from jax.experimental.pallas import tpu as pltpu


def _round_up(x, m):
    return ((x + m - 1) // m) * m


# ================ Kernel 1: fused 1x1 conv (matmul) + BN + ReLU ==============
def _mm_bn_relu_kernel(x_ref, w_ref, s_ref, b_ref, o_ref, acc_ref):
    k = pl.program_id(1)

    @pl.when(k == 0)
    def _init():
        acc_ref[...] = jnp.zeros_like(acc_ref)

    acc_ref[...] += jnp.dot(x_ref[...], w_ref[...],
                            preferred_element_type=jnp.float32)

    @pl.when(k == pl.num_programs(1) - 1)
    def _finalize():
        y = acc_ref[...] * s_ref[...] + b_ref[...]
        o_ref[...] = jnp.maximum(y, 0.0).astype(o_ref.dtype)


def fused_conv1x1_bn_relu(x2d, w_bf16, scale, bias, *, tm=256, tk=256):
    """(N, K) @ (K, Cout) with fused BN affine + ReLU.  bf16 MXU, f32 acc."""
    n, kdim = x2d.shape
    cout = w_bf16.shape[1]
    tm = min(tm, _round_up(n, 8))
    n_pad = _round_up(n, tm)
    tk = min(tk, _round_up(kdim, 128))
    k_pad = _round_up(kdim, tk)

    x_p = jnp.pad(x2d.astype(jnp.bfloat16),
                  ((0, n_pad - n), (0, k_pad - kdim)))
    w_p = jnp.pad(w_bf16, ((0, k_pad - kdim), (0, 0)))

    out = pl.pallas_call(
        _mm_bn_relu_kernel,
        out_shape=jax.ShapeDtypeStruct((n_pad, cout), jnp.float32),
        grid_spec=pltpu.PrefetchScalarGridSpec(
            num_scalar_prefetch=0,
            grid=(n_pad // tm, k_pad // tk),
            in_specs=[
                pl.BlockSpec((tm, tk), lambda i, k: (i, k)),
                pl.BlockSpec((tk, cout), lambda i, k: (k, 0)),
                pl.BlockSpec((1, cout), lambda i, k: (0, 0)),
                pl.BlockSpec((1, cout), lambda i, k: (0, 0)),
            ],
            out_specs=pl.BlockSpec((tm, cout), lambda i, k: (i, 0)),
            scratch_shapes=[pltpu.VMEM((tm, cout), jnp.float32)],
        ),
        compiler_params=pltpu.CompilerParams(
            dimension_semantics=("parallel", "arbitrary")),
    )(x_p, w_p, scale, bias)
    return out[:n]


# ====== Kernel 2: 3x3 conv + BN + ReLU fused with final 1x1 conv + bias ======
def _conv3x3_head_kernel(x_ref, w2_ref, s2_ref, b2_ref, w3_ref, b3_ref,
                         o_ref, acc_ref, *, tm, row_stride, pad_top):
    # x_ref: (rows, 512) f32, per-image spatially-padded activation, resident
    # in VMEM.  The 3x3 conv is 9 row-shifted (tm, 512) slices accumulated on
    # the MXU; epilogue applies BN+ReLU then the fused final 1x1 conv.
    i = pl.program_id(1)
    base = i * tm + pad_top                      # multiple of 8 by construction
    acc_ref[...] = jnp.zeros_like(acc_ref)
    for t in range(9):
        ky, kx = t // 3, t % 3
        d = (ky - 1) * row_stride + (kx - 1)     # static row shift of this tap
        d0 = (d // 8) * 8                        # aligned part (mult of 8)
        r = d - d0                               # static residual 0..7
        start = pl.multiple_of(base + d0, 8)
        if r == 0:
            lhs = x_ref[pl.ds(start, tm), :]
        else:
            lhs = x_ref[pl.ds(start, tm + 8), :][r:r + tm, :]
        acc_ref[...] += jnp.dot(lhs.astype(jnp.bfloat16), w2_ref[t],
                                preferred_element_type=jnp.float32)
    y2 = jnp.maximum(acc_ref[...] * s2_ref[...] + b2_ref[...], 0.0)
    y3 = jnp.dot(y2.astype(jnp.bfloat16), w3_ref[...],
                 preferred_element_type=jnp.float32)
    o_ref[...] = y3 + b3_ref[...]                # no BN/scale on final layer


def fused_conv3x3_head(y1, w2s, scale2, bias2, w3, bias3, *, spatial, tm=128):
    b, h, w = spatial
    c_in = w2s.shape[1]
    c_mid = w2s.shape[2]
    c_out = w3.shape[1]                          # already padded to mult of 128
    wr = w + 2                                   # padded row length (pixels)
    qi = (h + 2) * wr                            # padded positions per image
    tm = min(tm, _round_up(qi, 8))
    qi_pad = _round_up(qi, tm)
    pad_rows = _round_up(wr + 16, 8)             # halo guard rows (zeros)
    r_img = pad_rows + qi_pad + pad_rows

    # One spatial zero-pad + flatten (~1.2x activation), instead of 9x im2col.
    y1p = jnp.pad(y1.reshape(b, h, w, c_in), ((0, 0), (1, 1), (1, 1), (0, 0)))
    x2 = jnp.pad(y1p.reshape(b, qi, c_in),
                 ((0, 0), (pad_rows, pad_rows + qi_pad - qi), (0, 0)))

    kern = functools.partial(_conv3x3_head_kernel, tm=tm,
                             row_stride=wr, pad_top=pad_rows)
    out = pl.pallas_call(
        kern,
        out_shape=jax.ShapeDtypeStruct((b, qi_pad, c_out), jnp.float32),
        grid_spec=pltpu.PrefetchScalarGridSpec(
            num_scalar_prefetch=0,
            grid=(b, qi_pad // tm),
            in_specs=[
                pl.BlockSpec((None, r_img, c_in), lambda bi, i: (bi, 0, 0)),
                pl.BlockSpec((9, c_in, c_mid), lambda bi, i: (0, 0, 0)),
                pl.BlockSpec((1, c_mid), lambda bi, i: (0, 0)),
                pl.BlockSpec((1, c_mid), lambda bi, i: (0, 0)),
                pl.BlockSpec((c_mid, c_out), lambda bi, i: (0, 0)),
                pl.BlockSpec((1, c_out), lambda bi, i: (0, 0)),
            ],
            out_specs=pl.BlockSpec((None, tm, c_out), lambda bi, i: (bi, i, 0)),
            scratch_shapes=[pltpu.VMEM((tm, c_mid), jnp.float32)],
        ),
        compiler_params=pltpu.CompilerParams(
            dimension_semantics=("parallel", "parallel")),
    )(x2, w2s, scale2, bias2, w3, bias3)

    out = out[:, :qi, :].reshape(b, h + 2, w + 2, c_out)
    return out[:, 1:h + 1, 1:w + 1, :]


# ======================= deterministic parameter init =======================
class _KeyGen:
    def __init__(self, seed):
        self._key = jax.random.PRNGKey(seed)

    def __call__(self):
        self._key, sub = jax.random.split(self._key)
        return sub


def _conv_w(kg, kh, kw, cin, cout):
    fan_in = kh * kw * cin
    return (jax.random.normal(kg(), (kh, kw, cin, cout), jnp.float32)
            * jnp.sqrt(2.0 / fan_in))


def _bn_affine(kg, c, eps=1e-5):
    gamma = jax.random.uniform(kg(), (c,), jnp.float32, 0.8, 1.2)
    beta = 0.05 * jax.random.normal(kg(), (c,), jnp.float32)
    mean = 0.05 * jax.random.normal(kg(), (c,), jnp.float32)
    var = jax.random.uniform(kg(), (c,), jnp.float32, 0.8, 1.2)
    scale = gamma / jnp.sqrt(var + eps)
    bias = beta - mean * scale
    return scale, bias


_MBV2_CFG = [  # (expand t, out channels c, repeats n, stride s)
    (1, 16, 1, 1),
    (6, 24, 2, 2),
    (6, 32, 3, 2),
    (6, 64, 4, 2),
    (6, 96, 3, 1),
    (6, 160, 3, 2),
    (6, 320, 1, 1),
]


def _make_cbr(kg, kh, kw, cin, cout, stride, groups, act):
    w = _conv_w(kg, kh, kw, cin // groups, cout)
    scale, bias = _bn_affine(kg, cout)
    return dict(w=w, scale=scale, bias=bias, stride=stride,
                groups=groups, act=act)


def init_backbone_params(kg):
    layers = [("conv", _make_cbr(kg, 3, 3, 3, 32, 2, 1, True))]
    cin = 32
    for t, c, n, s in _MBV2_CFG:
        for i in range(n):
            stride = s if i == 0 else 1
            hidden = cin * t
            block = []
            if t != 1:
                block.append(_make_cbr(kg, 1, 1, cin, hidden, 1, 1, True))
            block.append(_make_cbr(kg, 3, 3, hidden, hidden, stride, hidden, True))
            block.append(_make_cbr(kg, 1, 1, hidden, c, 1, 1, False))
            layers.append(("block", dict(layers=block,
                                         use_res=(stride == 1 and cin == c))))
            cin = c
    layers.append(("conv", _make_cbr(kg, 1, 1, cin, 1280, 1, 1, True)))
    return layers


def init_yolo_head_params(kg, num_classes, num_anchors):
    out_ch = num_anchors * (num_classes + 5)
    out_ch_pad = _round_up(out_ch, 128)
    # Conv2d(1280, 512, 1) + bias, BN, ReLU
    w1 = _conv_w(kg, 1, 1, 1280, 512).reshape(1280, 512)
    b1 = 0.05 * jax.random.normal(kg(), (512,), jnp.float32)
    s1, t1 = _bn_affine(kg, 512)
    # Conv2d(512, 256, 3, padding=1) + bias, BN, ReLU
    w2 = _conv_w(kg, 3, 3, 512, 256)
    b2 = 0.05 * jax.random.normal(kg(), (256,), jnp.float32)
    s2, t2 = _bn_affine(kg, 256)
    # Conv2d(256, out_ch, 1) + bias, no BN / no ReLU (out channels padded)
    w3 = _conv_w(kg, 1, 1, 256, out_ch).reshape(256, out_ch)
    b3 = 0.05 * jax.random.normal(kg(), (out_ch,), jnp.float32)
    return dict(
        w1=w1.astype(jnp.bfloat16),
        scale1=s1.reshape(1, -1), bias1=(b1 * s1 + t1).reshape(1, -1),
        w2=w2.reshape(9, 512, 256).astype(jnp.bfloat16),
        scale2=s2.reshape(1, -1), bias2=(b2 * s2 + t2).reshape(1, -1),
        w3=jnp.pad(w3, ((0, 0), (0, out_ch_pad - out_ch))).astype(jnp.bfloat16),
        bias3=jnp.pad(b3, (0, out_ch_pad - out_ch)).reshape(1, -1),
    )


def init_params(num_classes, num_anchors=7, seed=0):
    kg = _KeyGen(seed)
    return dict(
        backbone=init_backbone_params(kg),
        yolo=init_yolo_head_params(kg, num_classes, num_anchors),
        num_classes=num_classes,
        num_anchors=num_anchors,
    )


# ====================== plain-JAX feature extractor =========================
def _conv_bn_act(x, p):
    kh = p["w"].shape[0]
    pad = (kh - 1) // 2
    y = jax.lax.conv_general_dilated(
        x.astype(jnp.bfloat16), p["w"].astype(jnp.bfloat16),
        (p["stride"], p["stride"]), [(pad, pad), (pad, pad)],
        dimension_numbers=("NHWC", "HWIO", "NHWC"),
        feature_group_count=p["groups"],
        preferred_element_type=jnp.float32)
    y = y * p["scale"] + p["bias"]
    if p["act"]:
        y = jnp.clip(y, 0.0, 6.0)  # ReLU6
    return y


def apply_backbone(layers, x):
    for kind, p in layers:
        if kind == "conv":
            x = _conv_bn_act(x, p)
        else:
            y = x
            for l in p["layers"]:
                y = _conv_bn_act(y, l)
            x = x + y if p["use_res"] else y
    return x


# ============================ YOLO head (Pallas) =============================
def apply_yolo_head(hp, feats, num_anchors, num_classes):
    b, hf, wf, cin = feats.shape
    n = b * hf * wf
    out_ch = num_anchors * (num_classes + 5)
    # 1x1 conv + BN + ReLU  (Pallas bf16 matmul kernel)
    y1 = fused_conv1x1_bn_relu(feats.reshape(n, cin), hp["w1"],
                               hp["scale1"], hp["bias1"])
    # 3x3 conv (padding=1) + BN + ReLU fused with final 1x1 conv + bias.
    y3 = fused_conv3x3_head(y1, hp["w2"], hp["scale2"], hp["bias2"],
                            hp["w3"], hp["bias3"], spatial=(b, hf, wf))
    y3 = y3[..., :out_ch]
    # (B, H, W, A*(C+5)) -> (B, A, C+5, H, W); the torch box/objectness/class
    # slicing followed by cat along dim 2 is an identity concat.
    y3 = y3.reshape(b, hf, wf, num_anchors, num_classes + 5)
    return jnp.transpose(y3, (0, 3, 4, 1, 2))


# ================================ forward ====================================
def dual_pathway_forward(params, x):
    if x.ndim == 3:
        x = x[None]
    # torch: if x.size(1) != 3 -> input is NHWC.  Our kernels want NHWC, so
    # convert only when the input is NCHW (channel dim == 3).
    if x.shape[1] == 3:
        x = jnp.transpose(x, (0, 2, 3, 1))
    feats = apply_backbone(params["backbone"], x)          # (B, H/32, W/32, 1280)
    return apply_yolo_head(params["yolo"], feats,
                           params["num_anchors"], params["num_classes"])


if __name__ == "__main__":
    num_classes, num_anchors = 3, 7
    params = init_params(num_classes, num_anchors, seed=0)

    key = jax.random.PRNGKey(0)
    x = jax.random.normal(key, (2, 3, 64, 64), jnp.float32)  # NCHW, like torch

    fwd = jax.jit(lambda inp: dual_pathway_forward(params, inp))
    out = jax.block_until_ready(fwd(x))

    expected = (2, num_anchors, num_classes + 5, 2, 2)  # 64 / 32 = 2
    assert out.shape == expected, (out.shape, expected)
    assert bool(jnp.all(jnp.isfinite(out)))
    print("KERNEL_OK")
</pallas_src>

<mosaic_0001>
module attributes {stable_mosaic.version = 11 : i64} {
  func.func @_mm_bn_relu_kernel(%arg0: i32, %arg1: i32, %arg2: memref<8x256xbf16, #tpu.memory_space<vmem>>, %arg3: memref<256x512xbf16, #tpu.memory_space<vmem>>, %arg4: memref<1x512xf32, #tpu.memory_space<vmem>>, %arg5: memref<1x512xf32, #tpu.memory_space<vmem>>, %arg6: memref<8x512xf32, #tpu.memory_space<vmem>>, %arg7: memref<8x512xf32, #tpu.memory_space<vmem>>) attributes {dimension_semantics = [#tpu.dimension_semantics<parallel>, #tpu.dimension_semantics<arbitrary>], iteration_bounds = array<i64: 1, 5>, scalar_prefetch = 0 : i64, scratch_operands = 1 : i64, tpu.core_type = #tpu.core_type<tc>, window_params = [{transform_indices = @transform_0, window_bounds = array<i64: 8, 256>}, {transform_indices = @transform_1, window_bounds = array<i64: 256, 512>}, {pipeline_mode = #tpu.pipeline_mode<synchronous>, transform_indices = @transform_2, window_bounds = array<i64: 1, 512>}, {pipeline_mode = #tpu.pipeline_mode<synchronous>, transform_indices = @transform_3, window_bounds = array<i64: 1, 512>}, {transform_indices = @transform_4, window_bounds = array<i64: 8, 512>}]} {
    %c0_i32 = arith.constant 0 : i32
    %0 = arith.cmpi eq, %arg1, %c0_i32 : i32
    %1 = arith.extui %0 : i1 to i32
    %c0_i32_0 = arith.constant 0 : i32
    %2 = arith.cmpi ne, %1, %c0_i32_0 : i32
    scf.if %2 {
      %cst_9 = arith.constant 0.000000e+00 : f32
      %12 = vector.broadcast %cst_9 : f32 to vector<8x512xf32>
      %c0_10 = arith.constant 0 : index
      %c0_11 = arith.constant 0 : index
      %13 = vector.load %arg7[%c0_10, %c0_11] : memref<8x512xf32, #tpu.memory_space<vmem>>, vector<8x512xf32>
      tpu.vector_store %arg7[%c0_10, %c0_11], %12 {strides = array<i32>} : memref<8x512xf32, #tpu.memory_space<vmem>>, vector<8x512xf32>,
    } else {
    }
    %c0 = arith.constant 0 : index
    %c0_1 = arith.constant 0 : index
    %3 = vector.load %arg7[%c0, %c0_1] : memref<8x512xf32, #tpu.memory_space<vmem>>, vector<8x512xf32>
    %c0_2 = arith.constant 0 : index
    %c0_3 = arith.constant 0 : index
    %4 = vector.load %arg2[%c0_2, %c0_3] : memref<8x256xbf16, #tpu.memory_space<vmem>>, vector<8x256xbf16>
    %c0_4 = arith.constant 0 : index
    %c0_5 = arith.constant 0 : index
    %5 = vector.load %arg3[%c0_4, %c0_5] : memref<256x512xbf16, #tpu.memory_space<vmem>>, vector<256x512xbf16>
    %cst = arith.constant dense<0.000000e+00> : vector<8x512xf32>
    %6 = tpu.matmul %4, %5, %cst {dimension_numbers = #tpu.dot_dimension_numbers<[1], [0], [0], [1], [0, 0, 1, 1], [], []>} : vector<8x256xbf16>, vector<256x512xbf16>, vector<8x512xf32> -> vector<8x512xf32>
    %7 = arith.addf %3, %6 : vector<8x512xf32>
    %c0_6 = arith.constant 0 : index
    %c0_7 = arith.constant 0 : index
    %8 = vector.load %arg7[%c0_6, %c0_7] : memref<8x512xf32, #tpu.memory_space<vmem>>, vector<8x512xf32>
    tpu.vector_store %arg7[%c0_6, %c0_7], %7 {strides = array<i32>} : memref<8x512xf32, #tpu.memory_space<vmem>>, vector<8x512xf32>,
    %c4_i32 = arith.constant 4 : i32
    %9 = arith.cmpi eq, %arg1, %c4_i32 : i32
    %10 = arith.extui %9 : i1 to i32
    %c0_i32_8 = arith.constant 0 : i32
    %11 = arith.cmpi ne, %10, %c0_i32_8 : i32
    scf.if %11 {
      %c0_9 = arith.constant 0 : index
      %c0_10 = arith.constant 0 : index
      %12 = vector.load %arg7[%c0_9, %c0_10] : memref<8x512xf32, #tpu.memory_space<vmem>>, vector<8x512xf32>
      %c0_11 = arith.constant 0 : index
      %c0_12 = arith.constant 0 : index
      %13 = vector.load %arg4[%c0_11, %c0_12] : memref<1x512xf32, #tpu.memory_space<vmem>>, vector<1x512xf32>
      %14 = vector.broadcast %13 : vector<1x512xf32> to vector<8x512xf32>
      %15 = arith.mulf %12, %14 : vector<8x512xf32>
      %c0_13 = arith.constant 0 : index
      %c0_14 = arith.constant 0 : index
      %16 = vector.load %arg5[%c0_13, %c0_14] : memref<1x512xf32, #tpu.memory_space<vmem>>, vector<1x512xf32>
      %17 = vector.broadcast %16 : vector<1x512xf32> to vector<8x512xf32>
      %18 = arith.addf %15, %17 : vector<8x512xf32>
      %cst_15 = arith.constant 0.000000e+00 : f32
      %19 = vector.broadcast %cst_15 : f32 to vector<8x512xf32>
      %20 = arith.maximumf %18, %19 : vector<8x512xf32>
      %c0_16 = arith.constant 0 : index
      %c0_17 = arith.constant 0 : index
      %21 = vector.load %arg6[%c0_16, %c0_17] : memref<8x512xf32, #tpu.memory_space<vmem>>, vector<8x512xf32>
      tpu.vector_store %arg6[%c0_16, %c0_17], %20 {strides = array<i32>} : memref<8x512xf32, #tpu.memory_space<vmem>>, vector<8x512xf32>,
    } else {
    }
    return
  }
  func.func @transform_0(%arg0: i32, %arg1: i32) -> (i32, i32) {
    %c0_i32 = arith.constant 0 : i32
    return %arg0, %arg1 : i32, i32
  }
  func.func @transform_1(%arg0: i32, %arg1: i32) -> (i32, i32) {
    %c0_i32 = arith.constant 0 : i32
    %c0_i32_0 = arith.constant 0 : i32
    return %arg1, %c0_i32 : i32, i32
  }
  func.func @transform_2(%arg0: i32, %arg1: i32) -> (i32, i32) {
    %c0_i32 = arith.constant 0 : i32
    %c0_i32_0 = arith.constant 0 : i32
    %c0_i32_1 = arith.constant 0 : i32
    return %c0_i32, %c0_i32_0 : i32, i32
  }
  func.func @transform_3(%arg0: i32, %arg1: i32) -> (i32, i32) {
    %c0_i32 = arith.constant 0 : i32
    %c0_i32_0 = arith.constant 0 : i32
    %c0_i32_1 = arith.constant 0 : i32
    return %c0_i32, %c0_i32_0 : i32, i32
  }
  func.func @transform_4(%arg0: i32, %arg1: i32) -> (i32, i32) {
    %c0_i32 = arith.constant 0 : i32
    %c0_i32_0 = arith.constant 0 : i32
    return %arg0, %c0_i32 : i32, i32
  }
}

module attributes {stable_mosaic.version = 11 : i64} {
  func.func @_conv3x3_head_kernel(%arg0: i32, %arg1: i32, %arg2: memref<1x64x512xf32, #tpu.memory_space<vmem>>, %arg3: memref<9x512x256xbf16, #tpu.memory_space<vmem>>, %arg4: memref<1x256xf32, #tpu.memory_space<vmem>>, %arg5: memref<1x256xf32, #tpu.memory_space<vmem>>, %arg6: memref<256x128xbf16, #tpu.memory_space<vmem>>, %arg7: memref<1x128xf32, #tpu.memory_space<vmem>>, %arg8: memref<1x16x128xf32, #tpu.memory_space<vmem>>, %arg9: memref<16x256xf32, #tpu.memory_space<vmem>>) attributes {dimension_semantics = [#tpu.dimension_semantics<parallel>, #tpu.dimension_semantics<parallel>], iteration_bounds = array<i64: 2, 1>, scalar_prefetch = 0 : i64, scratch_operands = 1 : i64, tpu.core_type = #tpu.core_type<tc>, window_params = [{transform_indices = @transform_0, window_bounds = array<i64: 1, 64, 512>}, {pipeline_mode = #tpu.pipeline_mode<synchronous>, transform_indices = @transform_1, window_bounds = array<i64: 9, 512, 256>}, {pipeline_mode = #tpu.pipeline_mode<synchronous>, transform_indices = @transform_2, window_bounds = array<i64: 1, 256>}, {pipeline_mode = #tpu.pipeline_mode<synchronous>, transform_indices = @transform_3, window_bounds = array<i64: 1, 256>}, {pipeline_mode = #tpu.pipeline_mode<synchronous>, transform_indices = @transform_4, window_bounds = array<i64: 256, 128>}, {pipeline_mode = #tpu.pipeline_mode<synchronous>, transform_indices = @transform_5, window_bounds = array<i64: 1, 128>}, {transform_indices = @transform_6, window_bounds = array<i64: 1, 16, 128>}]} {
    %c16_i32 = arith.constant 16 : i32
    %0 = arith.muli %arg1, %c16_i32 : i32
    %c24_i32 = arith.constant 24 : i32
    %1 = arith.addi %0, %c24_i32 : i32
    %cst = arith.constant 0.000000e+00 : f32
    %2 = vector.broadcast %cst : f32 to vector<16x256xf32>
    %c0 = arith.constant 0 : index
    %c0_0 = arith.constant 0 : index
    %3 = vector.load %arg9[%c0, %c0_0] : memref<16x256xf32, #tpu.memory_space<vmem>>, vector<16x256xf32>
    tpu.vector_store %arg9[%c0, %c0_0], %2 {strides = array<i32>} : memref<16x256xf32, #tpu.memory_space<vmem>>, vector<16x256xf32>,
    %c-8_i32 = arith.constant -8 : i32
    %4 = arith.addi %1, %c-8_i32 : i32
    %5 = tpu.assume_multiple %4, 8 : i32
    %c0_1 = arith.constant 0 : index
    %6 = arith.index_cast %5 : i32 to index
    %c0_2 = arith.constant 0 : index
    %7 = vector.load %arg2[%c0_1, %6, %c0_2] : memref<1x64x512xf32, #tpu.memory_space<vmem>>, vector<1x24x512xf32>
    %8 = vector.shape_cast %7 : vector<1x24x512xf32> to vector<24x512xf32>
    %9 = vector.extract_strided_slice %8 {offsets = [3, 0], sizes = [16, 512], strides = [1, 1]} : vector<24x512xf32> to vector<16x512xf32>
    %c0_3 = arith.constant 0 : index
    %c0_4 = arith.constant 0 : index
    %10 = vector.load %arg9[%c0_3, %c0_4] : memref<16x256xf32, #tpu.memory_space<vmem>>, vector<16x256xf32>
    %11 = arith.truncf %9 : vector<16x512xf32> to vector<16x512xbf16>
    %c0_5 = arith.constant 0 : index
    %c0_6 = arith.constant 0 : index
    %c0_7 = arith.constant 0 : index
    %12 = vector.load %arg3[%c0_5, %c0_6, %c0_7] : memref<9x512x256xbf16, #tpu.memory_space<vmem>>, vector<1x512x256xbf16>
    %13 = vector.shape_cast %12 : vector<1x512x256xbf16> to vector<512x256xbf16>
    %cst_8 = arith.constant dense<0.000000e+00> : vector<16x256xf32>
    %14 = tpu.matmul %11, %13, %cst_8 {dimension_numbers = #tpu.dot_dimension_numbers<[1], [0], [0], [1], [0, 0, 1, 1], [], []>} : vector<16x512xbf16>, vector<512x256xbf16>, vector<16x256xf32> -> vector<16x256xf32>
    %15 = arith.addf %10, %14 : vector<16x256xf32>
    %c0_9 = arith.constant 0 : index
    %c0_10 = arith.constant 0 : index
    %16 = vector.load %arg9[%c0_9, %c0_10] : memref<16x256xf32, #tpu.memory_space<vmem>>, vector<16x256xf32>
    tpu.vector_store %arg9[%c0_9, %c0_10], %15 {strides = array<i32>} : memref<16x256xf32, #tpu.memory_space<vmem>>, vector<16x256xf32>,
    %c-8_i32_11 = arith.constant -8 : i32
    %17 = arith.addi %1, %c-8_i32_11 : i32
    %18 = tpu.assume_multiple %17, 8 : i32
    %c0_12 = arith.constant 0 : index
    %19 = arith.index_cast %18 : i32 to index
    %c0_13 = arith.constant 0 : index
    %20 = vector.load %arg2[%c0_12, %19, %c0_13] : memref<1x64x512xf32, #tpu.memory_space<vmem>>, vector<1x24x512xf32>
    %21 = vector.shape_cast %20 : vector<1x24x512xf32> to vector<24x512xf32>
    %22 = vector.extract_strided_slice %21 {offsets = [4, 0], sizes = [16, 512], strides = [1, 1]} : vector<24x512xf32> to vector<16x512xf32>
    %c0_14 = arith.constant 0 : index
    %c0_15 = arith.constant 0 : index
    %23 = vector.load %arg9[%c0_14, %c0_15] : memref<16x256xf32, #tpu.memory_space<vmem>>, vector<16x256xf32>
    %24 = arith.truncf %22 : vector<16x512xf32> to vector<16x512xbf16>
    %c1 = arith.constant 1 : index
    %c0_16 = arith.constant 0 : index
    %c0_17 = arith.constant 0 : index
    %25 = vector.load %arg3[%c1, %c0_16, %c0_17] : memref<9x512x256xbf16, #tpu.memory_space<vmem>>, vector<1x512x256xbf16>
    %26 = vector.shape_cast %25 : vector<1x512x256xbf16> to vector<512x256xbf16>
    %cst_18 = arith.constant dense<0.000000e+00> : vector<16x256xf32>
    %27 = tpu.matmul %24, %26, %cst_18 {dimension_numbers = #tpu.dot_dimension_numbers<[1], [0], [0], [1], [0, 0, 1, 1], [], []>} : vector<16x512xbf16>, vector<512x256xbf16>, vector<16x256xf32> -> vector<16x256xf32>
    %28 = arith.addf %23, %27 : vector<16x256xf32>
    %c0_19 = arith.constant 0 : index
    %c0_20 = arith.constant 0 : index
    %29 = vector.load %arg9[%c0_19, %c0_20] : memref<16x256xf32, #tpu.memory_space<vmem>>, vector<16x256xf32>
    tpu.vector_store %arg9[%c0_19, %c0_20], %28 {strides = array<i32>} : memref<16x256xf32, #tpu.memory_space<vmem>>, vector<16x256xf32>,
    %c-8_i32_21 = arith.constant -8 : i32
    %30 = arith.addi %1, %c-8_i32_21 : i32
    %31 = tpu.assume_multiple %30, 8 : i32
    %c0_22 = arith.constant 0 : index
    %32 = arith.index_cast %31 : i32 to index
    %c0_23 = arith.constant 0 : index
    %33 = vector.load %arg2[%c0_22, %32, %c0_23] : memref<1x64x512xf32, #tpu.memory_space<vmem>>, vector<1x24x512xf32>
    %34 = vector.shape_cast %33 : vector<1x24x512xf32> to vector<24x512xf32>
    %35 = vector.extract_strided_slice %34 {offsets = [5, 0], sizes = [16, 512], strides = [1, 1]} : vector<24x512xf32> to vector<16x512xf32>
    %c0_24 = arith.constant 0 : index
    %c0_25 = arith.constant 0 : index
    %36 = vector.load %arg9[%c0_24, %c0_25] : memref<16x256xf32, #tpu.memory_space<vmem>>, vector<16x256xf32>
    %37 = arith.truncf %35 : vector<16x512xf32> to vector<16x512xbf16>
    %c2 = arith.constant 2 : index
    %c0_26 = arith.constant 0 : index
    %c0_27 = arith.constant 0 : index
    %38 = vector.load %arg3[%c2, %c0_26, %c0_27] : memref<9x512x256xbf16, #tpu.memory_space<vmem>>, vector<1x512x256xbf16>
    %39 = vector.shape_cast %38 : vector<1x512x256xbf16> to vector<512x256xbf16>
    %cst_28 = arith.constant dense<0.000000e+00> : vector<16x256xf32>
    %40 = tpu.matmul %37, %39, %cst_28 {dimension_numbers = #tpu.dot_dimension_numbers<[1], [0], [0], [1], [0, 0, 1, 1], [], []>} : vector<16x512xbf16>, vector<512x256xbf16>, vector<16x256xf32> -> vector<16x256xf32>
    %41 = arith.addf %36, %40 : vector<16x256xf32>
    %c0_29 = arith.constant 0 : index
    %c0_30 = arith.constant 0 : index
    %42 = vector.load %arg9[%c0_29, %c0_30] : memref<16x256xf32, #tpu.memory_space<vmem>>, vector<16x256xf32>
    tpu.vector_store %arg9[%c0_29, %c0_30], %41 {strides = array<i32>} : memref<16x256xf32, #tpu.memory_space<vmem>>, vector<16x256xf32>,
    %c-8_i32_31 = arith.constant -8 : i32
    %43 = arith.addi %1, %c-8_i32_31 : i32
    %44 = tpu.assume_multiple %43, 8 : i32
    %c0_32 = arith.constant 0 : index
    %45 = arith.index_cast %44 : i32 to index
    %c0_33 = arith.constant 0 : index
    %46 = vector.load %arg2[%c0_32, %45, %c0_33] : memref<1x64x512xf32, #tpu.memory_space<vmem>>, vector<1x24x512xf32>
    %47 = vector.shape_cast %46 : vector<1x24x512xf32> to vector<24x512xf32>
    %48 = vector.extract_strided_slice %47 {offsets = [7, 0], sizes = [16, 512], strides = [1, 1]} : vector<24x512xf32> to vector<16x512xf32>
    %c0_34 = arith.constant 0 : index
    %c0_35 = arith.constant 0 : index
    %49 = vector.load %arg9[%c0_34, %c0_35] : memref<16x256xf32, #tpu.memory_space<vmem>>, vector<16x256xf32>
    %50 = arith.truncf %48 : vector<16x512xf32> to vector<16x512xbf16>
    %c3 = arith.constant 3 : index
    %c0_36 = arith.constant 0 : index
    %c0_37 = arith.constant 0 : index
    %51 = vector.load %arg3[%c3, %c0_36, %c0_37] : memref<9x512x256xbf16, #tpu.memory_space<vmem>>, vector<1x512x256xbf16>
    %52 = vector.shape_cast %51 : vector<1x512x256xbf16> to vector<512x256xbf16>
    %cst_38 = arith.constant dense<0.000000e+00> : vector<16x256xf32>
    %53 = tpu.matmul %50, %52, %cst_38 {dimension_numbers = #tpu.dot_dimension_numbers<[1], [0], [0], [1], [0, 0, 1, 1], [], []>} : vector<16x512xbf16>, vector<512x256xbf16>, vector<16x256xf32> -> vector<16x256xf32>
    %54 = arith.addf %49, %53 : vector<16x256xf32>
    %c0_39 = arith.constant 0 : index
    %c0_40 = arith.constant 0 : index
    %55 = vector.load %arg9[%c0_39, %c0_40] : memref<16x256xf32, #tpu.memory_space<vmem>>, vector<16x256xf32>
    tpu.vector_store %arg9[%c0_39, %c0_40], %54 {strides = array<i32>} : memref<16x256xf32, #tpu.memory_space<vmem>>, vector<16x256xf32>,
    %c0_i32 = arith.constant 0 : i32
    %56 = arith.addi %1, %c0_i32 : i32
    %57 = tpu.assume_multiple %56, 8 : i32
    %c0_41 = arith.constant 0 : index
    %58 = arith.index_cast %57 : i32 to index
    %c0_42 = arith.constant 0 : index
    %59 = vector.load %arg2[%c0_41, %58, %c0_42] : memref<1x64x512xf32, #tpu.memory_space<vmem>>, vector<1x16x512xf32>
    %60 = vector.shape_cast %59 : vector<1x16x512xf32> to vector<16x512xf32>
    %c0_43 = arith.constant 0 : index
    %c0_44 = arith.constant 0 : index
    %61 = vector.load %arg9[%c0_43, %c0_44] : memref<16x256xf32, #tpu.memory_space<vmem>>, vector<16x256xf32>
    %62 = arith.truncf %60 : vector<16x512xf32> to vector<16x512xbf16>
    %c4 = arith.constant 4 : index
    %c0_45 = arith.constant 0 : index
    %c0_46 = arith.constant 0 : index
    %63 = vector.load %arg3[%c4, %c0_45, %c0_46] : memref<9x512x256xbf16, #tpu.memory_space<vmem>>, vector<1x512x256xbf16>
    %64 = vector.shape_cast %63 : vector<1x512x256xbf16> to vector<512x256xbf16>
    %cst_47 = arith.constant dense<0.000000e+00> : vector<16x256xf32>
    %65 = tpu.matmul %62, %64, %cst_47 {dimension_numbers = #tpu.dot_dimension_numbers<[1], [0], [0], [1], [0, 0, 1, 1], [], []>} : vector<16x512xbf16>, vector<512x256xbf16>, vector<16x256xf32> -> vector<16x256xf32>
    %66 = arith.addf %61, %65 : vector<16x256xf32>
    %c0_48 = arith.constant 0 : index
    %c0_49 = arith.constant 0 : index
    %67 = vector.load %arg9[%c0_48, %c0_49] : memref<16x256xf32, #tpu.memory_space<vmem>>, vector<16x256xf32>
    tpu.vector_store %arg9[%c0_48, %c0_49], %66 {strides = array<i32>} : memref<16x256xf32, #tpu.memory_space<vmem>>, vector<16x256xf32>,
    %c0_i32_50 = arith.constant 0 : i32
    %68 = arith.addi %1, %c0_i32_50 : i32
    %69 = tpu.assume_multiple %68, 8 : i32
    %c0_51 = arith.constant 0 : index
    %70 = arith.index_cast %69 : i32 to index
    %c0_52 = arith.constant 0 : index
    %71 = vector.load %arg2[%c0_51, %70, %c0_52] : memref<1x64x512xf32, #tpu.memory_space<vmem>>, vector<1x24x512xf32>
    %72 = vector.shape_cast %71 : vector<1x24x512xf32> to vector<24x512xf32>
    %73 = vector.extract_strided_slice %72 {offsets = [1, 0], sizes = [16, 512], strides = [1, 1]} : vector<24x512xf32> to vector<16x512xf32>
    %c0_53 = arith.constant 0 : index
    %c0_54 = arith.constant 0 : index
    %74 = vector.load %arg9[%c0_53, %c0_54] : memref<16x256xf32, #tpu.memory_space<vmem>>, vector<16x256xf32>
    %75 = arith.truncf %73 : vector<16x512xf32> to vector<16x512xbf16>
    %c5 = arith.constant 5 : index
    %c0_55 = arith.constant 0 : index
    %c0_56 = arith.constant 0 : index
    %76 = vector.load %arg3[%c5, %c0_55, %c0_56] : memref<9x512x256xbf16, #tpu.memory_space<vmem>>, vector<1x512x256xbf16>
    %77 = vector.shape_cast %76 : vector<1x512x256xbf16> to vector<512x256xbf16>
    %cst_57 = arith.constant dense<0.000000e+00> : vector<16x256xf32>
    %78 = tpu.matmul %75, %77, %cst_57 {dimension_numbers = #tpu.dot_dimension_numbers<[1], [0], [0], [1], [0, 0, 1, 1], [], []>} : vector<16x512xbf16>, vector<512x256xbf16>, vector<16x256xf32> -> vector<16x256xf32>
    %79 = arith.addf %74, %78 : vector<16x256xf32>
    %c0_58 = arith.constant 0 : index
    %c0_59 = arith.constant 0 : index
    %80 = vector.load %arg9[%c0_58, %c0_59] : memref<16x256xf32, #tpu.memory_space<vmem>>, vector<16x256xf32>
    tpu.vector_store %arg9[%c0_58, %c0_59], %79 {strides = array<i32>} : memref<16x256xf32, #tpu.memory_space<vmem>>, vector<16x256xf32>,
    %c0_i32_60 = arith.constant 0 : i32
    %81 = arith.addi %1, %c0_i32_60 : i32
    %82 = tpu.assume_multiple %81, 8 : i32
    %c0_61 = arith.constant 0 : index
    %83 = arith.index_cast %82 : i32 to index
    %c0_62 = arith.constant 0 : index
    %84 = vector.load %arg2[%c0_61, %83, %c0_62] : memref<1x64x512xf32, #tpu.memory_space<vmem>>, vector<1x24x512xf32>
    %85 = vector.shape_cast %84 : vector<1x24x512xf32> to vector<24x512xf32>
    %86 = vector.extract_strided_slice %85 {offsets = [3, 0], sizes = [16, 512], strides = [1, 1]} : vector<24x512xf32> to vector<16x512xf32>
    %c0_63 = arith.constant 0 : index
    %c0_64 = arith.constant 0 : index
    %87 = vector.load %arg9[%c0_63, %c0_64] : memref<16x256xf32, #tpu.memory_space<vmem>>, vector<16x256xf32>
    %88 = arith.truncf %86 : vector<16x512xf32> to vector<16x512xbf16>
    %c6 = arith.constant 6 : index
    %c0_65 = arith.constant 0 : index
    %c0_66 = arith.constant 0 : index
    %89 = vector.load %arg3[%c6, %c0_65, %c0_66] : memref<9x512x256xbf16, #tpu.memory_space<vmem>>, vector<1x512x256xbf16>
    %90 = vector.shape_cast %89 : vector<1x512x256xbf16> to vector<512x256xbf16>
    %cst_67 = arith.constant dense<0.000000e+00> : vector<16x256xf32>
    %91 = tpu.matmul %88, %90, %cst_67 {dimension_numbers = #tpu.dot_dimension_numbers<[1], [0], [0], [1], [0, 0, 1, 1], [], []>} : vector<16x512xbf16>, vector<512x256xbf16>, vector<16x256xf32> -> vector<16x256xf32>
    %92 = arith.addf %87, %91 : vector<16x256xf32>
    %c0_68 = arith.constant 0 : index
    %c0_69 = arith.constant 0 : index
    %93 = vector.load %arg9[%c0_68, %c0_69] : memref<16x256xf32, #tpu.memory_space<vmem>>, vector<16x256xf32>
    tpu.vector_store %arg9[%c0_68, %c0_69], %92 {strides = array<i32>} : memref<16x256xf32, #tpu.memory_space<vmem>>, vector<16x256xf32>,
    %c0_i32_70 = arith.constant 0 : i32
    %94 = arith.addi %1, %c0_i32_70 : i32
    %95 = tpu.assume_multiple %94, 8 : i32
    %c0_71 = arith.constant 0 : index
    %96 = arith.index_cast %95 : i32 to index
    %c0_72 = arith.constant 0 : index
    %97 = vector.load %arg2[%c0_71, %96, %c0_72] : memref<1x64x512xf32, #tpu.memory_space<vmem>>, vector<1x24x512xf32>
    %98 = vector.shape_cast %97 : vector<1x24x512xf32> to vector<24x512xf32>
    %99 = vector.extract_strided_slice %98 {offsets = [4, 0], sizes = [16, 512], strides = [1, 1]} : vector<24x512xf32> to vector<16x512xf32>
    %c0_73 = arith.constant 0 : index
    %c0_74 = arith.constant 0 : index
    %100 = vector.load %arg9[%c0_73, %c0_74] : memref<16x256xf32, #tpu.memory_space<vmem>>, vector<16x256xf32>
    %101 = arith.truncf %99 : vector<16x512xf32> to vector<16x512xbf16>
    %c7 = arith.constant 7 : index
    %c0_75 = arith.constant 0 : index
    %c0_76 = arith.constant 0 : index
    %102 = vector.load %arg3[%c7, %c0_75, %c0_76] : memref<9x512x256xbf16, #tpu.memory_space<vmem>>, vector<1x512x256xbf16>
    %103 = vector.shape_cast %102 : vector<1x512x256xbf16> to vector<512x256xbf16>
    %cst_77 = arith.constant dense<0.000000e+00> : vector<16x256xf32>
    %104 = tpu.matmul %101, %103, %cst_77 {dimension_numbers = #tpu.dot_dimension_numbers<[1], [0], [0], [1], [0, 0, 1, 1], [], []>} : vector<16x512xbf16>, vector<512x256xbf16>, vector<16x256xf32> -> vector<16x256xf32>
    %105 = arith.addf %100, %104 : vector<16x256xf32>
    %c0_78 = arith.constant 0 : index
    %c0_79 = arith.constant 0 : index
    %106 = vector.load %arg9[%c0_78, %c0_79] : memref<16x256xf32, #tpu.memory_space<vmem>>, vector<16x256xf32>
    tpu.vector_store %arg9[%c0_78, %c0_79], %105 {strides = array<i32>} : memref<16x256xf32, #tpu.memory_space<vmem>>, vector<16x256xf32>,
    %c0_i32_80 = arith.constant 0 : i32
    %107 = arith.addi %1, %c0_i32_80 : i32
    %108 = tpu.assume_multiple %107, 8 : i32
    %c0_81 = arith.constant 0 : index
    %109 = arith.index_cast %108 : i32 to index
    %c0_82 = arith.constant 0 : index
    %110 = vector.load %arg2[%c0_81, %109, %c0_82] : memref<1x64x512xf32, #tpu.memory_space<vmem>>, vector<1x24x512xf32>
    %111 = vector.shape_cast %110 : vector<1x24x512xf32> to vector<24x512xf32>
    %112 = vector.extract_strided_slice %111 {offsets = [5, 0], sizes = [16, 512], strides = [1, 1]} : vector<24x512xf32> to vector<16x512xf32>
    %c0_83 = arith.constant 0 : index
    %c0_84 = arith.constant 0 : index
    %113 = vector.load %arg9[%c0_83, %c0_84] : memref<16x256xf32, #tpu.memory_space<vmem>>, vector<16x256xf32>
    %114 = arith.truncf %112 : vector<16x512xf32> to vector<16x512xbf16>
    %c8 = arith.constant 8 : index
    %c0_85 = arith.constant 0 : index
    %c0_86 = arith.constant 0 : index
    %115 = vector.load %arg3[%c8, %c0_85, %c0_86] : memref<9x512x256xbf16, #tpu.memory_space<vmem>>, vector<1x512x256xbf16>
    %116 = vector.shape_cast %115 : vector<1x512x256xbf16> to vector<512x256xbf16>
    %cst_87 = arith.constant dense<0.000000e+00> : vector<16x256xf32>
    %117 = tpu.matmul %114, %116, %cst_87 {dimension_numbers = #tpu.dot_dimension_numbers<[1], [0], [0], [1], [0, 0, 1, 1], [], []>} : vector<16x512xbf16>, vector<512x256xbf16>, vector<16x256xf32> -> vector<16x256xf32>
    %118 = arith.addf %113, %117 : vector<16x256xf32>
    %c0_88 = arith.constant 0 : index
    %c0_89 = arith.constant 0 : index
    %119 = vector.load %arg9[%c0_88, %c0_89] : memref<16x256xf32, #tpu.memory_space<vmem>>, vector<16x256xf32>
    tpu.vector_store %arg9[%c0_88, %c0_89], %118 {strides = array<i32>} : memref<16x256xf32, #tpu.memory_space<vmem>>, vector<16x256xf32>,
    %c0_90 = arith.constant 0 : index
    %c0_91 = arith.constant 0 : index
    %120 = vector.load %arg9[%c0_90, %c0_91] : memref<16x256xf32, #tpu.memory_space<vmem>>, vector<16x256xf32>
    %c0_92 = arith.constant 0 : index
    %c0_93 = arith.constant 0 : index
    %121 = vector.load %arg4[%c0_92, %c0_93] : memref<1x256xf32, #tpu.memory_space<vmem>>, vector<1x256xf32>
    %122 = vector.broadcast %121 : vector<1x256xf32> to vector<16x256xf32>
    %123 = arith.mulf %120, %122 : vector<16x256xf32>
    %c0_94 = arith.constant 0 : index
    %c0_95 = arith.constant 0 : index
    %124 = vector.load %arg5[%c0_94, %c0_95] : memref<1x256xf32, #tpu.memory_space<vmem>>, vector<1x256xf32>
    %125 = vector.broadcast %124 : vector<1x256xf32> to vector<16x256xf32>
    %126 = arith.addf %123, %125 : vector<16x256xf32>
    %cst_96 = arith.constant 0.000000e+00 : f32
    %127 = vector.broadcast %cst_96 : f32 to vector<16x256xf32>
    %128 = arith.maximumf %126, %127 : vector<16x256xf32>
    %129 = arith.truncf %128 : vector<16x256xf32> to vector<16x256xbf16>
    %c0_97 = arith.constant 0 : index
    %c0_98 = arith.constant 0 : index
    %130 = vector.load %arg6[%c0_97, %c0_98] : memref<256x128xbf16, #tpu.memory_space<vmem>>, vector<256x128xbf16>
    %cst_99 = arith.constant dense<0.000000e+00> : vector<16x128xf32>
    %131 = tpu.matmul %129, %130, %cst_99 {dimension_numbers = #tpu.dot_dimension_numbers<[1], [0], [0], [1], [0, 0, 1, 1], [], []>} : vector<16x256xbf16>, vector<256x128xbf16>, vector<16x128xf32> -> vector<16x128xf32>
    %c0_100 = arith.constant 0 : index
    %c0_101 = arith.constant 0 : index
    %132 = vector.load %arg7[%c0_100, %c0_101] : memref<1x128xf32, #tpu.memory_space<vmem>>, vector<1x128xf32>
    %133 = vector.broadcast %132 : vector<1x128xf32> to vector<16x128xf32>
    %134 = arith.addf %131, %133 : vector<16x128xf32>
    %c0_102 = arith.constant 0 : index
    %c0_103 = arith.constant 0 : index
    %c0_104 = arith.constant 0 : index
    %135 = vector.load %arg8[%c0_102, %c0_103, %c0_104] : memref<1x16x128xf32, #tpu.memory_space<vmem>>, vector<1x16x128xf32>
    %136 = vector.shape_cast %135 : vector<1x16x128xf32> to vector<16x128xf32>
    %137 = vector.shape_cast %134 : vector<16x128xf32> to vector<1x16x128xf32>
    tpu.vector_store %arg8[%c0_102, %c0_103, %c0_104], %137 {strides = array<i32>} : memref<1x16x128xf32, #tpu.memory_space<vmem>>, vector<1x16x128xf32>,
    return
  }
  func.func @transform_0(%arg0: i32, %arg1: i32) -> (i32, i32, i32) {
    %c0_i32 = arith.constant 0 : i32
    %c0_i32_0 = arith.constant 0 : i32
    %c0_i32_1 = arith.constant 0 : i32
    return %arg0, %c0_i32, %c0_i32_0 : i32, i32, i32
  }
  func.func @transform_1(%arg0: i32, %arg1: i32) -> (i32, i32, i32) {
    %c0_i32 = arith.constant 0 : i32
    %c0_i32_0 = arith.constant 0 : i32
    %c0_i32_1 = arith.constant 0 : i32
    %c0_i32_2 = arith.constant 0 : i32
    return %c0_i32, %c0_i32_0, %c0_i32_1 : i32, i32, i32
  }
  func.func @transform_2(%arg0: i32, %arg1: i32) -> (i32, i32) {
    %c0_i32 = arith.constant 0 : i32
    %c0_i32_0 = arith.constant 0 : i32
    %c0_i32_1 = arith.constant 0 : i32
    return %c0_i32, %c0_i32_0 : i32, i32
  }
  func.func @transform_3(%arg0: i32, %arg1: i32) -> (i32, i32) {
    %c0_i32 = arith.constant 0 : i32
    %c0_i32_0 = arith.constant 0 : i32
    %c0_i32_1 = arith.constant 0 : i32
    return %c0_i32, %c0_i32_0 : i32, i32
  }
  func.func @transform_4(%arg0: i32, %arg1: i32) -> (i32, i32) {
    %c0_i32 = arith.constant 0 : i32
    %c0_i32_0 = arith.constant 0 : i32
    %c0_i32_1 = arith.constant 0 : i32
    return %c0_i32, %c0_i32_0 : i32, i32
  }
  func.func @transform_5(%arg0: i32, %arg1: i32) -> (i32, i32) {
    %c0_i32 = arith.constant 0 : i32
    %c0_i32_0 = arith.constant 0 : i32
    %c0_i32_1 = arith.constant 0 : i32
    return %c0_i32, %c0_i32_0 : i32, i32
  }
  func.func @transform_6(%arg0: i32, %arg1: i32) -> (i32, i32, i32) {
    %c0_i32 = arith.constant 0 : i32
    %c0_i32_0 = arith.constant 0 : i32
    return %arg0, %arg1, %c0_i32 : i32, i32, i32
  }
}

</mosaic_0001>

<bundles_post_ra>
// kernel: _lambda_.2
= control target key start
LH: loop header
LB: loop body
LE: loop exit
PB: predicated region body
PF: predicated region fallthrough
CT: control target
= control target key end

     0   :  { %s1146_s15 = smov 0   ;;  %s1148_s16 = smov 0   ;;  %s1272_s0 = inlined_call_operand.vmem [shape: bf16[8,1280], index: 0, kind: input, shape index: {}]   ;;  %s1273_s1 = inlined_call_operand.vmem [shape: bf16[1280,512], index: 1, kind: input, shape index: {}]   ;;  %s1274_s2 = inlined_call_operand.vmem [shape: f32[1,512], index: 2, kind: input, shape index: {}]   ;;  %s1275_s3 = inlined_call_operand.vmem [shape: f32[1,512], index: 3, kind: input, shape index: {}]   ;;  %s1276_s4 = inlined_call_operand.vmem [shape: f32[8,512], index: 4, kind: output, shape index: {}]  }
   0x1   :  { %s1150_s17 = smov 0  }
   0x2 LB: > { %s23_s18 = sadd.s32 1, %s1114_s16  ;;  %p895_p0 = scmp.ge.s32.totalorder %s1118_s17, 1  ;;  %s1118_s17 = sphi %s1150_s17, %s14_s17   ;;  %s1114_s16 = sphi %s1148_s16, %s1278_s16   ;;  %s1110_s15 = sphi %s1146_s15, %s1277_s15  }
   0x3   : > { %p24_p1 = scmp.ge.s32.totalorder %s23_s18, 5  ;;  %p193_p2 = scmp.lt.s32.totalorder %s1118_s17, 6 }
   0x5   : > { %s1280_s18 = smov (%p24_p1, %s23_s18), 0  ;;  %p194_p3 = pnand %p895_p0, %p193_p2 }
   0x6   : > { %s896_s19 = sshll.u32 (!%p194_p3), %s1110_s15, 1  ;;  %s898_s20 = sshll.u32 (!%p194_p3), %s1110_s15, 5 }
   0x7   : > { %197 = sbr.rel (%p194_p3) target bundleno = 319 (0x13f), region = 36  ;;  %p232_p4 = scmp.lt.s32.totalorder (!%p194_p3), %s896_s19, 9 }
   0x8   : > { %p240_p5 = scmp.lt.s32.totalorder (!%p194_p3), %s898_s20, 159  ;;  %p901_p6 = scmp.ne.s32.totalorder (!%p194_p3), %s1110_s15, 0 }
   0xe   : > { %s1282_s19 = smov (!%p232_p4, %s896_s19), 9  ;;  %s1284_s20 = smov (!%p240_p5, %s898_s20), 159 }
   0xf   : > { %s897_s21 = sshll.u32 %s1282_s19, 2  ;;  %s972_s25 = sshll.u32 %s1284_s20, 4  ;;  %v1120_v0 = vmov (!%p901_p6), 0.0  }
  0x10   : > { %s1171_s24 = scalar_lea.vmem %s1272_s0, %s897_s21  ;;  %s1176_s28 = scalar_lea.vmem %s1273_s1, %s972_s25  ;;  %255 = vst [vmem:[#allocation2] sm:$0xff] (!%p901_p6), %v1120_v0  ;;  %256 = vst [vmem:[#allocation2 + $0x8] sm:$0xff] (!%p901_p6), %v1120_v0 }
  0x11   : > { %254 = sbr.rel (%p901_p6) target bundleno = 24 (0x18), region = 40  ;;  %257 = vst [vmem:[#allocation2 + $0x10] sm:$0xff] (!%p901_p6), %v1120_v0  ;;  %258 = vst [vmem:[#allocation2 + $0x18] sm:$0xff] (!%p901_p6), %v1120_v0 }
  0x18 PF: > { %v998_v1 = vld [vmem:[%s1176_s28 + $0x4] ss:$16 sps:$4 sm:$0xff]   ;;  %v1000_v2 = vld [vmem:[%s1176_s28 + $0xc] ss:$16 sps:$4 sm:$0xff]   ;;  %v1002_v3 = vld [vmem:[%s1176_s28] ss:$16 sps:$4 sm:$0xff]  }
  0x19   : > { %655 = vmatprep.subr.bf16.mxu0 %v998_v1  ;;  %v1003_v4 = vld [vmem:[%s1176_s28 + $0x8] ss:$16 sps:$4 sm:$0xff]   ;;  %696 = vmatprep.subr.bf16.mxu1 %v1000_v2  ;;  %v1004_v5 = vld [vmem:[%s1176_s28 + $0x24] ss:$16 sps:$4 sm:$0xff]   ;;  %v1006_v6 = vld [vmem:[%s1176_s28 + $0x2c] ss:$16 sps:$4 sm:$0xff]  }
  0x1a   : > { %656 = vmatpush1.bf16.msra.mxu0 %v1002_v3  ;;  %697 = vmatpush1.bf16.msra.mxu1 %v1003_v4  ;;  %v1008_v7 = vld [vmem:[%s1176_s28 + $0x20] ss:$16 sps:$4 sm:$0xff]   ;;  %v1009_v8 = vld [vmem:[%s1176_s28 + $0x28] ss:$16 sps:$4 sm:$0xff]   ;;  %v1010_v9 = vld [vmem:[%s1176_s28 + $0x44] ss:$16 sps:$4 sm:$0xff]  }
  0x1b   : > { %657 = vmatprep.subr.bf16.mxu0 %v1004_v5  ;;  %698 = vmatprep.subr.bf16.mxu1 %v1006_v6  ;;  %v1012_v10 = vld [vmem:[%s1176_s28 + $0x4c] ss:$16 sps:$4 sm:$0xff]   ;;  %v1014_v11 = vld [vmem:[%s1176_s28 + $0x40] ss:$16 sps:$4 sm:$0xff]   ;;  %v1015_v12 = vld [vmem:[%s1176_s28 + $0x48] ss:$16 sps:$4 sm:$0xff]  }
  0x1c   : > { %v1016_v13 = vld [vmem:[%s1176_s28 + $0x64] ss:$16 sps:$4 sm:$0xff]   ;;  %v1018_v14 = vld [vmem:[%s1176_s28 + $0x6c] ss:$16 sps:$4 sm:$0xff]   ;;  %v1020_v15 = vld [vmem:[%s1176_s28 + $0x60] ss:$16 sps:$4 sm:$0xff]  }
  0x1d   : > { %v1021_v16 = vld [vmem:[%s1176_s28 + $0x68] ss:$16 sps:$4 sm:$0xff]   ;;  %v1022_v17 = vld [vmem:[%s1176_s28 + $0x84] ss:$16 sps:$4 sm:$0xff]   ;;  %v1024_v18 = vld [vmem:[%s1176_s28 + $0x8c] ss:$16 sps:$4 sm:$0xff]  }
  0x1e   : > { %658 = vmatpush1.bf16.msra.mxu0 %v1008_v7  ;;  %699 = vmatpush1.bf16.msra.mxu1 %v1009_v8  ;;  %v1026_v19 = vld [vmem:[%s1176_s28 + $0x80] ss:$16 sps:$4 sm:$0xff]   ;;  %v1027_v20 = vld [vmem:[%s1176_s28 + $0x88] ss:$16 sps:$4 sm:$0xff]   ;;  %v1028_v21 = vld [vmem:[%s1176_s28 + $0xa4] ss:$16 sps:$4 sm:$0xff]  }
  0x1f   : > { %659 = vmatprep.subr.bf16.mxu0 %v1010_v9  ;;  %700 = vmatprep.subr.bf16.mxu1 %v1012_v10  ;;  %v1030_v22 = vld [vmem:[%s1176_s28 + $0xac] ss:$16 sps:$4 sm:$0xff]   ;;  %v1032_v23 = vld [vmem:[%s1176_s28 + $0xa0] ss:$16 sps:$4 sm:$0xff]   ;;  %v1033_v24 = vld [vmem:[%s1176_s28 + $0xa8] ss:$16 sps:$4 sm:$0xff]  }
  0x20   : > { %v1034_v25 = vld [vmem:[%s1176_s28 + $0xc4] ss:$16 sps:$4 sm:$0xff]   ;;  %v1036_v26 = vld [vmem:[%s1176_s28 + $0xcc] ss:$16 sps:$4 sm:$0xff]   ;;  %v1038_v27 = vld [vmem:[%s1176_s28 + $0xc0] ss:$16 sps:$4 sm:$0xff]  }
  0x21   : > { %v1039_v28 = vld [vmem:[%s1176_s28 + $0xc8] ss:$16 sps:$4 sm:$0xff]   ;;  %v1040_v29 = vld [vmem:[%s1176_s28 + $0xe4] ss:$16 sps:$4 sm:$0xff]   ;;  %v1042_v30 = vld [vmem:[%s1176_s28 + $0xec] ss:$16 sps:$4 sm:$0xff]  }
  0x22   : > { %660 = vmatpush1.bf16.msra.mxu0 %v1014_v11  ;;  %701 = vmatpush1.bf16.msra.mxu1 %v1015_v12  ;;  %v1044_v31 = vld [vmem:[%s1176_s28 + $0xe0] ss:$16 sps:$4 sm:$0xff]   ;;  %v1045_v32 = vld [vmem:[%s1176_s28 + $0xe8] ss:$16 sps:$4 sm:$0xff]   ;;  %v1046_v33 = vld [vmem:[%s1176_s28 + $0x104] ss:$16 sps:$4 sm:$0xff]  }
  0x23   : > { %661 = vmatprep.subr.bf16.mxu0 %v1016_v13  ;;  %702 = vmatprep.subr.bf16.mxu1 %v1018_v14  ;;  %v1048_v34 = vld [vmem:[%s1176_s28 + $0x10c] ss:$16 sps:$4 sm:$0xff]   ;;  %v1050_v35 = vld [vmem:[%s1176_s28 + $0x100] ss:$16 sps:$4 sm:$0xff]   ;;  %v1051_v36 = vld [vmem:[%s1176_s28 + $0x108] ss:$16 sps:$4 sm:$0xff]  }
  0x24   : > { %v1052_v37 = vld [vmem:[%s1176_s28 + $0x124] ss:$16 sps:$4 sm:$0xff]   ;;  %v1054_v38 = vld [vmem:[%s1176_s28 + $0x12c] ss:$16 sps:$4 sm:$0xff]   ;;  %v1056_v39 = vld [vmem:[%s1176_s28 + $0x120] ss:$16 sps:$4 sm:$0xff]  }
  0x25   : > { %v1057_v40 = vld [vmem:[%s1176_s28 + $0x128] ss:$16 sps:$4 sm:$0xff]   ;;  %v1058_v41 = vld [vmem:[%s1176_s28 + $0x144] ss:$16 sps:$4 sm:$0xff]   ;;  %v1060_v42 = vld [vmem:[%s1176_s28 + $0x14c] ss:$16 sps:$4 sm:$0xff]  }
  0x26   : > { %662 = vmatpush1.bf16.msra.mxu0 %v1020_v15  ;;  %703 = vmatpush1.bf16.msra.mxu1 %v1021_v16  ;;  %v1062_v43 = vld [vmem:[%s1176_s28 + $0x140] ss:$16 sps:$4 sm:$0xff]   ;;  %v1063_v44 = vld [vmem:[%s1176_s28 + $0x148] ss:$16 sps:$4 sm:$0xff]   ;;  %v1064_v45 = vld [vmem:[%s1176_s28 + $0x164] ss:$16 sps:$4 sm:$0xff]  }
  0x27   : > { %663 = vmatprep.subr.bf16.mxu0 %v1022_v17  ;;  %704 = vmatprep.subr.bf16.mxu1 %v1024_v18  ;;  %v1066_v46 = vld [vmem:[%s1176_s28 + $0x16c] ss:$16 sps:$4 sm:$0xff]   ;;  %v263_v47 = vld [vmem:[%s1171_s24] sm:$0xff]  ;;  %v1069_v50 = vld [vmem:[%s1176_s28 + $0x168] ss:$16 sps:$4 sm:$0xff]   ;;  %p968_p7 = scmp.ne.s32.totalorder %s1110_s15, 4 }
  0x28   : > { %v903_v48 = vcombine.high %v263_v47, %v263_v47  ;;  %v1068_v49 = vld [vmem:[%s1176_s28 + $0x160] ss:$16 sps:$4 sm:$0xff]   ;;  %v1070_v51 = vld [vmem:[%s1176_s28 + $0x184] ss:$16 sps:$4 sm:$0xff]   ;;  %v1072_v52 = vld [vmem:[%s1176_s28 + $0x18c] ss:$16 sps:$4 sm:$0xff]   ;;  %v902_v3 = vcombine.low %v263_v47, %v263_v47 }
  0x29   : > { %v1074_v53 = vld [vmem:[%s1176_s28 + $0x180] ss:$16 sps:$4 sm:$0xff]   ;;  %v1075_v54 = vld [vmem:[%s1176_s28 + $0x188] ss:$16 sps:$4 sm:$0xff]   ;;  %v1076_v55 = vld [vmem:[%s1176_s28 + $0x1a4] ss:$16 sps:$4 sm:$0xff]  }
  0x2a   : > { %664 = vmatpush1.bf16.msra.mxu0 %v1026_v19  ;;  %705 = vmatpush1.bf16.msra.mxu1 %v1027_v20  ;;  %v1078_v56 = vld [vmem:[%s1176_s28 + $0x1ac] ss:$16 sps:$4 sm:$0xff]   ;;  %v1080_v57 = vld [vmem:[%s1176_s28 + $0x1a0] ss:$16 sps:$4 sm:$0xff]   ;;  %v1081_v58 = vld [vmem:[%s1176_s28 + $0x1a8] ss:$16 sps:$4 sm:$0xff]   ;;  %v755_v20 = vlaneseq (!%p968_p7) }
  0x2b   : > { %665 = vmatprep.subr.bf16.mxu0 %v1028_v21  ;;  %706 = vmatprep.subr.bf16.mxu1 %v1030_v22  ;;  %v1082_v59 = vld [vmem:[%s1176_s28 + $0x1c4] ss:$16 sps:$4 sm:$0xff]   ;;  %v1084_v60 = vld [vmem:[%s1176_s28 + $0x1cc] ss:$16 sps:$4 sm:$0xff]   ;;  %v1086_v61 = vld [vmem:[%s1176_s28 + $0x1c0] ss:$16 sps:$4 sm:$0xff]  }
  0x2c   : > { %687 = vmatprep.mubr.bf16.mxu0 %v903_v48  ;;  %728 = vmatprep.mubr.bf16.mxu1 %v903_v48  ;;  %v1087_v62 = vld [vmem:[%s1176_s28 + $0x1c8] ss:$16 sps:$4 sm:$0xff]   ;;  %v1088_v63 = vld [vmem:[%s1176_s28 + $0x1e4] ss:$16 sps:$4 sm:$0xff]   ;;  %v1090_v0 = vld [vmem:[%s1176_s28 + $0x1ec] ss:$16 sps:$4 sm:$0xff]  }
  0x2d   : > { %v1092_v1 = vld [vmem:[%s1176_s28 + $0x1e0] ss:$16 sps:$4 sm:$0xff]   ;;  %v1093_v2 = vld [vmem:[%s1176_s28 + $0x1e8] ss:$16 sps:$4 sm:$0xff]   ;;  %v756_v21 = vshrl.u32 (!%p968_p7), %v755_v20, 7 }
  0x2e   : > { %666 = vmatpush1.bf16.msra.mxu0 %v1032_v23  ;;  %707 = vmatpush1.bf16.msra.mxu1 %v1033_v24  ;;  %v259_v4 = vld [vmem:[#allocation2] sm:$0xff]  ;;  %v261_v5 = vld [vmem:[#allocation2 + $0x10] sm:$0xff]  ;;  %v260_v6 = vld [vmem:[#allocation2 + $0x8] sm:$0xff] }
  0x2f   : > { %667 = vmatprep.subr.bf16.mxu0 %v1034_v25  ;;  %708 = vmatprep.subr.bf16.mxu1 %v1036_v26  ;;  %v262_v7 = vld [vmem:[#allocation2 + $0x18] sm:$0xff]  ;;  %v753_v22 = vld [vmem:[%s1274_s2] sm:$0xf] (!%p968_p7)  ;;  %v757_v24 = vsub.s32 (!%p968_p7), 0, %v756_v21  ;;  %v761_v25 = vsub.s32 (!%p968_p7), 1, %v756_v21  ;;  %v765_v26 = vsub.s32 (!%p968_p7), 2, %v756_v21 }
  0x30   : > { %v779_v23 = vld [vmem:[%s1275_s3] sm:$0xf] (!%p968_p7) }
  0x32   : > { %668 = vmatpush1.bf16.msra.mxu0 %v1038_v27  ;;  %709 = vmatpush1.bf16.msra.mxu1 %v1039_v28  ;;  %v769_v27 = vsub.s32 (!%p968_p7), 3, %v756_v21 }
  0x33   : > { %669 = vmatprep.subr.bf16.mxu0 %v1040_v29  ;;  %710 = vmatprep.subr.bf16.mxu1 %v1042_v30  ;;  %v758_v30 = vrot.slane (!%p968_p7), %v753_v22, %v757_v24 }
  0x36   : > { %670 = vmatpush1.bf16.msra.mxu0 %v1044_v31  ;;  %711 = vmatpush1.bf16.msra.mxu1 %v1045_v32  ;;  %v784_v31 = vrot.slane (!%p968_p7), %v779_v23, %v757_v24  ;;  %v762_v32 = vrot.slane (!%p968_p7), %v753_v22, %v761_v25 }
  0x37   : > { %671 = vmatprep.subr.bf16.mxu0 %v1046_v33  ;;  %712 = vmatprep.subr.bf16.mxu1 %v1048_v34  ;;  %v788_v33 = vrot.slane (!%p968_p7), %v779_v23, %v761_v25 }
  0x3a   : > { %672 = vmatpush1.bf16.msra.mxu0 %v1050_v35  ;;  %713 = vmatpush1.bf16.msra.mxu1 %v1051_v36  ;;  %v766_v36 = vrot.slane (!%p968_p7), %v753_v22, %v765_v26 }
  0x3b   : > { %673 = vmatprep.subr.bf16.mxu0 %v1052_v37  ;;  %714 = vmatprep.subr.bf16.mxu1 %v1054_v38  ;;  %v792_v37 = vrot.slane (!%p968_p7), %v779_v23, %v765_v26  ;;  %v770_v38 = vrot.slane (!%p968_p7), %v753_v22, %v769_v27 }
  0x3e   : > { %674 = vmatpush1.bf16.msra.mxu0 %v1056_v39  ;;  %715 = vmatpush1.bf16.msra.mxu1 %v1057_v40  ;;  %v796_v39 = vrot.slane (!%p968_p7), %v779_v23, %v769_v27 }
  0x3f   : > { %675 = vmatprep.subr.bf16.mxu0 %v1058_v41  ;;  %716 = vmatprep.subr.bf16.mxu1 %v1060_v42 }
  0x42   : > { %676 = vmatpush1.bf16.msra.mxu0 %v1062_v43  ;;  %717 = vmatpush1.bf16.msra.mxu1 %v1063_v44 }
  0x43   : > { %677 = vmatprep.subr.bf16.mxu0 %v1064_v45  ;;  %718 = vmatprep.subr.bf16.mxu1 %v1066_v46 }
  0x46   : > { %678 = vmatpush1.bf16.msra.mxu0 %v1068_v49  ;;  %719 = vmatpush1.bf16.msra.mxu1 %v1069_v50 }
  0x47   : > { %679 = vmatprep.subr.bf16.mxu0 %v1070_v51  ;;  %720 = vmatprep.subr.bf16.mxu1 %v1072_v52 }
  0x4a   : > { %680 = vmatpush1.bf16.msra.mxu0 %v1074_v53  ;;  %721 = vmatpush1.bf16.msra.mxu1 %v1075_v54 }
  0x4b   : > { %681 = vmatprep.subr.bf16.mxu0 %v1076_v55  ;;  %722 = vmatprep.subr.bf16.mxu1 %v1078_v56 }
  0x4e   : > { %682 = vmatpush1.bf16.msra.mxu0 %v1080_v57  ;;  %723 = vmatpush1.bf16.msra.mxu1 %v1081_v58 }
  0x4f   : > { %683 = vmatprep.subr.bf16.mxu0 %v1082_v59  ;;  %724 = vmatprep.subr.bf16.mxu1 %v1084_v60 }
  0x52   : > { %684 = vmatpush1.bf16.msra.mxu0 %v1086_v61  ;;  %725 = vmatpush1.bf16.msra.mxu1 %v1087_v62 }
  0x53   : > { %685 = vmatprep.subr.bf16.mxu0 %v1088_v63  ;;  %726 = vmatprep.subr.bf16.mxu1 %v1090_v0 }
  0x56   : > { %686 = vmatpush1.bf16.msra.mxu0 %v1092_v1  ;;  %727 = vmatpush1.bf16.msra.mxu1 %v1093_v2 }
  0x59   : > { %688 = vmatmul.mubr.bf16.vlgmr.msra.gmra.mrb[0].mxu0 %v902_v3  ;;  %729 = vmatmul.mubr.bf16.vlgmr.msra.gmra.mrb[0].mxu1 %v902_v3 }
 0x12a   : > { %748 = sbr.rel (%p968_p7) target bundleno = 319 (0x13f), region = 44 }
 0x12c   : > { %v689_v8 = vpop.f32.mrb[0].mxu0  ;;  %v730_v9 = vpop.f32.mrb[0].mxu1 }
 0x12d   : > { %v737_v10 = vadd.f32 %v689_v8, %v259_v4  ;;  %v739_v11 = vadd.f32 %v730_v9, %v261_v5  ;;  %v691_v12 = vpop.f32.mrb[1].mxu0  ;;  %v732_v13 = vpop.f32.mrb[1].mxu1 }
 0x12e   : > { %v738_v14 = vadd.f32 %v691_v12, %v260_v6  ;;  %v740_v15 = vadd.f32 %v732_v13, %v262_v7  ;;  %v693_v16 = vpop.f32.mrb[2].mxu0  ;;  %v734_v17 = vpop.f32.mrb[2].mxu1 }
 0x12f   : > { %741 = vst [vmem:[#allocation2] sm:$0xff] %v737_v10  ;;  %743 = vst [vmem:[#allocation2 + $0x10] sm:$0xff] %v739_v11  ;;  %v694_v18 = vpop.f32.mrb[3].mxu0  ;;  %v735_v19 = vpop.f32.mrb[3].mxu1 }
 0x130   : > { %742 = vst [vmem:[#allocation2 + $0x8] sm:$0xff] %v738_v14  ;;  %744 = vst [vmem:[#allocation2 + $0x18] sm:$0xff] %v740_v15 }
 0x136   : > { %v749_v28 = vld [vmem:[#allocation2] sm:$0xff]  ;;  %v751_v34 = vld [vmem:[#allocation2 + $0x10] sm:$0xff] }
 0x137   : > { %v750_v29 = vld [vmem:[#allocation2 + $0x8] sm:$0xff]  ;;  %v752_v35 = vld [vmem:[#allocation2 + $0x18] sm:$0xff]  ;;  %v775_v40 = vmul.f32 %v758_v30, %v749_v28  ;;  %v777_v42 = vmul.f32 %v766_v36, %v751_v34 }
 0x138   : > { %v776_v41 = vmul.f32 %v762_v32, %v750_v29  ;;  %v778_v43 = vmul.f32 %v770_v38, %v752_v35 }
 0x139   : > { %v801_v44 = vadd.f32 %v784_v31, %v775_v40  ;;  %v803_v46 = vadd.f32 %v792_v37, %v777_v42 }
 0x13a   : > { %v802_v45 = vadd.f32 %v788_v33, %v776_v41  ;;  %v804_v47 = vadd.f32 %v796_v39, %v778_v43 }
 0x13b   : > { %v805_v48 = vmax.f32 %v801_v44, 0.0  ;;  %v807_v50 = vmax.f32 %v803_v46, 0.0 }
 0x13c   : > { %v806_v49 = vmax.f32 %v802_v45, 0.0  ;;  %v808_v51 = vmax.f32 %v804_v47, 0.0 }
 0x13d   : > { %809 = vst [vmem:[%s1276_s4] sm:$0xff] %v805_v48  ;;  %811 = vst [vmem:[%s1276_s4 + $0x10] sm:$0xff] %v807_v50 }
 0x13e   : > { %810 = vst [vmem:[%s1276_s4 + $0x8] sm:$0xff] %v806_v49  ;;  %812 = vst [vmem:[%s1276_s4 + $0x18] sm:$0xff] %v808_v51 }
 0x13f PF: > { %s14_s17 = sadd.s32 1, %s1118_s17   ;;  %s1277_s15 = smov %s1114_s16 }
 0x140   : > { %p11_p8 = scmp.ge.s32.totalorder %s14_s17, 7   ;;  %s1278_s16 = smov %s1280_s18 }
 0x142   :  { %13 = sbr.rel (!%p11_p8) target bundleno = 2 (0x2), region = 77 }

// kernel: _lambda_.3
= control target key start
LH: loop header
LB: loop body
LE: loop exit
PB: predicated region body
PF: predicated region fallthrough
CT: control target
= control target key end

     0   :  { %s7860_s21 = smov 0   ;;  %s7862_s22 = smov 0   ;;  %s10032_s0 = inlined_call_operand.vmem [shape: f32[2,64,512], index: 0, kind: input, shape index: {}]   ;;  %s10033_s1 = inlined_call_operand.vmem [shape: bf16[9,512,256], index: 1, kind: input, shape index: {}]   ;;  %s10034_s2 = inlined_call_operand.vmem [shape: f32[1,256], index: 2, kind: input, shape index: {}]   ;;  %s10035_s3 = inlined_call_operand.vmem [shape: f32[1,256], index: 3, kind: input, shape index: {}]   ;;  %s10036_s4 = inlined_call_operand.vmem [shape: bf16[256,128], index: 4, kind: input, shape index: {}]   ;;  %s10037_s5 = inlined_call_operand.vmem [shape: f32[1,128], index: 5, kind: input, shape index: {}]   ;;  %s10038_s6 = inlined_call_operand.vmem [shape: f32[2,16,128], index: 6, kind: output, shape index: {}]  }
   0x1   :  { %s7864_s23 = smov 0  }
   0x2 LB: > { %s28_s24 = sadd.s32 1, %s7819_s22  ;;  %p5585_p0 = scmp.ge.s32.totalorder %s7823_s23, 1  ;;  %s7823_s23 = sphi %s7864_s23, %s16_s23   ;;  %s7819_s22 = sphi %s7862_s22, %s10040_s22   ;;  %s7815_s21 = sphi %s7860_s21, %s10039_s21  }
   0x3   : > { %p30_p1 = scmp.ge.s32.totalorder %s28_s24, 2  ;;  %p226_p2 = scmp.lt.s32.totalorder %s7823_s23, 3 }
   0x5   : > { %s10042_s24 = smov (%p30_p1, %s28_s24), 0  ;;  %p227_p3 = pnand %p5585_p0, %p226_p2 }
   0x6   : > { %v6917_v0 = vld [vmem:[%s10033_s1 + $0x4] ss:$8 sps:$4 sm:$0xff] (!%p227_p3)   ;;  %v6921_v2 = vld [vmem:[%s10033_s1] ss:$8 sps:$4 sm:$0xff] (!%p227_p3)   ;;  %v6923_v4 = vld [vmem:[%s10033_s1 + $0x14] ss:$8 sps:$4 sm:$0xff] (!%p227_p3)  }
   0x7   : > { %230 = sbr.rel (%p227_p3) target bundleno = 1030 (0x406), region = 44  ;;  %v6919_v1 = vld [vmem:[%s10033_s1 + $0x904] ss:$8 sps:$4 sm:$0xff] (!%p227_p3)   ;;  %769 = vmatprep.subr.bf16.mxu1 (!%p227_p3), %v6917_v0  ;;  %v6922_v3 = vld [vmem:[%s10033_s1 + $0x900] ss:$8 sps:$4 sm:$0xff] (!%p227_p3)   ;;  %p260_p4 = scmp.lt.s32.totalorder (!%p227_p3), %s7815_s21, 1 }
   0x8   : > { %2992 = vmatprep.subr.bf16.mxu0 (!%p227_p3), %v6919_v1  ;;  %770 = vmatpush1.bf16.msra.mxu1 (!%p227_p3), %v6921_v2  ;;  %v6925_v5 = vld [vmem:[%s10033_s1 + $0x914] ss:$8 sps:$4 sm:$0xff] (!%p227_p3)   ;;  %v6927_v6 = vld [vmem:[%s10033_s1 + $0x10] ss:$8 sps:$4 sm:$0xff] (!%p227_p3)   ;;  %v6929_v8 = vld [vmem:[%s10033_s1 + $0x24] ss:$8 sps:$4 sm:$0xff] (!%p227_p3)  }
   0x9   : > { %2993 = vmatpush1.bf16.msra.mxu0 (!%p227_p3), %v6922_v3  ;;  %771 = vmatprep.subr.bf16.mxu1 (!%p227_p3), %v6923_v4  ;;  %v6928_v7 = vld [vmem:[%s10033_s1 + $0x910] ss:$8 sps:$4 sm:$0xff] (!%p227_p3)   ;;  %v6931_v9 = vld [vmem:[%s10033_s1 + $0x924] ss:$8 sps:$4 sm:$0xff] (!%p227_p3)   ;;  %v6933_v10 = vld [vmem:[%s10033_s1 + $0x20] ss:$8 sps:$4 sm:$0xff] (!%p227_p3)  }
   0xa   : > { %2994 = vmatprep.subr.bf16.mxu0 (!%p227_p3), %v6925_v5  ;;  %v6934_v11 = vld [vmem:[%s10033_s1 + $0x920] ss:$8 sps:$4 sm:$0xff] (!%p227_p3)   ;;  %v6935_v12 = vld [vmem:[%s10033_s1 + $0x34] ss:$8 sps:$4 sm:$0xff] (!%p227_p3)   ;;  %v6939_v14 = vld [vmem:[%s10033_s1 + $0x30] ss:$8 sps:$4 sm:$0xff] (!%p227_p3)  }
   0xb   : > { %v6937_v13 = vld [vmem:[%s10033_s1 + $0x934] ss:$8 sps:$4 sm:$0xff] (!%p227_p3)   ;;  %v6940_v15 = vld [vmem:[%s10033_s1 + $0x930] ss:$8 sps:$4 sm:$0xff] (!%p227_p3)   ;;  %v6941_v16 = vld [vmem:[%s10033_s1 + $0x44] ss:$8 sps:$4 sm:$0xff] (!%p227_p3)  }
   0xc   : > { %772 = vmatpush1.bf16.msra.mxu1 (!%p227_p3), %v6927_v6  ;;  %v6943_v17 = vld [vmem:[%s10033_s1 + $0x944] ss:$8 sps:$4 sm:$0xff] (!%p227_p3)   ;;  %v6945_v18 = vld [vmem:[%s10033_s1 + $0x40] ss:$8 sps:$4 sm:$0xff] (!%p227_p3)   ;;  %v6947_v20 = vld [vmem:[%s10033_s1 + $0x54] ss:$8 sps:$4 sm:$0xff] (!%p227_p3)  }
   0xd   : > { %2995 = vmatpush1.bf16.msra.mxu0 (!%p227_p3), %v6928_v7  ;;  %773 = vmatprep.subr.bf16.mxu1 (!%p227_p3), %v6929_v8  ;;  %v6946_v19 = vld [vmem:[%s10033_s1 + $0x940] ss:$8 sps:$4 sm:$0xff] (!%p227_p3)   ;;  %v6949_v21 = vld [vmem:[%s10033_s1 + $0x954] ss:$8 sps:$4 sm:$0xff] (!%p227_p3)   ;;  %v6951_v22 = vld [vmem:[%s10033_s1 + $0x50] ss:$8 sps:$4 sm:$0xff] (!%p227_p3)  }
   0xe   : > { %2996 = vmatprep.subr.bf16.mxu0 %v6931_v9  ;;  %v6952_v23 = vld [vmem:[%s10033_s1 + $0x950] ss:$8 sps:$4 sm:$0xff]   ;;  %v6953_v24 = vld [vmem:[%s10033_s1 + $0x64] ss:$8 sps:$4 sm:$0xff]   ;;  %v6957_v26 = vld [vmem:[%s10033_s1 + $0x60] ss:$8 sps:$4 sm:$0xff]  }
   0xf   : > { %v6955_v25 = vld [vmem:[%s10033_s1 + $0x964] ss:$8 sps:$4 sm:$0xff]   ;;  %v6958_v27 = vld [vmem:[%s10033_s1 + $0x960] ss:$8 sps:$4 sm:$0xff]   ;;  %v6959_v28 = vld [vmem:[%s10033_s1 + $0x74] ss:$8 sps:$4 sm:$0xff]  }
  0x10   : > { %774 = vmatpush1.bf16.msra.mxu1 %v6933_v10  ;;  %v6961_v29 = vld [vmem:[%s10033_s1 + $0x974] ss:$8 sps:$4 sm:$0xff]   ;;  %v6963_v30 = vld [vmem:[%s10033_s1 + $0x70] ss:$8 sps:$4 sm:$0xff]   ;;  %v6965_v32 = vld [vmem:[%s10033_s1 + $0x84] ss:$8 sps:$4 sm:$0xff]  }
  0x11   : > { %2997 = vmatpush1.bf16.msra.mxu0 %v6934_v11  ;;  %775 = vmatprep.subr.bf16.mxu1 %v6935_v12  ;;  %v6964_v31 = vld [vmem:[%s10033_s1 + $0x970] ss:$8 sps:$4 sm:$0xff]   ;;  %v6967_v33 = vld [vmem:[%s10033_s1 + $0x984] ss:$8 sps:$4 sm:$0xff]   ;;  %v6969_v34 = vld [vmem:[%s10033_s1 + $0x80] ss:$8 sps:$4 sm:$0xff]  }
  0x12   : > { %2998 = vmatprep.subr.bf16.mxu0 %v6937_v13  ;;  %v6970_v35 = vld [vmem:[%s10033_s1 + $0x980] ss:$8 sps:$4 sm:$0xff]   ;;  %v6971_v36 = vld [vmem:[%s10033_s1 + $0x94] ss:$8 sps:$4 sm:$0xff]   ;;  %s10044_s21 = smov (!%p260_p4, %s7815_s21), 1  ;;  %vm960_vm1 = vcmask 1045504  }
  0x13   : > { %v6973_v37 = vld [vmem:[%s10033_s1 + $0x994] ss:$8 sps:$4 sm:$0xff]   ;;  %v6975_v38 = vld [vmem:[%s10033_s1 + $0x90] ss:$8 sps:$4 sm:$0xff]   ;;  %v6977_v40 = vld [vmem:[%s10033_s1 + $0xa4] ss:$8 sps:$4 sm:$0xff]  }
  0x14   : > { %776 = vmatpush1.bf16.msra.mxu1 %v6939_v14  ;;  %v6976_v39 = vld [vmem:[%s10033_s1 + $0x990] ss:$8 sps:$4 sm:$0xff]   ;;  %s6801_s27 = sshll.u32 %s10044_s21, 8  ;;  %v6979_v41 = vld [vmem:[%s10033_s1 + $0x9a4] ss:$8 sps:$4 sm:$0xff]   ;;  %s6802_s8 = sshll.u32 %s10044_s21, 4 }
  0x15   : > { %2999 = vmatpush1.bf16.msra.mxu0 %v6940_v15  ;;  %777 = vmatprep.subr.bf16.mxu1 %v6941_v16  ;;  %v6981_v42 = vld [vmem:[%s10033_s1 + $0xa0] ss:$8 sps:$4 sm:$0xff]   ;;  %s8020_s12 = scalar_lea.vmem %s10032_s0, %s6801_s27  ;;  %v6983_v44 = vld [vmem:[%s10033_s1 + $0xb4] ss:$8 sps:$4 sm:$0xff]   ;;  %v6987_v46 = vld [vmem:[%s10033_s1 + $0xb0] ss:$8 sps:$4 sm:$0xff]   ;;  %s273_s14 = scalar_lea.vmem %s10038_s6, %s6802_s8 }
  0x16   : > { %3000 = vmatprep.subr.bf16.mxu0 %v6943_v17  ;;  %v6982_v43 = vld [vmem:[%s10033_s1 + $0x9a0] ss:$8 sps:$4 sm:$0xff]   ;;  %v6985_v45 = vld [vmem:[%s10033_s1 + $0x9b4] ss:$8 sps:$4 sm:$0xff]   ;;  %v6988_v47 = vld [vmem:[%s10033_s1 + $0x9b0] ss:$8 sps:$4 sm:$0xff]  }
  0x17   : > { %v5591_v48 = vld [vmem:[%s8020_s12 + $0x48] sm:$0xff]  ;;  %v8055_v55 = vld [vmem:[%s8020_s12 + $0x78] sm:$0xff]  ;;  %v5590_v62 = vld [vmem:[%s8020_s12 + $0x40] sm:$0xff]  ;;  %vm376_vm0 = vsmask.f32 6400 }
  0x18   : > { %778 = vmatpush1.bf16.msra.mxu1 %v6945_v18  ;;  %v8036_v49 = vld [vmem:[%s8020_s12 + $0x68] sm:$0xff]  ;;  %v8058_v56 = vld [vmem:[%s8020_s12 + $0x98] sm:$0xff]  ;;  %v5594_v2 = vld [vmem:[%s8020_s12 + $0x60] sm:$0xff]  ;;  %vm3132_vm2 = vsmask.f32 7424 }
  0x19   : > { %3001 = vmatpush1.bf16.msra.mxu0 %v6946_v19  ;;  %779 = vmatprep.subr.bf16.mxu1 %v6947_v20  ;;  %v8039_v50 = vld [vmem:[%s8020_s12 + $0x88] sm:$0xff]  ;;  %v8048_v53 = vpack.c.bf16 %v8036_v49, %v5591_v48  ;;  %v6995_v0 = vld [vmem:[%s10033_s1 + $0xd4] ss:$8 sps:$4 sm:$0xff]   ;;  %v8076_v1 = vpack.c.bf16 %v8058_v56, %v8055_v55  ;;  %v5598_v7 = vld [vmem:[%s8020_s12 + $0x80] sm:$0xff]  ;;  %v8083_v9 = vpack.c.bf16 %v5594_v2, %v5590_v62  ;;  %vm1480_vm3 = vsmask.f32 5376 }
  0x1a   : > { %3002 = vmatprep.subr.bf16.mxu0 %v6949_v21  ;;  %v6989_v51 = vld [vmem:[%s10033_s1 + $0xc4] ss:$8 sps:$4 sm:$0xff]   ;;  %v8052_v54 = vpack.c.bf16 %v8039_v50, %v8039_v50  ;;  %v6993_v57 = vld [vmem:[%s10033_s1 + $0xc0] ss:$8 sps:$4 sm:$0xff]   ;;  %v6997_v8 = vld [vmem:[%s10033_s1 + $0x9d4] ss:$8 sps:$4 sm:$0xff]   ;;  %v8085_v10 = vpack.c.bf16 %v5598_v7, %v5598_v7  ;;  %v8099_v20 = vpack.c.bf16 %v5598_v7, %v5594_v2 }
  0x1b   : > { %v6991_v52 = vld [vmem:[%s10033_s1 + $0x9c4] ss:$8 sps:$4 sm:$0xff]   ;;  %v395_v58 = vshrl.u32 %v8048_v53, 16  ;;  %v398_v59 = vshll.u32 %v8048_v53, 16  ;;  %v6994_v63 = vld [vmem:[%s10033_s1 + $0x9c0] ss:$8 sps:$4 sm:$0xff]   ;;  %3024 = vmatprep.mubr.bf16.mxu0 %v8076_v1 }
  0x1c   : > { %780 = vmatpush1.bf16.msra.mxu1 %v6951_v22  ;;  %v403_v60 = vshrl.u32 %v8052_v54, 16  ;;  %v406_v61 = vshll.u32 %v8052_v54, 16  ;;  %v6999_v13 = vld [vmem:[%s10033_s1 + $0xd0] ss:$8 sps:$4 sm:$0xff]   ;;  %v378_v14 = vshrl.u32 %v8083_v9, 16  ;;  %v381_v15 = vshll.u32 %v8083_v9, 16 }
  0x1d   : > { %3003 = vmatpush1.bf16.msra.mxu0 %v6952_v23  ;;  %781 = vmatprep.subr.bf16.mxu1 %v6953_v24  ;;  %v397_v3 = vrot.slane %v395_v58, 1  ;;  %v400_v4 = vrot.slane %v398_v59, 2  ;;  %v7000_v16 = vld [vmem:[%s10033_s1 + $0x9d0] ss:$8 sps:$4 sm:$0xff]   ;;  %v386_v18 = vshrl.u32 %v8085_v10, 16  ;;  %v389_v19 = vshll.u32 %v8085_v10, 16 }
  0x1e   : > { %3004 = vmatprep.subr.bf16.mxu0 %v6955_v25  ;;  %v405_v5 = vrot.slane %v403_v60, 1  ;;  %v408_v6 = vrot.slane %v406_v61, 2  ;;  %v7001_v21 = vld [vmem:[%s10033_s1 + $0xe4] ss:$8 sps:$4 sm:$0xff]   ;;  %v7005_v23 = vld [vmem:[%s10033_s1 + $0xe0] ss:$8 sps:$4 sm:$0xff]  }
  0x1f   : > { %v401_v11 = vor.u32 %v400_v4, %v397_v3  ;;  %v7003_v22 = vld [vmem:[%s10033_s1 + $0x9e4] ss:$8 sps:$4 sm:$0xff]   ;;  %v7006_v24 = vld [vmem:[%s10033_s1 + $0x9e0] ss:$8 sps:$4 sm:$0xff]   ;;  %v7007_v25 = vld [vmem:[%s10033_s1 + $0xf4] ss:$8 sps:$4 sm:$0xff]  }
  0x20   : > { %782 = vmatpush1.bf16.msra.mxu1 %v6957_v26  ;;  %v409_v12 = vor.u32 %v408_v6, %v405_v5  ;;  %v380_v26 = vrot.slane %v378_v14, 1  ;;  %v962_v48 = vrot.slane %v8085_v10, 2  ;;  %v7030_v58 = vld [vmem:[%s10033_s1 + $0xa24] ss:$8 sps:$4 sm:$0xff]   ;;  %v7025_v59 = vld [vmem:[%s10033_s1 + $0x120] ss:$8 sps:$4 sm:$0xff]   ;;  %v3060_v10 = vpack.c.bf16 %v8039_v50, %v8036_v49 }
  0x21   : > { %3005 = vmatpush1.bf16.msra.mxu0 %v6958_v27  ;;  %783 = vmatprep.subr.bf16.mxu1 %v6959_v28  ;;  %v383_v27 = vrot.slane %v381_v15, 2  ;;  %v388_v28 = vrot.slane %v386_v18, 1  ;;  %v7028_v60 = vld [vmem:[%s10033_s1 + $0xa20] ss:$8 sps:$4 sm:$0xff]   ;;  %v7033_v61 = vld [vmem:[%s10033_s1 + $0x134] ss:$8 sps:$4 sm:$0xff]  }
  0x22   : > { %3006 = vmatprep.subr.bf16.mxu0 %v6961_v29  ;;  %v410_v17 = vsel %vm376_vm0, %v401_v11, %v409_v12  ;;  %v391_v29 = vrot.slane %v389_v19, 2  ;;  %v7036_v62 = vld [vmem:[%s10033_s1 + $0xa34] ss:$8 sps:$4 sm:$0xff]   ;;  %v7039_v2 = vld [vmem:[%s10033_s1 + $0x144] ss:$8 sps:$4 sm:$0xff]   ;;  %v3148_v50 = vshll.u32 %v3060_v10, 16 }
  0x23   : > { %801 = vmatprep.mubr.bf16.mxu1 %v410_v17  ;;  %v7042_v3 = vld [vmem:[%s10033_s1 + $0xa44] ss:$8 sps:$4 sm:$0xff]   ;;  %v7037_v4 = vld [vmem:[%s10033_s1 + $0x140] ss:$8 sps:$4 sm:$0xff]   ;;  %v7045_v6 = vld [vmem:[%s10033_s1 + $0x154] ss:$8 sps:$4 sm:$0xff]  }
  0x24   : > { %784 = vmatpush1.bf16.msra.mxu1 %v6963_v30  ;;  %v7009_v30 = vld [vmem:[%s10033_s1 + $0x9f4] ss:$8 sps:$4 sm:$0xff]   ;;  %v7040_v5 = vld [vmem:[%s10033_s1 + $0xa40] ss:$8 sps:$4 sm:$0xff]   ;;  %v7046_v11 = vld [vmem:[%s10033_s1 + $0xa50] ss:$8 sps:$4 sm:$0xff]  }
  0x25   : > { %3007 = vmatpush1.bf16.msra.mxu0 %v6964_v31  ;;  %785 = vmatprep.subr.bf16.mxu1 %v6965_v32  ;;  %v7011_v31 = vld [vmem:[%s10033_s1 + $0xf0] ss:$8 sps:$4 sm:$0xff]   ;;  %v7048_v7 = vld [vmem:[%s10033_s1 + $0xa54] ss:$8 sps:$4 sm:$0xff]   ;;  %v7051_v12 = vld [vmem:[%s10033_s1 + $0x164] ss:$8 sps:$4 sm:$0xff]  }
  0x26   : > { %3008 = vmatprep.subr.bf16.mxu0 %v6967_v33  ;;  %v7012_v32 = vld [vmem:[%s10033_s1 + $0x9f0] ss:$8 sps:$4 sm:$0xff]   ;;  %v7015_v33 = vld [vmem:[%s10033_s1 + $0x104] ss:$8 sps:$4 sm:$0xff]   ;;  %v7049_v49 = vld [vmem:[%s10033_s1 + $0x160] ss:$8 sps:$4 sm:$0xff]  }
  0x27   : > { %v7052_v15 = vld [vmem:[%s10033_s1 + $0xa60] ss:$8 sps:$4 sm:$0xff]   ;;  %v7060_v17 = vld [vmem:[%s10033_s1 + $0xa74] ss:$8 sps:$4 sm:$0xff]   ;;  %vm2056_vm4 = vsmask.f32 4352 }
  0x28   : > { %786 = vmatpush1.bf16.msra.mxu1 %v6969_v34  ;;  %v384_v34 = vor.u32 %v383_v27, %v380_v26  ;;  %v8242_v18 = vld [vmem:[%s8020_s12 + $0x58] sm:$0xff]  ;;  %v3150_v26 = vrot.slane %v3148_v50, 1  ;;  %v6231_v27 = vld [vmem:[%s8020_s12 + $0xa8] sm:$0xff] }
  0x29   : > { %3009 = vmatpush1.bf16.msra.mxu0 %v6970_v35  ;;  %787 = vmatprep.subr.bf16.mxu1 %v6971_v36  ;;  %v392_v35 = vor.u32 %v391_v29, %v388_v28  ;;  %v8129_v36 = vld [vmem:[%s8020_s12 + $0x70] sm:$0xff]  ;;  %v7063_v28 = vld [vmem:[%s10033_s1 + $0x184] ss:$8 sps:$4 sm:$0xff]  }
  0x2a   : > { %3010 = vmatprep.subr.bf16.mxu0 %v6973_v37  ;;  %v8132_v37 = vld [vmem:[%s8020_s12 + $0x90] sm:$0xff]  ;;  %v7066_v29 = vld [vmem:[%s10033_s1 + $0xa84] ss:$8 sps:$4 sm:$0xff]  }
  0x2b   : > { %v7099_v50 = vld [vmem:[%s10033_s1 + $0x1e4] ss:$8 sps:$4 sm:$0xff]  }
  0x2c   : > { %788 = vmatpush1.bf16.msra.mxu1 %v6975_v38  ;;  %v7018_v38 = vld [vmem:[%s10033_s1 + $0xa04] ss:$8 sps:$4 sm:$0xff]  }
  0x2d   : > { %3011 = vmatpush1.bf16.msra.mxu0 %v6976_v39  ;;  %789 = vmatprep.subr.bf16.mxu1 %v6977_v40  ;;  %v7013_v39 = vld [vmem:[%s10033_s1 + $0x100] ss:$8 sps:$4 sm:$0xff]   ;;  %v8142_v40 = vpack.c.bf16 %v8132_v37, %v8129_v36 }
  0x2e   : > { %3012 = vmatprep.subr.bf16.mxu0 %v6979_v41  ;;  %v7016_v41 = vld [vmem:[%s10033_s1 + $0xa00] ss:$8 sps:$4 sm:$0xff]  }
  0x30   : > { %790 = vmatpush1.bf16.msra.mxu1 %v6981_v42  ;;  %v393_v42 = vsel %vm376_vm0, %v384_v34, %v392_v35 }
  0x31   : > { %3013 = vmatpush1.bf16.msra.mxu0 %v6982_v43  ;;  %791 = vmatprep.subr.bf16.mxu1 %v6983_v44  ;;  %v7021_v43 = vld [vmem:[%s10033_s1 + $0x114] ss:$8 sps:$4 sm:$0xff]  }
  0x32   : > { %3014 = vmatprep.subr.bf16.mxu0 %v6985_v45  ;;  %v7024_v44 = vld [vmem:[%s10033_s1 + $0xa14] ss:$8 sps:$4 sm:$0xff]   ;;  %v964_v45 = vrot.slane %v8048_v53, 2  ;;  %v7022_v53 = vld [vmem:[%s10033_s1 + $0xa10] ss:$8 sps:$4 sm:$0xff]  }
  0x34   : > { %792 = vmatpush1.bf16.msra.mxu1 %v6987_v46  ;;  %v965_v46 = vrot.slane %v8052_v54, 2  ;;  %v7027_v54 = vld [vmem:[%s10033_s1 + $0x124] ss:$8 sps:$4 sm:$0xff]  }
  0x35   : > { %3015 = vmatpush1.bf16.msra.mxu0 %v6988_v47  ;;  %793 = vmatprep.subr.bf16.mxu1 %v6989_v51  ;;  %v961_v47 = vrot.slane %v8083_v9, 2  ;;  %v7019_v51 = vld [vmem:[%s10033_s1 + $0x110] ss:$8 sps:$4 sm:$0xff]  }
  0x36   : > { %3016 = vmatprep.subr.bf16.mxu0 %v6991_v52  ;;  %v8163_v52 = vsel %vm960_vm1, %v964_v45, %v965_v46  ;;  %v7043_v9 = vld [vmem:[%s10033_s1 + $0x150] ss:$8 sps:$4 sm:$0xff]  }
  0x38   : > { %794 = vmatpush1.bf16.msra.mxu1 %v6993_v57  ;;  %v8172_v57 = vsel %vm960_vm1, %v961_v47, %v962_v48  ;;  %v7067_v48 = vld [vmem:[%s10033_s1 + $0x190] ss:$8 sps:$4 sm:$0xff]  }
  0x39   : > { %3017 = vmatpush1.bf16.msra.mxu0 %v6994_v63  ;;  %795 = vmatprep.subr.bf16.mxu1 %v6995_v0  ;;  %v7031_v63 = vld [vmem:[%s10033_s1 + $0x130] ss:$8 sps:$4 sm:$0xff]  }
  0x3a   : > { %3018 = vmatprep.subr.bf16.mxu0 %v6997_v8  ;;  %v7034_v0 = vld [vmem:[%s10033_s1 + $0xa30] ss:$8 sps:$4 sm:$0xff]   ;;  %v311_v8 = vpack.c.bf16 %v8058_v56, %v8058_v56  ;;  %v7054_v56 = vld [vmem:[%s10033_s1 + $0xa64] ss:$8 sps:$4 sm:$0xff]  }
  0x3c   : > { %796 = vmatpush1.bf16.msra.mxu1 %v6999_v13  ;;  %v437_v13 = vshrl.u32 %v311_v8, 16  ;;  %v440_v14 = vshll.u32 %v311_v8, 16 }
  0x3d   : > { %3019 = vmatpush1.bf16.msra.mxu0 %v7000_v16  ;;  %797 = vmatprep.subr.bf16.mxu1 %v7001_v21  ;;  %v7057_v16 = vld [vmem:[%s10033_s1 + $0x174] ss:$8 sps:$4 sm:$0xff]  }
  0x3e   : > { %3020 = vmatprep.subr.bf16.mxu0 %v7003_v22  ;;  %v439_v19 = vrot.slane %v437_v13, 1  ;;  %v442_v21 = vrot.slane %v440_v14, 2  ;;  %v3146_v22 = vshrl.u32 %v3060_v10, 16 }
  0x40   : > { %798 = vmatpush1.bf16.msra.mxu1 %v7005_v23  ;;  %v7055_v23 = vld [vmem:[%s10033_s1 + $0x170] ss:$8 sps:$4 sm:$0xff]  }
  0x41   : > { %3021 = vmatpush1.bf16.msra.mxu0 %v7006_v24  ;;  %799 = vmatprep.subr.bf16.mxu1 %v7007_v25  ;;  %v7058_v24 = vld [vmem:[%s10033_s1 + $0xa70] ss:$8 sps:$4 sm:$0xff]   ;;  %v307_v25 = vpack.c.bf16 %v8055_v55, %v8242_v18  ;;  %v7061_v55 = vld [vmem:[%s10033_s1 + $0x180] ss:$8 sps:$4 sm:$0xff]  }
  0x42   : > { %3022 = vmatprep.subr.bf16.mxu0 %v7009_v30 }
  0x43   : > { %v429_v30 = vshrl.u32 %v307_v25, 16 }
  0x44   : > { %800 = vmatpush1.bf16.msra.mxu1 %v7011_v31  ;;  %v432_v31 = vshll.u32 %v307_v25, 16 }
  0x45   : > { %3023 = vmatpush1.bf16.msra.mxu0 %v7012_v32  ;;  %812 = vmatprep.subr.bf16.mxu1 %v7015_v33  ;;  %v8259_v32 = vpack.c.bf16 %v6231_v27, %v6231_v27  ;;  %v443_v33 = vor.u32 %v442_v21, %v439_v19  ;;  %v431_v34 = vrot.slane %v429_v30, 1  ;;  %v7097_v19 = vld [vmem:[%s10033_s1 + $0x1e0] ss:$8 sps:$4 sm:$0xff]   ;;  %v7108_v27 = vld [vmem:[%s10033_s1 + $0xaf4] ss:$8 sps:$4 sm:$0xff]  }
  0x46   : > { %3505 = vmatprep.subr.bf16.mxu0 %v7018_v38  ;;  %v434_v35 = vrot.slane %v432_v31, 2  ;;  %v3151_v38 = vor.u32 %v3150_v26, %v3146_v22  ;;  %v7106_v30 = vld [vmem:[%s10033_s1 + $0xaf0] ss:$8 sps:$4 sm:$0xff]  }
  0x47   : > { %802 = vmatmul.mubr.bf16.vlgmr.msra.gmra.mrb[0].mxu1 %v393_v42  ;;  %v7069_v42 = vld [vmem:[%s10033_s1 + $0x194] ss:$8 sps:$4 sm:$0xff]  }
  0x48   : > { %3025 = vmatmul.mubr.bf16.vlgmr.msra.gmra.mrb[0].mxu0 %v8142_v40  ;;  %813 = vmatpush1.bf16.msra.mxu1 %v7013_v39  ;;  %v3153_v39 = vshll.u32 %v8259_v32, 16 }
  0x49   : > { %3506 = vmatpush1.bf16.msra.mxu0 %v7016_v41  ;;  %814 = vmatprep.subr.bf16.mxu1 %v7021_v43  ;;  %v7064_v41 = vld [vmem:[%s10033_s1 + $0xa80] ss:$8 sps:$4 sm:$0xff]   ;;  %v7072_v43 = vld [vmem:[%s10033_s1 + $0xa94] ss:$8 sps:$4 sm:$0xff]  }
  0x4a   : > { %3507 = vmatprep.subr.bf16.mxu0 %v7024_v44  ;;  %v435_v44 = vor.u32 %v434_v35, %v431_v34  ;;  %v3155_v45 = vrot.slane %v3153_v39, 1  ;;  %v3714_v34 = vshrl.u32 %v8259_v32, 16  ;;  %v7111_v35 = vld [vmem:[%s10033_s1 + $0x204] ss:$8 sps:$4 sm:$0xff]  }
  0x4c   : > { %815 = vmatpush1.bf16.msra.mxu1 %v7019_v51  ;;  %v444_v46 = vsel %vm376_vm0, %v435_v44, %v443_v33  ;;  %v3156_v47 = vsel %vm3132_vm2, %v3151_v38, %v3155_v45  ;;  %v7070_v51 = vld [vmem:[%s10033_s1 + $0xa90] ss:$8 sps:$4 sm:$0xff]   ;;  %v7114_v38 = vld [vmem:[%s10033_s1 + $0xb04] ss:$8 sps:$4 sm:$0xff]  }
  0x4d   : > { %3508 = vmatpush1.bf16.msra.mxu0 %v7022_v53  ;;  %816 = vmatprep.subr.bf16.mxu1 %v7027_v54  ;;  %v7075_v53 = vld [vmem:[%s10033_s1 + $0x1a4] ss:$8 sps:$4 sm:$0xff]  }
  0x4e   : > { %3509 = vmatprep.subr.bf16.mxu0 %v7030_v58  ;;  %v7078_v54 = vld [vmem:[%s10033_s1 + $0xaa4] ss:$8 sps:$4 sm:$0xff]   ;;  %844 = vmatprep.mubr.bf16.mxu1 %v444_v46  ;;  %v7073_v58 = vld [vmem:[%s10033_s1 + $0x1a0] ss:$8 sps:$4 sm:$0xff]  }
  0x4f   : > { %3537 = vmatprep.mubr.bf16.mxu0 %v3156_v47  ;;  %v7109_v46 = vld [vmem:[%s10033_s1 + $0x200] ss:$8 sps:$4 sm:$0xff]  }
  0x50   : > { %817 = vmatpush1.bf16.msra.mxu1 %v7025_v59  ;;  %v7076_v59 = vld [vmem:[%s10033_s1 + $0xaa0] ss:$8 sps:$4 sm:$0xff]  }
  0x51   : > { %3510 = vmatpush1.bf16.msra.mxu0 %v7028_v60  ;;  %818 = vmatprep.subr.bf16.mxu1 %v7033_v61  ;;  %v7081_v60 = vld [vmem:[%s10033_s1 + $0x1b4] ss:$8 sps:$4 sm:$0xff]   ;;  %v7112_v47 = vld [vmem:[%s10033_s1 + $0xb00] ss:$8 sps:$4 sm:$0xff]  }
  0x52   : > { %3511 = vmatprep.subr.bf16.mxu0 %v7036_v62  ;;  %v7084_v61 = vld [vmem:[%s10033_s1 + $0xab4] ss:$8 sps:$4 sm:$0xff]   ;;  %v7079_v62 = vld [vmem:[%s10033_s1 + $0x1b0] ss:$8 sps:$4 sm:$0xff]  }
  0x54   : > { %819 = vmatpush1.bf16.msra.mxu1 %v7031_v63  ;;  %v7082_v63 = vld [vmem:[%s10033_s1 + $0xab0] ss:$8 sps:$4 sm:$0xff]  }
  0x55   : > { %3512 = vmatpush1.bf16.msra.mxu0 %v7034_v0  ;;  %820 = vmatprep.subr.bf16.mxu1 %v7039_v2  ;;  %v7087_v0 = vld [vmem:[%s10033_s1 + $0x1c4] ss:$8 sps:$4 sm:$0xff]  }
  0x56   : > { %3513 = vmatprep.subr.bf16.mxu0 %v7042_v3  ;;  %v7090_v2 = vld [vmem:[%s10033_s1 + $0xac4] ss:$8 sps:$4 sm:$0xff]   ;;  %v5592_v3 = vld [vmem:[%s8020_s12 + $0x50] sm:$0xff] }
  0x57   : > { %v306_v8 = vpack.c.bf16 %v8129_v36, %v5592_v3  ;;  %v7094_v36 = vld [vmem:[%s10033_s1 + $0xad0] ss:$8 sps:$4 sm:$0xff]  }
  0x58   : > { %821 = vmatpush1.bf16.msra.mxu1 %v7037_v4  ;;  %v310_v4 = vpack.c.bf16 %v8132_v37, %v8132_v37  ;;  %v7096_v37 = vld [vmem:[%s10033_s1 + $0xad4] ss:$8 sps:$4 sm:$0xff]  }
  0x59   : > { %3514 = vmatpush1.bf16.msra.mxu0 %v7040_v5  ;;  %822 = vmatprep.subr.bf16.mxu1 %v7045_v6  ;;  %v7085_v5 = vld [vmem:[%s10033_s1 + $0x1c0] ss:$8 sps:$4 sm:$0xff]   ;;  %v412_v13 = vshrl.u32 %v306_v8, 16  ;;  %v415_v14 = vshll.u32 %v306_v8, 16 }
  0x5a   : > { %3515 = vmatprep.subr.bf16.mxu0 %v7048_v7  ;;  %v7088_v6 = vld [vmem:[%s10033_s1 + $0xac0] ss:$8 sps:$4 sm:$0xff]   ;;  %v7093_v7 = vld [vmem:[%s10033_s1 + $0x1d4] ss:$8 sps:$4 sm:$0xff]   ;;  %v420_v10 = vshrl.u32 %v310_v4, 16 }
  0x5b   : > { %v417_v25 = vrot.slane %v415_v14, 2 }
  0x5c   : > { %823 = vmatpush1.bf16.msra.mxu1 %v7043_v9  ;;  %v6230_v9 = vld [vmem:[%s8020_s12 + $0xa0] sm:$0xff] }
  0x5d   : > { %3516 = vmatpush1.bf16.msra.mxu0 %v7046_v11  ;;  %824 = vmatprep.subr.bf16.mxu1 %v7051_v12  ;;  %v7091_v11 = vld [vmem:[%s10033_s1 + $0x1d0] ss:$8 sps:$4 sm:$0xff]   ;;  %v423_v12 = vshll.u32 %v310_v4, 16  ;;  %v7124_v4 = vld [vmem:[%s10033_s1 + $0xb20] ss:$8 sps:$4 sm:$0xff]  }
  0x5e   : > { %3517 = vmatprep.subr.bf16.mxu0 %v7054_v56  ;;  %v3136_v56 = vshll.u32 %v8099_v20, 16 }
  0x5f   : > { %v425_v21 = vrot.slane %v423_v12, 2 }
  0x60   : > { %825 = vmatpush1.bf16.msra.mxu1 %v7049_v49  ;;  %v3063_v49 = vpack.c.bf16 %v6230_v9, %v6230_v9  ;;  %v3138_v22 = vrot.slane %v3136_v56, 1  ;;  %v7127_v9 = vld [vmem:[%s10033_s1 + $0x230] ss:$8 sps:$4 sm:$0xff]  }
  0x61   : > { %3518 = vmatpush1.bf16.msra.mxu0 %v7052_v15  ;;  %826 = vmatprep.subr.bf16.mxu1 %v7057_v16  ;;  %v7102_v15 = vld [vmem:[%s10033_s1 + $0xae4] ss:$8 sps:$4 sm:$0xff]   ;;  %v422_v16 = vrot.slane %v420_v10, 1  ;;  %v7130_v10 = vld [vmem:[%s10033_s1 + $0xb30] ss:$8 sps:$4 sm:$0xff]  }
  0x62   : > { %3519 = vmatprep.subr.bf16.mxu0 %v7060_v17  ;;  %v3134_v17 = vshrl.u32 %v8099_v20, 16  ;;  %v3141_v26 = vshll.u32 %v3063_v49, 16  ;;  %v7105_v20 = vld [vmem:[%s10033_s1 + $0x1f4] ss:$8 sps:$4 sm:$0xff]  }
  0x64   : > { %827 = vmatpush1.bf16.msra.mxu1 %v7055_v23  ;;  %v7100_v23 = vld [vmem:[%s10033_s1 + $0xae0] ss:$8 sps:$4 sm:$0xff]   ;;  %v3139_v33 = vor.u32 %v3138_v22, %v3134_v17  ;;  %v8378_v45 = vrot.slane %v3141_v26, 2 }
  0x65   : > { %3520 = vmatpush1.bf16.msra.mxu0 %v7058_v24  ;;  %828 = vmatprep.subr.bf16.mxu1 %v7063_v28  ;;  %v414_v24 = vrot.slane %v412_v13, 1  ;;  %v7103_v28 = vld [vmem:[%s10033_s1 + $0x1f0] ss:$8 sps:$4 sm:$0xff]  }
  0x66   : > { %3521 = vmatprep.subr.bf16.mxu0 %v7066_v29  ;;  %v426_v29 = vor.u32 %v425_v21, %v422_v16  ;;  %v7144_v21 = vld [vmem:[%s10033_s1 + $0xb54] ss:$8 sps:$4 sm:$0xff]  }
  0x67   : > { %v418_v31 = vor.u32 %v417_v25, %v414_v24  ;;  %v7142_v24 = vld [vmem:[%s10033_s1 + $0xb50] ss:$8 sps:$4 sm:$0xff]   ;;  %v7147_v25 = vld [vmem:[%s10033_s1 + $0x264] ss:$8 sps:$4 sm:$0xff]  }
  0x68   : > { %829 = vmatpush1.bf16.msra.mxu1 %v7061_v55  ;;  %v3143_v55 = vrot.slane %v3141_v26, 1  ;;  %v7150_v26 = vld [vmem:[%s10033_s1 + $0xb64] ss:$8 sps:$4 sm:$0xff]  }
  0x69   : > { %3522 = vmatpush1.bf16.msra.mxu0 %v7064_v41  ;;  %830 = vmatprep.subr.bf16.mxu1 %v7069_v42  ;;  %v3697_v41 = vshrl.u32 %v3063_v49, 16  ;;  %v8370_v42 = vrot.slane %v3714_v34, 1  ;;  %v7157_v34 = vld [vmem:[%s10033_s1 + $0x280] ss:$8 sps:$4 sm:$0xff]  }
  0x6a   : > { %3523 = vmatprep.subr.bf16.mxu0 %v7072_v43  ;;  %v8374_v43 = vrot.slane %v3153_v39, 2  ;;  %v3144_v32 = vsel %vm3132_vm2, %v3139_v33, %v3143_v55  ;;  %v7159_v33 = vld [vmem:[%s10033_s1 + $0x284] ss:$8 sps:$4 sm:$0xff]  }
  0x6b   : > { %v8376_v44 = vrot.slane %v3697_v41, 1  ;;  %v7162_v55 = vld [vmem:[%s10033_s1 + $0xb84] ss:$8 sps:$4 sm:$0xff]   ;;  %v7168_v41 = vld [vmem:[%s10033_s1 + $0xb94] ss:$8 sps:$4 sm:$0xff]  }
  0x6c   : > { %831 = vmatpush1.bf16.msra.mxu1 %v7067_v48  ;;  %v427_v48 = vsel %vm376_vm0, %v418_v31, %v426_v29  ;;  %v3720_v39 = vor.u32 %v8374_v43, %v8370_v42  ;;  %v7156_v29 = vld [vmem:[%s10033_s1 + $0xb74] ss:$8 sps:$4 sm:$0xff]   ;;  %v7154_v31 = vld [vmem:[%s10033_s1 + $0xb70] ss:$8 sps:$4 sm:$0xff]   ;;  %v7219_v42 = vld [vmem:[%s10033_s1 + $0x324] ss:$8 sps:$4 sm:$0xff]  }
  0x6d   : > { %3524 = vmatpush1.bf16.msra.mxu0 %v7070_v51  ;;  %832 = vmatprep.subr.bf16.mxu1 %v7075_v53  ;;  %v7117_v51 = vld [vmem:[%s10033_s1 + $0x214] ss:$8 sps:$4 sm:$0xff]   ;;  %v7222_v43 = vld [vmem:[%s10033_s1 + $0xc24] ss:$8 sps:$4 sm:$0xff]  }
  0x6e   : > { %3525 = vmatprep.subr.bf16.mxu0 %v7078_v54  ;;  %v7120_v53 = vld [vmem:[%s10033_s1 + $0xb14] ss:$8 sps:$4 sm:$0xff]   ;;  %v3703_v54 = vor.u32 %v8378_v45, %v8376_v44  ;;  %v7307_v44 = vld [vmem:[%s10033_s1 + $0x410] ss:$8 sps:$4 sm:$0xff]  }
  0x6f   : > { %v7310_v45 = vld [vmem:[%s10033_s1 + $0xd10] ss:$8 sps:$4 sm:$0xff]  }
  0x70   : > { %833 = vmatpush1.bf16.msra.mxu1 %v7073_v58  ;;  %v3172_v58 = vshll.u32 %v8076_v1, 16 }
  0x71   : > { %3526 = vmatpush1.bf16.msra.mxu0 %v7076_v59  ;;  %834 = vmatprep.subr.bf16.mxu1 %v7081_v60  ;;  %v7115_v59 = vld [vmem:[%s10033_s1 + $0x210] ss:$8 sps:$4 sm:$0xff]  }
  0x72   : > { %3527 = vmatprep.subr.bf16.mxu0 %v7084_v61  ;;  %v7118_v60 = vld [vmem:[%s10033_s1 + $0xb10] ss:$8 sps:$4 sm:$0xff]   ;;  %v7123_v61 = vld [vmem:[%s10033_s1 + $0x224] ss:$8 sps:$4 sm:$0xff]   ;;  %v3174_v3 = vrot.slane %v3172_v58, 1 }
  0x73   : > { %v7177_v58 = vld [vmem:[%s10033_s1 + $0x2b4] ss:$8 sps:$4 sm:$0xff]  }
  0x74   : > { %835 = vmatpush1.bf16.msra.mxu1 %v7079_v62  ;;  %v7126_v62 = vld [vmem:[%s10033_s1 + $0xb24] ss:$8 sps:$4 sm:$0xff]  }
  0x75   : > { %3528 = vmatpush1.bf16.msra.mxu0 %v7082_v63  ;;  %836 = vmatprep.subr.bf16.mxu1 %v7087_v0  ;;  %v3160_v63 = vshll.u32 %v8142_v40, 16  ;;  %v7121_v0 = vld [vmem:[%s10033_s1 + $0x220] ss:$8 sps:$4 sm:$0xff]  }
  0x76   : > { %3529 = vmatprep.subr.bf16.mxu0 %v7090_v2  ;;  %v3170_v2 = vshrl.u32 %v8076_v1, 16  ;;  %v3158_v1 = vshrl.u32 %v8142_v40, 16  ;;  %v7135_v40 = vld [vmem:[%s10033_s1 + $0x244] ss:$8 sps:$4 sm:$0xff]  }
  0x77   : > { %v3162_v8 = vrot.slane %v3160_v63, 1  ;;  %v7186_v63 = vld [vmem:[%s10033_s1 + $0xbc4] ss:$8 sps:$4 sm:$0xff]  }
  0x78   : > { %837 = vmatpush1.bf16.msra.mxu1 %v7085_v5  ;;  %v7129_v5 = vld [vmem:[%s10033_s1 + $0x234] ss:$8 sps:$4 sm:$0xff]  }
  0x79   : > { %3530 = vmatpush1.bf16.msra.mxu0 %v7088_v6  ;;  %838 = vmatprep.subr.bf16.mxu1 %v7093_v7  ;;  %v6233_v6 = vld [vmem:[%s8020_s12 + $0xb8] sm:$0xff]  ;;  %v3163_v14 = vor.u32 %v3162_v8, %v3158_v1  ;;  %v7198_v1 = vld [vmem:[%s10033_s1 + $0xbe4] ss:$8 sps:$4 sm:$0xff]  }
  0x7a   : > { %3531 = vmatprep.subr.bf16.mxu0 %v7096_v37  ;;  %v8427_v7 = vpack.c.bf16 %v6233_v6, %v6233_v6  ;;  %v6232_v37 = vld [vmem:[%s8020_s12 + $0xb0] sm:$0xff]  ;;  %v8576_v8 = vld [vmem:[%s8020_s12 + $0x68] sm:$0xff] }
  0x7b   : > { %v8438_v56 = vpack.c.bf16 %v6232_v37, %v6232_v37  ;;  %v7190_v6 = vld [vmem:[%s10033_s1 + $0xbd0] ss:$8 sps:$4 sm:$0xff]   ;;  %v8579_v37 = vld [vmem:[%s8020_s12 + $0x88] sm:$0xff] }
  0x7c   : > { %839 = vmatpush1.bf16.msra.mxu1 %v7091_v11  ;;  %v3175_v11 = vor.u32 %v3174_v3, %v3170_v2  ;;  %v3177_v12 = vshll.u32 %v8427_v7, 16  ;;  %v7184_v2 = vld [vmem:[%s10033_s1 + $0xbc0] ss:$8 sps:$4 sm:$0xff]   ;;  %v7189_v3 = vld [vmem:[%s10033_s1 + $0x2d4] ss:$8 sps:$4 sm:$0xff]  }
  0x7d   : > { %3532 = vmatpush1.bf16.msra.mxu0 %v7094_v36  ;;  %840 = vmatprep.subr.bf16.mxu1 %v7099_v50  ;;  %v7138_v36 = vld [vmem:[%s10033_s1 + $0xb44] ss:$8 sps:$4 sm:$0xff]   ;;  %v3165_v49 = vshll.u32 %v8438_v56, 16  ;;  %v7133_v50 = vld [vmem:[%s10033_s1 + $0x240] ss:$8 sps:$4 sm:$0xff]  }
  0x7e   : > { %3533 = vmatprep.subr.bf16.mxu0 %v7102_v15  ;;  %v3179_v13 = vrot.slane %v3177_v12, 1  ;;  %v7136_v15 = vld [vmem:[%s10033_s1 + $0xb40] ss:$8 sps:$4 sm:$0xff]  }
  0x7f   : > { %v3167_v17 = vrot.slane %v3165_v49, 1 }
  0x80   : > { %841 = vmatpush1.bf16.msra.mxu1 %v7097_v19  ;;  %v3180_v16 = vsel %vm3132_vm2, %v3175_v11, %v3179_v13  ;;  %v7141_v19 = vld [vmem:[%s10033_s1 + $0x254] ss:$8 sps:$4 sm:$0xff]   ;;  %v7196_v11 = vld [vmem:[%s10033_s1 + $0xbe0] ss:$8 sps:$4 sm:$0xff]  }
  0x81   : > { %3534 = vmatpush1.bf16.msra.mxu0 %v7100_v23  ;;  %842 = vmatprep.subr.bf16.mxu1 %v7105_v20  ;;  %v8465_v22 = vsel %vm3132_vm2, %v3163_v14, %v3167_v17  ;;  %v7139_v23 = vld [vmem:[%s10033_s1 + $0x250] ss:$8 sps:$4 sm:$0xff]   ;;  %v7145_v20 = vld [vmem:[%s10033_s1 + $0x260] ss:$8 sps:$4 sm:$0xff]  }
  0x82   : > { %3535 = vmatprep.subr.bf16.mxu0 %v7108_v27  ;;  %v7148_v27 = vld [vmem:[%s10033_s1 + $0xb60] ss:$8 sps:$4 sm:$0xff]   ;;  %v8596_v13 = vld [vmem:[%s8020_s12 + $0x98] sm:$0xff] }
  0x83   : > { %v8605_v17 = vpack.c.bf16 %v8596_v13, %v8596_v13 }
  0x84   : > { %843 = vmatpush1.bf16.msra.mxu1 %v7103_v28  ;;  %v7153_v28 = vld [vmem:[%s10033_s1 + $0x274] ss:$8 sps:$4 sm:$0xff]  }
  0x85   : > { %3536 = vmatpush1.bf16.msra.mxu0 %v7106_v30  ;;  %1297 = vmatprep.subr.bf16.mxu1 %v7111_v35  ;;  %v7151_v30 = vld [vmem:[%s10033_s1 + $0x270] ss:$8 sps:$4 sm:$0xff]   ;;  %v7160_v35 = vld [vmem:[%s10033_s1 + $0xb80] ss:$8 sps:$4 sm:$0xff]  }
  0x86   : > { %3548 = vmatprep.subr.bf16.mxu0 %v7114_v38  ;;  %v7165_v38 = vld [vmem:[%s10033_s1 + $0x294] ss:$8 sps:$4 sm:$0xff]  }
  0x87   : > { %845 = vmatmul.mubr.bf16.vlgmr.msra.gmra.mrb[0].mxu1 %v427_v48  ;;  %v7171_v48 = vld [vmem:[%s10033_s1 + $0x2a4] ss:$8 sps:$4 sm:$0xff]  }
  0x88   : > { %3538 = vmatmul.mubr.bf16.vlgmr.msra.gmra.mrb[0].mxu0 %v3144_v32  ;;  %1298 = vmatpush1.bf16.msra.mxu1 %v7109_v46  ;;  %v7163_v46 = vld [vmem:[%s10033_s1 + $0x290] ss:$8 sps:$4 sm:$0xff]   ;;  %v7174_v32 = vld [vmem:[%s10033_s1 + $0xba4] ss:$8 sps:$4 sm:$0xff]  }
  0x89   : > { %3549 = vmatpush1.bf16.msra.mxu0 %v7112_v47  ;;  %1299 = vmatprep.subr.bf16.mxu1 %v7117_v51  ;;  %v7166_v47 = vld [vmem:[%s10033_s1 + $0xb90] ss:$8 sps:$4 sm:$0xff]   ;;  %v7169_v51 = vld [vmem:[%s10033_s1 + $0x2a0] ss:$8 sps:$4 sm:$0xff]  }
  0x8a   : > { %3550 = vmatprep.subr.bf16.mxu0 %v7120_v53  ;;  %1329 = vmatprep.mubr.bf16.mxu1 %v8163_v52  ;;  %v7132_v52 = vld [vmem:[%s10033_s1 + $0xb34] ss:$8 sps:$4 sm:$0xff]   ;;  %v7172_v53 = vld [vmem:[%s10033_s1 + $0xba0] ss:$8 sps:$4 sm:$0xff]  }
  0x8b   : > { %3580 = vmatprep.mubr.bf16.mxu0 %v3180_v16 }
  0x8c   : > { %1300 = vmatpush1.bf16.msra.mxu1 %v7115_v59  ;;  %v7180_v59 = vld [vmem:[%s10033_s1 + $0xbb4] ss:$8 sps:$4 sm:$0xff]  }
  0x8d   : > { %3551 = vmatpush1.bf16.msra.mxu0 %v7118_v60  ;;  %1301 = vmatprep.subr.bf16.mxu1 %v7123_v61  ;;  %v7175_v60 = vld [vmem:[%s10033_s1 + $0x2b0] ss:$8 sps:$4 sm:$0xff]  }
  0x8e   : > { %3552 = vmatprep.subr.bf16.mxu0 %v7126_v62  ;;  %v7178_v61 = vld [vmem:[%s10033_s1 + $0xbb0] ss:$8 sps:$4 sm:$0xff]   ;;  %v7183_v62 = vld [vmem:[%s10033_s1 + $0x2c4] ss:$8 sps:$4 sm:$0xff]  }
  0x90   : > { %1302 = vmatpush1.bf16.msra.mxu1 %v7121_v0  ;;  %v7181_v0 = vld [vmem:[%s10033_s1 + $0x2c0] ss:$8 sps:$4 sm:$0xff]  }
  0x91   : > { %3553 = vmatpush1.bf16.msra.mxu0 %v7124_v4  ;;  %1303 = vmatprep.subr.bf16.mxu1 %v7129_v5  ;;  %v7192_v4 = vld [vmem:[%s10033_s1 + $0xbd4] ss:$8 sps:$4 sm:$0xff]   ;;  %v7187_v5 = vld [vmem:[%s10033_s1 + $0x2d0] ss:$8 sps:$4 sm:$0xff]  }
  0x92   : > { %3554 = vmatprep.subr.bf16.mxu0 %v7132_v52  ;;  %v7195_v52 = vld [vmem:[%s10033_s1 + $0x2e4] ss:$8 sps:$4 sm:$0xff]  }
  0x94   : > { %1304 = vmatpush1.bf16.msra.mxu1 %v7127_v9  ;;  %v7193_v9 = vld [vmem:[%s10033_s1 + $0x2e0] ss:$8 sps:$4 sm:$0xff]  }
  0x95   : > { %3555 = vmatpush1.bf16.msra.mxu0 %v7130_v10  ;;  %1305 = vmatprep.subr.bf16.mxu1 %v7135_v40  ;;  %v3616_v10 = vpack.c.bf16 %v8579_v37, %v8576_v8  ;;  %v7201_v40 = vld [vmem:[%s10033_s1 + $0x2f4] ss:$8 sps:$4 sm:$0xff]  }
  0x96   : > { %3556 = vmatprep.subr.bf16.mxu0 %v7138_v36  ;;  %v8593_v36 = vld [vmem:[%s8020_s12 + $0x78] sm:$0xff] }
  0x97   : > { %v3706_v14 = vshrl.u32 %v3616_v10, 16  ;;  %v882_v16 = vpack.c.bf16 %v8593_v36, %v8242_v18  ;;  %v7207_v18 = vld [vmem:[%s10033_s1 + $0x304] ss:$8 sps:$4 sm:$0xff]  }
  0x98   : > { %1306 = vmatpush1.bf16.msra.mxu1 %v7133_v50  ;;  %v3709_v50 = vshll.u32 %v3616_v10, 16  ;;  %v8735_v10 = vld [vmem:[%s8020_s12 + $0x80] sm:$0xff] }
  0x99   : > { %3557 = vmatpush1.bf16.msra.mxu0 %v7136_v15  ;;  %1307 = vmatprep.subr.bf16.mxu1 %v7141_v19  ;;  %v7204_v15 = vld [vmem:[%s10033_s1 + $0xbf4] ss:$8 sps:$4 sm:$0xff]   ;;  %v3708_v19 = vrot.slane %v3706_v14, 1  ;;  %v1411_v14 = vpack.c.bf16 %v8735_v10, %v8735_v10 }
  0x9a   : > { %3558 = vmatprep.subr.bf16.mxu0 %v7144_v21  ;;  %v3711_v21 = vrot.slane %v3709_v50, 2  ;;  %v7255_v50 = vld [vmem:[%s10033_s1 + $0x384] ss:$8 sps:$4 sm:$0xff]  }
  0x9c   : > { %1308 = vmatpush1.bf16.msra.mxu1 %v7139_v23  ;;  %v7199_v23 = vld [vmem:[%s10033_s1 + $0x2f0] ss:$8 sps:$4 sm:$0xff]  }
  0x9d   : > { %3559 = vmatpush1.bf16.msra.mxu0 %v7142_v24  ;;  %1309 = vmatprep.subr.bf16.mxu1 %v7147_v25  ;;  %v7202_v24 = vld [vmem:[%s10033_s1 + $0xbf0] ss:$8 sps:$4 sm:$0xff]   ;;  %v7210_v25 = vld [vmem:[%s10033_s1 + $0xc04] ss:$8 sps:$4 sm:$0xff]  }
  0x9e   : > { %3560 = vmatprep.subr.bf16.mxu0 %v7150_v26  ;;  %v970_v26 = vrot.slane %v882_v16, 2  ;;  %v7253_v16 = vld [vmem:[%s10033_s1 + $0x380] ss:$8 sps:$4 sm:$0xff]  }
  0xa0   : > { %1310 = vmatpush1.bf16.msra.mxu1 %v7145_v20  ;;  %v971_v20 = vrot.slane %v8605_v17, 2 }
  0xa1   : > { %3561 = vmatpush1.bf16.msra.mxu0 %v7148_v27  ;;  %1311 = vmatprep.subr.bf16.mxu1 %v7153_v28  ;;  %v3712_v27 = vor.u32 %v3711_v21, %v3708_v19  ;;  %v7205_v28 = vld [vmem:[%s10033_s1 + $0x300] ss:$8 sps:$4 sm:$0xff]   ;;  %v7261_v21 = vld [vmem:[%s10033_s1 + $0x394] ss:$8 sps:$4 sm:$0xff]  }
  0xa2   : > { %3562 = vmatprep.subr.bf16.mxu0 %v7156_v29  ;;  %v7208_v29 = vld [vmem:[%s10033_s1 + $0xc00] ss:$8 sps:$4 sm:$0xff]  }
  0xa3   : > { %v7256_v19 = vld [vmem:[%s10033_s1 + $0xc80] ss:$8 sps:$4 sm:$0xff]  }
  0xa4   : > { %1312 = vmatpush1.bf16.msra.mxu1 %v7151_v30  ;;  %v7213_v30 = vld [vmem:[%s10033_s1 + $0x314] ss:$8 sps:$4 sm:$0xff]  }
  0xa5   : > { %3563 = vmatpush1.bf16.msra.mxu0 %v7154_v31  ;;  %1313 = vmatprep.subr.bf16.mxu1 %v7159_v33  ;;  %v7216_v31 = vld [vmem:[%s10033_s1 + $0xc14] ss:$8 sps:$4 sm:$0xff]   ;;  %v972_v33 = vsel %vm960_vm1, %v970_v26, %v971_v20 }
  0xa6   : > { %3564 = vmatprep.subr.bf16.mxu0 %v7162_v55  ;;  %v3721_v55 = vsel %vm376_vm0, %v3712_v27, %v3720_v39  ;;  %v7264_v26 = vld [vmem:[%s10033_s1 + $0xc94] ss:$8 sps:$4 sm:$0xff]   ;;  %v1493_v27 = vshll.u32 %v1411_v14, 16 }
  0xa8   : > { %1314 = vmatpush1.bf16.msra.mxu1 %v7157_v34  ;;  %v3748_v34 = vshrl.u32 %v8427_v7, 16  ;;  %v7217_v7 = vld [vmem:[%s10033_s1 + $0x320] ss:$8 sps:$4 sm:$0xff]  }
  0xa9   : > { %3565 = vmatpush1.bf16.msra.mxu0 %v7160_v35  ;;  %1315 = vmatprep.subr.bf16.mxu1 %v7165_v38  ;;  %v7211_v35 = vld [vmem:[%s10033_s1 + $0x310] ss:$8 sps:$4 sm:$0xff]  }
  0xaa   : > { %3566 = vmatprep.subr.bf16.mxu0 %v7168_v41  ;;  %v8656_v39 = vrot.slane %v3748_v34, 1  ;;  %v7225_v41 = vld [vmem:[%s10033_s1 + $0x334] ss:$8 sps:$4 sm:$0xff]  }
  0xac   : > { %1316 = vmatpush1.bf16.msra.mxu1 %v7163_v46  ;;  %v7228_v46 = vld [vmem:[%s10033_s1 + $0xc34] ss:$8 sps:$4 sm:$0xff]  }
  0xad   : > { %3567 = vmatpush1.bf16.msra.mxu0 %v7166_v47  ;;  %1317 = vmatprep.subr.bf16.mxu1 %v7171_v48  ;;  %v3731_v47 = vshrl.u32 %v8438_v56, 16  ;;  %v8675_v48 = vrot.slane %v3165_v49, 2  ;;  %v7234_v56 = vld [vmem:[%s10033_s1 + $0xc44] ss:$8 sps:$4 sm:$0xff]  }
  0xae   : > { %3568 = vmatprep.subr.bf16.mxu0 %v7174_v32  ;;  %v7223_v32 = vld [vmem:[%s10033_s1 + $0x330] ss:$8 sps:$4 sm:$0xff]  }
  0xaf   : > { %v8689_v49 = vrot.slane %v3731_v47, 1 }
  0xb0   : > { %1318 = vmatpush1.bf16.msra.mxu1 %v7169_v51  ;;  %v7226_v51 = vld [vmem:[%s10033_s1 + $0xc30] ss:$8 sps:$4 sm:$0xff]  }
  0xb1   : > { %3569 = vmatpush1.bf16.msra.mxu0 %v7172_v53  ;;  %1319 = vmatprep.subr.bf16.mxu1 %v7177_v58  ;;  %v7231_v53 = vld [vmem:[%s10033_s1 + $0x344] ss:$8 sps:$4 sm:$0xff]   ;;  %v3737_v58 = vor.u32 %v8675_v48, %v8689_v49  ;;  %v7403_v48 = vld [vmem:[%s10033_s1 + $0x510] ss:$8 sps:$4 sm:$0xff]  }
  0xb2   : > { %3570 = vmatprep.subr.bf16.mxu0 %v7180_v59  ;;  %v7229_v59 = vld [vmem:[%s10033_s1 + $0x340] ss:$8 sps:$4 sm:$0xff]   ;;  %v7406_v49 = vld [vmem:[%s10033_s1 + $0xe10] ss:$8 sps:$4 sm:$0xff]  }
  0xb4   : > { %1320 = vmatpush1.bf16.msra.mxu1 %v7175_v60  ;;  %v7232_v60 = vld [vmem:[%s10033_s1 + $0xc40] ss:$8 sps:$4 sm:$0xff]  }
  0xb5   : > { %3571 = vmatpush1.bf16.msra.mxu0 %v7178_v61  ;;  %1321 = vmatprep.subr.bf16.mxu1 %v7183_v62  ;;  %v7237_v61 = vld [vmem:[%s10033_s1 + $0x354] ss:$8 sps:$4 sm:$0xff]  }
  0xb6   : > { %3572 = vmatprep.subr.bf16.mxu0 %v7186_v63  ;;  %v7240_v62 = vld [vmem:[%s10033_s1 + $0xc54] ss:$8 sps:$4 sm:$0xff]   ;;  %v7235_v63 = vld [vmem:[%s10033_s1 + $0x350] ss:$8 sps:$4 sm:$0xff]  }
  0xb8   : > { %1322 = vmatpush1.bf16.msra.mxu1 %v7181_v0  ;;  %v7238_v0 = vld [vmem:[%s10033_s1 + $0xc50] ss:$8 sps:$4 sm:$0xff]  }
  0xb9   : > { %3573 = vmatpush1.bf16.msra.mxu0 %v7184_v2  ;;  %1323 = vmatprep.subr.bf16.mxu1 %v7189_v3  ;;  %v7243_v2 = vld [vmem:[%s10033_s1 + $0x364] ss:$8 sps:$4 sm:$0xff]  }
  0xba   : > { %3574 = vmatprep.subr.bf16.mxu0 %v7192_v4  ;;  %v7246_v3 = vld [vmem:[%s10033_s1 + $0xc64] ss:$8 sps:$4 sm:$0xff]   ;;  %v7241_v4 = vld [vmem:[%s10033_s1 + $0x360] ss:$8 sps:$4 sm:$0xff]  }
  0xbc   : > { %1324 = vmatpush1.bf16.msra.mxu1 %v7187_v5  ;;  %v7244_v5 = vld [vmem:[%s10033_s1 + $0xc60] ss:$8 sps:$4 sm:$0xff]  }
  0xbd   : > { %3575 = vmatpush1.bf16.msra.mxu0 %v7190_v6  ;;  %1325 = vmatprep.subr.bf16.mxu1 %v7195_v52  ;;  %v1412_v6 = vpack.c.bf16 %v8579_v37, %v8579_v37  ;;  %v7249_v52 = vld [vmem:[%s10033_s1 + $0x374] ss:$8 sps:$4 sm:$0xff]   ;;  %v7250_v37 = vld [vmem:[%s10033_s1 + $0xc70] ss:$8 sps:$4 sm:$0xff]  }
  0xbe   : > { %3576 = vmatprep.subr.bf16.mxu0 %v7198_v1  ;;  %v7252_v1 = vld [vmem:[%s10033_s1 + $0xc74] ss:$8 sps:$4 sm:$0xff]  }
  0xc0   : > { %1326 = vmatpush1.bf16.msra.mxu1 %v7193_v9  ;;  %v7247_v9 = vld [vmem:[%s10033_s1 + $0x370] ss:$8 sps:$4 sm:$0xff]  }
  0xc1   : > { %3577 = vmatpush1.bf16.msra.mxu0 %v7196_v11  ;;  %1327 = vmatprep.subr.bf16.mxu1 %v7201_v40  ;;  %v1507_v11 = vshrl.u32 %v1412_v6, 16  ;;  %v1510_v40 = vshll.u32 %v1412_v6, 16  ;;  %v7277_v6 = vld [vmem:[%s10033_s1 + $0x3c0] ss:$8 sps:$4 sm:$0xff]  }
  0xc2   : > { %3578 = vmatprep.subr.bf16.mxu0 %v7204_v15  ;;  %v7258_v15 = vld [vmem:[%s10033_s1 + $0xc84] ss:$8 sps:$4 sm:$0xff]  }
  0xc4   : > { %1328 = vmatpush1.bf16.msra.mxu1 %v7199_v23  ;;  %v5807_v23 = vld [vmem:[%s8020_s12 + $0x48] sm:$0xff] }
  0xc5   : > { %3579 = vmatpush1.bf16.msra.mxu0 %v7202_v24  ;;  %1340 = vmatprep.subr.bf16.mxu1 %v7207_v18  ;;  %v1509_v24 = vrot.slane %v1507_v11, 2  ;;  %v1512_v18 = vrot.slane %v1510_v40, 3  ;;  %v1408_v20 = vpack.c.bf16 %v8576_v8, %v5807_v23  ;;  %v5806_v8 = vld [vmem:[%s8020_s12 + $0x40] sm:$0xff]  ;;  %v7283_v11 = vld [vmem:[%s10033_s1 + $0x3d0] ss:$8 sps:$4 sm:$0xff]  }
  0xc6   : > { %4080 = vmatprep.subr.bf16.mxu0 %v7210_v25  ;;  %v1490_v25 = vshrl.u32 %v1411_v14, 16  ;;  %v7291_v40 = vld [vmem:[%s10033_s1 + $0x3e4] ss:$8 sps:$4 sm:$0xff]   ;;  %v3618_v14 = vpack.c.bf16 %v8596_v13, %v8593_v36  ;;  %v7289_v23 = vld [vmem:[%s10033_s1 + $0x3e0] ss:$8 sps:$4 sm:$0xff]  }
  0xc7   : > { %1330 = vmatmul.mubr.bf16.vlgmr.msra.gmra.mrb[0].mxu1 %v8172_v57  ;;  %v7214_v57 = vld [vmem:[%s10033_s1 + $0xc10] ss:$8 sps:$4 sm:$0xff]   ;;  %v1513_v34 = vor.u32 %v1512_v18, %v1509_v24  ;;  %v7292_v18 = vld [vmem:[%s10033_s1 + $0xce0] ss:$8 sps:$4 sm:$0xff]  }
  0xc8   : > { %3581 = vmatmul.mubr.bf16.vlgmr.msra.gmra.mrb[0].mxu0 %v8465_v22  ;;  %1341 = vmatpush1.bf16.msra.mxu1 %v7205_v28  ;;  %v8648_v22 = vrot.slane %v3177_v12, 2  ;;  %v7220_v12 = vld [vmem:[%s10033_s1 + $0xc20] ss:$8 sps:$4 sm:$0xff]   ;;  %v7259_v28 = vld [vmem:[%s10033_s1 + $0x390] ss:$8 sps:$4 sm:$0xff]   ;;  %v3740_v13 = vshrl.u32 %v3618_v14, 16 }
  0xc9   : > { %4081 = vmatpush1.bf16.msra.mxu0 %v7208_v29  ;;  %1342 = vmatprep.subr.bf16.mxu1 %v7213_v30  ;;  %v7262_v29 = vld [vmem:[%s10033_s1 + $0xc90] ss:$8 sps:$4 sm:$0xff]   ;;  %v7267_v30 = vld [vmem:[%s10033_s1 + $0x3a4] ss:$8 sps:$4 sm:$0xff]   ;;  %v3743_v24 = vshll.u32 %v3618_v14, 16 }
  0xca   : > { %4082 = vmatprep.subr.bf16.mxu0 %v7216_v31  ;;  %1372 = vmatprep.mubr.bf16.mxu1 %v972_v33  ;;  %v3754_v38 = vor.u32 %v8648_v22, %v8656_v39  ;;  %v6362_v31 = vld [vmem:[%s8020_s12 + $0x60] sm:$0xff]  ;;  %v1499_v33 = vshrl.u32 %v1408_v20, 16  ;;  %v7343_v14 = vld [vmem:[%s10033_s1 + $0x470] ss:$8 sps:$4 sm:$0xff]  }
  0xcb   : > { %4112 = vmatprep.mubr.bf16.mxu0 %v3721_v55  ;;  %v1502_v55 = vshll.u32 %v1408_v20, 16  ;;  %v7318_v22 = vld [vmem:[%s10033_s1 + $0xd24] ss:$8 sps:$4 sm:$0xff]   ;;  %v7313_v39 = vld [vmem:[%s10033_s1 + $0x420] ss:$8 sps:$4 sm:$0xff]  }
  0xcc   : > { %1343 = vmatpush1.bf16.msra.mxu1 %v7211_v35  ;;  %v1492_v35 = vrot.slane %v1490_v25, 2  ;;  %v7797_v25 = vld [vmem:[%s8020_s12 + $0x50] sm:$0xff] }
  0xcd   : > { %4083 = vmatpush1.bf16.msra.mxu0 %v7214_v57  ;;  %1344 = vmatprep.subr.bf16.mxu1 %v7219_v42  ;;  %v7270_v57 = vld [vmem:[%s10033_s1 + $0xca4] ss:$8 sps:$4 sm:$0xff]   ;;  %v1501_v42 = vrot.slane %v1499_v33, 2  ;;  %v3742_v33 = vrot.slane %v3740_v13, 1  ;;  %v7352_v13 = vld [vmem:[%s10033_s1 + $0xd80] ss:$8 sps:$4 sm:$0xff]  }
  0xce   : > { %4084 = vmatprep.subr.bf16.mxu0 %v7222_v43  ;;  %v1504_v43 = vrot.slane %v1502_v55, 3  ;;  %v3745_v55 = vrot.slane %v3743_v24, 2  ;;  %v7357_v24 = vld [vmem:[%s10033_s1 + $0x494] ss:$8 sps:$4 sm:$0xff]  }
  0xd0   : > { %1345 = vmatpush1.bf16.msra.mxu1 %v7217_v7  ;;  %v1407_v7 = vpack.c.bf16 %v6362_v31, %v5806_v8 }
  0xd1   : > { %4085 = vmatpush1.bf16.msra.mxu0 %v7220_v12  ;;  %1346 = vmatprep.subr.bf16.mxu1 %v7225_v41  ;;  %v1495_v12 = vrot.slane %v1493_v27, 3  ;;  %v7265_v41 = vld [vmem:[%s10033_s1 + $0x3a0] ss:$8 sps:$4 sm:$0xff]  }
  0xd2   : > { %4086 = vmatprep.subr.bf16.mxu0 %v7228_v46  ;;  %v1505_v46 = vor.u32 %v1504_v43, %v1501_v42  ;;  %v1482_v47 = vshrl.u32 %v1407_v7, 16  ;;  %v7303_v42 = vld [vmem:[%s10033_s1 + $0x404] ss:$8 sps:$4 sm:$0xff]  }
  0xd3   : > { %v7306_v43 = vld [vmem:[%s10033_s1 + $0xd04] ss:$8 sps:$4 sm:$0xff]  }
  0xd4   : > { %1347 = vmatpush1.bf16.msra.mxu1 %v7223_v32  ;;  %v1485_v32 = vshll.u32 %v1407_v7, 16  ;;  %v3746_v7 = vor.u32 %v3745_v55, %v3742_v33  ;;  %v7372_v33 = vld [vmem:[%s10033_s1 + $0xdb4] ss:$8 sps:$4 sm:$0xff]   ;;  %v7367_v55 = vld [vmem:[%s10033_s1 + $0x4b0] ss:$8 sps:$4 sm:$0xff]  }
  0xd5   : > { %4087 = vmatpush1.bf16.msra.mxu0 %v7226_v51  ;;  %1348 = vmatprep.subr.bf16.mxu1 %v7231_v53  ;;  %v7268_v51 = vld [vmem:[%s10033_s1 + $0xca0] ss:$8 sps:$4 sm:$0xff]   ;;  %v7273_v53 = vld [vmem:[%s10033_s1 + $0x3b4] ss:$8 sps:$4 sm:$0xff]  }
  0xd6   : > { %4088 = vmatprep.subr.bf16.mxu0 %v7234_v56  ;;  %v7276_v56 = vld [vmem:[%s10033_s1 + $0xcb4] ss:$8 sps:$4 sm:$0xff]  }
  0xd8   : > { %1349 = vmatpush1.bf16.msra.mxu1 %v7229_v59  ;;  %v8789_v59 = vsel %vm1480_vm3, %v1505_v46, %v1513_v34  ;;  %v7298_v34 = vld [vmem:[%s10033_s1 + $0xcf0] ss:$8 sps:$4 sm:$0xff]  }
  0xd9   : > { %4089 = vmatpush1.bf16.msra.mxu0 %v7232_v60  ;;  %1350 = vmatprep.subr.bf16.mxu1 %v7237_v61  ;;  %v1484_v60 = vrot.slane %v1482_v47, 2  ;;  %v1487_v61 = vrot.slane %v1485_v32, 3  ;;  %v7309_v32 = vld [vmem:[%s10033_s1 + $0x414] ss:$8 sps:$4 sm:$0xff]  }
  0xda   : > { %4090 = vmatprep.subr.bf16.mxu0 %v7240_v62  ;;  %v1496_v62 = vor.u32 %v1495_v12, %v1492_v35  ;;  %v7301_v12 = vld [vmem:[%s10033_s1 + $0x400] ss:$8 sps:$4 sm:$0xff]  }
  0xdc   : > { %1351 = vmatpush1.bf16.msra.mxu1 %v7235_v63  ;;  %v1488_v63 = vor.u32 %v1487_v61, %v1484_v60  ;;  %v7319_v60 = vld [vmem:[%s10033_s1 + $0x430] ss:$8 sps:$4 sm:$0xff]  }
  0xdd   : > { %4091 = vmatpush1.bf16.msra.mxu0 %v7238_v0  ;;  %1352 = vmatprep.subr.bf16.mxu1 %v7243_v2  ;;  %v7271_v0 = vld [vmem:[%s10033_s1 + $0x3b0] ss:$8 sps:$4 sm:$0xff]  }
  0xde   : > { %4092 = vmatprep.subr.bf16.mxu0 %v7246_v3  ;;  %v7274_v2 = vld [vmem:[%s10033_s1 + $0xcb0] ss:$8 sps:$4 sm:$0xff]   ;;  %v7279_v3 = vld [vmem:[%s10033_s1 + $0x3c4] ss:$8 sps:$4 sm:$0xff]  }
  0xdf   : > { %v7322_v61 = vld [vmem:[%s10033_s1 + $0xd30] ss:$8 sps:$4 sm:$0xff]  }
  0xe0   : > { %1353 = vmatpush1.bf16.msra.mxu1 %v7241_v4  ;;  %v7282_v4 = vld [vmem:[%s10033_s1 + $0xcc4] ss:$8 sps:$4 sm:$0xff]  }
  0xe1   : > { %4093 = vmatpush1.bf16.msra.mxu0 %v7244_v5  ;;  %1354 = vmatprep.subr.bf16.mxu1 %v7249_v52  ;;  %v8804_v5 = vsel %vm1480_vm3, %v1488_v63, %v1496_v62  ;;  %v7280_v52 = vld [vmem:[%s10033_s1 + $0xcc0] ss:$8 sps:$4 sm:$0xff]   ;;  %v7327_v62 = vld [vmem:[%s10033_s1 + $0x444] ss:$8 sps:$4 sm:$0xff]  }
  0xe2   : > { %4094 = vmatprep.subr.bf16.mxu0 %v7252_v1  ;;  %v3615_v1 = vpack.c.bf16 %v8735_v10, %v6362_v31  ;;  %v7286_v10 = vld [vmem:[%s10033_s1 + $0xcd0] ss:$8 sps:$4 sm:$0xff]   ;;  %v7330_v63 = vld [vmem:[%s10033_s1 + $0xd44] ss:$8 sps:$4 sm:$0xff]  }
  0xe3   : > { %v7295_v31 = vld [vmem:[%s10033_s1 + $0x3f0] ss:$8 sps:$4 sm:$0xff]  }
  0xe4   : > { %1355 = vmatpush1.bf16.msra.mxu1 %v7247_v9  ;;  %v7285_v9 = vld [vmem:[%s10033_s1 + $0x3d4] ss:$8 sps:$4 sm:$0xff]  }
  0xe5   : > { %4095 = vmatpush1.bf16.msra.mxu0 %v7250_v37  ;;  %1356 = vmatprep.subr.bf16.mxu1 %v7255_v50  ;;  %v7288_v37 = vld [vmem:[%s10033_s1 + $0xcd4] ss:$8 sps:$4 sm:$0xff]   ;;  %v7294_v50 = vld [vmem:[%s10033_s1 + $0xce4] ss:$8 sps:$4 sm:$0xff]  }
  0xe6   : > { %4096 = vmatprep.subr.bf16.mxu0 %v7258_v15  ;;  %v3689_v15 = vshrl.u32 %v3615_v1, 16 }
  0xe8   : > { %1357 = vmatpush1.bf16.msra.mxu1 %v7253_v16  ;;  %v3692_v16 = vshll.u32 %v3615_v1, 16  ;;  %v3691_v27 = vrot.slane %v3689_v15, 1  ;;  %v7339_v1 = vld [vmem:[%s10033_s1 + $0x464] ss:$8 sps:$4 sm:$0xff]  }
  0xe9   : > { %4097 = vmatpush1.bf16.msra.mxu0 %v7256_v19  ;;  %1358 = vmatprep.subr.bf16.mxu1 %v7261_v21  ;;  %v8834_v19 = vld [vmem:[%s8020_s12 + $0x70] sm:$0xff]  ;;  %v7351_v15 = vld [vmem:[%s10033_s1 + $0x484] ss:$8 sps:$4 sm:$0xff]  }
  0xea   : > { %4098 = vmatprep.subr.bf16.mxu0 %v7264_v26  ;;  %v8837_v21 = vld [vmem:[%s8020_s12 + $0x90] sm:$0xff]  ;;  %v881_v26 = vpack.c.bf16 %v8834_v19, %v7797_v25 }
  0xeb   : > { %v8849_v20 = vpack.c.bf16 %v8837_v21, %v8837_v21  ;;  %v7355_v25 = vld [vmem:[%s10033_s1 + $0x490] ss:$8 sps:$4 sm:$0xff]  }
  0xec   : > { %1359 = vmatpush1.bf16.msra.mxu1 %v7259_v28  ;;  %v3694_v28 = vrot.slane %v3692_v16, 2  ;;  %v967_v8 = vrot.slane %v881_v26, 2  ;;  %v7354_v16 = vld [vmem:[%s10033_s1 + $0xd84] ss:$8 sps:$4 sm:$0xff]   ;;  %v7358_v26 = vld [vmem:[%s10033_s1 + $0xd90] ss:$8 sps:$4 sm:$0xff]  }
  0xed   : > { %4099 = vmatpush1.bf16.msra.mxu0 %v7262_v29  ;;  %1360 = vmatprep.subr.bf16.mxu1 %v7267_v30  ;;  %v7297_v29 = vld [vmem:[%s10033_s1 + $0x3f4] ss:$8 sps:$4 sm:$0xff]   ;;  %v968_v35 = vrot.slane %v8849_v20, 2 }
  0xee   : > { %4100 = vmatprep.subr.bf16.mxu0 %v7270_v57  ;;  %v7300_v30 = vld [vmem:[%s10033_s1 + $0xcf4] ss:$8 sps:$4 sm:$0xff]   ;;  %v3695_v57 = vor.u32 %v3694_v28, %v3691_v27  ;;  %v7363_v27 = vld [vmem:[%s10033_s1 + $0x4a4] ss:$8 sps:$4 sm:$0xff]  }
  0xef   : > { %v969_v46 = vsel %vm960_vm1, %v967_v8, %v968_v35  ;;  %v7366_v28 = vld [vmem:[%s10033_s1 + $0xda4] ss:$8 sps:$4 sm:$0xff]  }
  0xf0   : > { %1361 = vmatpush1.bf16.msra.mxu1 %v7265_v41  ;;  %v7304_v41 = vld [vmem:[%s10033_s1 + $0xd00] ss:$8 sps:$4 sm:$0xff]   ;;  %v3704_v47 = vsel %vm376_vm0, %v3695_v57, %v3703_v54  ;;  %v7315_v54 = vld [vmem:[%s10033_s1 + $0x424] ss:$8 sps:$4 sm:$0xff]  }
  0xf1   : > { %4101 = vmatpush1.bf16.msra.mxu0 %v7268_v51  ;;  %1362 = vmatprep.subr.bf16.mxu1 %v7273_v53  ;;  %v7312_v51 = vld [vmem:[%s10033_s1 + $0xd14] ss:$8 sps:$4 sm:$0xff]   ;;  %v3755_v53 = vsel %vm376_vm0, %v3746_v7, %v3754_v38  ;;  %v7316_v38 = vld [vmem:[%s10033_s1 + $0xd20] ss:$8 sps:$4 sm:$0xff]   ;;  %v7375_v8 = vld [vmem:[%s10033_s1 + $0x4c4] ss:$8 sps:$4 sm:$0xff]  }
  0xf2   : > { %4102 = vmatprep.subr.bf16.mxu0 %v7276_v56  ;;  %v7321_v56 = vld [vmem:[%s10033_s1 + $0x434] ss:$8 sps:$4 sm:$0xff]   ;;  %v7378_v35 = vld [vmem:[%s10033_s1 + $0xdc4] ss:$8 sps:$4 sm:$0xff]   ;;  %v7373_v57 = vld [vmem:[%s10033_s1 + $0x4c0] ss:$8 sps:$4 sm:$0xff]  }
  0xf3   : > { %v7381_v7 = vld [vmem:[%s10033_s1 + $0x4d4] ss:$8 sps:$4 sm:$0xff]  }
  0xf4   : > { %1363 = vmatpush1.bf16.msra.mxu1 %v7271_v0  ;;  %v7325_v0 = vld [vmem:[%s10033_s1 + $0x440] ss:$8 sps:$4 sm:$0xff]  }
  0xf5   : > { %4103 = vmatpush1.bf16.msra.mxu0 %v7274_v2  ;;  %1364 = vmatprep.subr.bf16.mxu1 %v7279_v3  ;;  %v7328_v2 = vld [vmem:[%s10033_s1 + $0xd40] ss:$8 sps:$4 sm:$0xff]   ;;  %v7333_v3 = vld [vmem:[%s10033_s1 + $0x454] ss:$8 sps:$4 sm:$0xff]  }
  0xf6   : > { %4104 = vmatprep.subr.bf16.mxu0 %v7282_v4  ;;  %v7336_v4 = vld [vmem:[%s10033_s1 + $0xd54] ss:$8 sps:$4 sm:$0xff]  }
  0xf8   : > { %1365 = vmatpush1.bf16.msra.mxu1 %v7277_v6  ;;  %v7331_v6 = vld [vmem:[%s10033_s1 + $0x450] ss:$8 sps:$4 sm:$0xff]  }
  0xf9   : > { %4105 = vmatpush1.bf16.msra.mxu0 %v7280_v52  ;;  %1366 = vmatprep.subr.bf16.mxu1 %v7285_v9  ;;  %v7334_v52 = vld [vmem:[%s10033_s1 + $0xd50] ss:$8 sps:$4 sm:$0xff]   ;;  %v7342_v9 = vld [vmem:[%s10033_s1 + $0xd64] ss:$8 sps:$4 sm:$0xff]  }
  0xfa   : > { %4106 = vmatprep.subr.bf16.mxu0 %v7288_v37  ;;  %v7337_v37 = vld [vmem:[%s10033_s1 + $0x460] ss:$8 sps:$4 sm:$0xff]  }
  0xfc   : > { %1367 = vmatpush1.bf16.msra.mxu1 %v7283_v11  ;;  %v7340_v11 = vld [vmem:[%s10033_s1 + $0xd60] ss:$8 sps:$4 sm:$0xff]  }
  0xfd   : > { %4107 = vmatpush1.bf16.msra.mxu0 %v7286_v10  ;;  %1368 = vmatprep.subr.bf16.mxu1 %v7291_v40  ;;  %v7345_v10 = vld [vmem:[%s10033_s1 + $0x474] ss:$8 sps:$4 sm:$0xff]  }
  0xfe   : > { %4108 = vmatprep.subr.bf16.mxu0 %v7294_v50  ;;  %v7348_v40 = vld [vmem:[%s10033_s1 + $0xd74] ss:$8 sps:$4 sm:$0xff]   ;;  %v7346_v50 = vld [vmem:[%s10033_s1 + $0xd70] ss:$8 sps:$4 sm:$0xff]  }
 0x100   : > { %1369 = vmatpush1.bf16.msra.mxu1 %v7289_v23  ;;  %v7349_v23 = vld [vmem:[%s10033_s1 + $0x480] ss:$8 sps:$4 sm:$0xff]  }
 0x101   : > { %4109 = vmatpush1.bf16.msra.mxu0 %v7292_v18  ;;  %1370 = vmatprep.subr.bf16.mxu1 %v7297_v29  ;;  %v7360_v18 = vld [vmem:[%s10033_s1 + $0xd94] ss:$8 sps:$4 sm:$0xff]   ;;  %v7361_v29 = vld [vmem:[%s10033_s1 + $0x4a0] ss:$8 sps:$4 sm:$0xff]  }
 0x102   : > { %4110 = vmatprep.subr.bf16.mxu0 %v7300_v30  ;;  %v7364_v30 = vld [vmem:[%s10033_s1 + $0xda0] ss:$8 sps:$4 sm:$0xff]  }
 0x104   : > { %1371 = vmatpush1.bf16.msra.mxu1 %v7295_v31  ;;  %v7369_v31 = vld [vmem:[%s10033_s1 + $0x4b4] ss:$8 sps:$4 sm:$0xff]  }
 0x105   : > { %4111 = vmatpush1.bf16.msra.mxu0 %v7298_v34  ;;  %1873 = vmatprep.subr.bf16.mxu1 %v7303_v42  ;;  %v7370_v34 = vld [vmem:[%s10033_s1 + $0xdb0] ss:$8 sps:$4 sm:$0xff]   ;;  %v7376_v42 = vld [vmem:[%s10033_s1 + $0xdc0] ss:$8 sps:$4 sm:$0xff]  }
 0x106   : > { %4123 = vmatprep.subr.bf16.mxu0 %v7306_v43  ;;  %v3617_v43 = vpack.c.bf16 %v8837_v21, %v8834_v19  ;;  %v7379_v21 = vld [vmem:[%s10033_s1 + $0x4d0] ss:$8 sps:$4 sm:$0xff]  }
 0x107   : > { %1373 = vmatmul.mubr.bf16.vlgmr.msra.gmra.mrb[0].mxu1 %v969_v46 }
 0x108   : > { %4113 = vmatmul.mubr.bf16.vlgmr.msra.gmra.mrb[0].mxu0 %v3704_v47  ;;  %1874 = vmatpush1.bf16.msra.mxu1 %v7301_v12  ;;  %v5809_v12 = vld [vmem:[%s8020_s12 + $0x58] sm:$0xff]  ;;  %v3723_v46 = vshrl.u32 %v3617_v43, 16 }
 0x109   : > { %4124 = vmatpush1.bf16.msra.mxu0 %v7304_v41  ;;  %1875 = vmatprep.subr.bf16.mxu1 %v7309_v32  ;;  %v7384_v41 = vld [vmem:[%s10033_s1 + $0xdd4] ss:$8 sps:$4 sm:$0xff]   ;;  %v1410_v47 = vpack.c.bf16 %v8593_v36, %v5809_v12  ;;  %v7382_v32 = vld [vmem:[%s10033_s1 + $0xdd0] ss:$8 sps:$4 sm:$0xff]   ;;  %v7390_v36 = vld [vmem:[%s10033_s1 + $0xde4] ss:$8 sps:$4 sm:$0xff]  }
 0x10a   : > { %4125 = vmatprep.subr.bf16.mxu0 %v7312_v51  ;;  %1905 = vmatprep.mubr.bf16.mxu1 %v8789_v59  ;;  %v7324_v59 = vld [vmem:[%s10033_s1 + $0xd34] ss:$8 sps:$4 sm:$0xff]   ;;  %v3726_v51 = vshll.u32 %v3617_v43, 16  ;;  %v7427_v43 = vld [vmem:[%s10033_s1 + $0x550] ss:$8 sps:$4 sm:$0xff]  }
 0x10b   : > { %4155 = vmatprep.mubr.bf16.mxu0 %v3755_v53  ;;  %v7387_v53 = vld [vmem:[%s10033_s1 + $0x4e4] ss:$8 sps:$4 sm:$0xff]  }
 0x10c   : > { %1876 = vmatpush1.bf16.msra.mxu1 %v7307_v44  ;;  %v7385_v44 = vld [vmem:[%s10033_s1 + $0x4e0] ss:$8 sps:$4 sm:$0xff]   ;;  %v7435_v12 = vld [vmem:[%s10033_s1 + $0x564] ss:$8 sps:$4 sm:$0xff]  }
 0x10d   : > { %4126 = vmatpush1.bf16.msra.mxu0 %v7310_v45  ;;  %1877 = vmatprep.subr.bf16.mxu1 %v7315_v54  ;;  %v7388_v45 = vld [vmem:[%s10033_s1 + $0xde0] ss:$8 sps:$4 sm:$0xff]   ;;  %v1541_v54 = vshrl.u32 %v8605_v17, 16 }
 0x10e   : > { %4127 = vmatprep.subr.bf16.mxu0 %v7318_v22  ;;  %v1544_v22 = vshll.u32 %v8605_v17, 16  ;;  %v7396_v17 = vld [vmem:[%s10033_s1 + $0xdf4] ss:$8 sps:$4 sm:$0xff]  }
 0x110   : > { %1878 = vmatpush1.bf16.msra.mxu1 %v7313_v39  ;;  %v9061_v39 = vld [vmem:[%s8020_s12 + $0x68] sm:$0xff] }
 0x111   : > { %4128 = vmatpush1.bf16.msra.mxu0 %v7316_v38  ;;  %1879 = vmatprep.subr.bf16.mxu1 %v7321_v56  ;;  %v1533_v38 = vshrl.u32 %v1410_v47, 16  ;;  %v1536_v56 = vshll.u32 %v1410_v47, 16  ;;  %v7436_v47 = vld [vmem:[%s10033_s1 + $0xe60] ss:$8 sps:$4 sm:$0xff]  }
 0x112   : > { %4129 = vmatprep.subr.bf16.mxu0 %v7324_v59  ;;  %v3725_v59 = vrot.slane %v3723_v46, 1  ;;  %v7433_v46 = vld [vmem:[%s10033_s1 + $0x560] ss:$8 sps:$4 sm:$0xff]  }
 0x114   : > { %1880 = vmatpush1.bf16.msra.mxu1 %v7319_v60  ;;  %v3728_v60 = vrot.slane %v3726_v51, 2  ;;  %v7439_v51 = vld [vmem:[%s10033_s1 + $0x570] ss:$8 sps:$4 sm:$0xff]  }
 0x115   : > { %4130 = vmatpush1.bf16.msra.mxu0 %v7322_v61  ;;  %1881 = vmatprep.subr.bf16.mxu1 %v7327_v62  ;;  %v9064_v61 = vld [vmem:[%s8020_s12 + $0x88] sm:$0xff] }
 0x116   : > { %4131 = vmatprep.subr.bf16.mxu0 %v7330_v63  ;;  %v6511_v62 = vld [vmem:[%s8020_s12 + $0xa8] sm:$0xff]  ;;  %v7393_v63 = vld [vmem:[%s10033_s1 + $0x4f4] ss:$8 sps:$4 sm:$0xff]  }
 0x118   : > { %1882 = vmatpush1.bf16.msra.mxu1 %v7325_v0  ;;  %v1543_v0 = vrot.slane %v1541_v54, 2  ;;  %v7448_v54 = vld [vmem:[%s10033_s1 + $0xe80] ss:$8 sps:$4 sm:$0xff]  }
 0x119   : > { %4132 = vmatpush1.bf16.msra.mxu0 %v7328_v2  ;;  %1883 = vmatprep.subr.bf16.mxu1 %v7333_v3  ;;  %v1546_v2 = vrot.slane %v1544_v22, 3  ;;  %v1535_v3 = vrot.slane %v1533_v38, 2  ;;  %v7453_v22 = vld [vmem:[%s10033_s1 + $0x594] ss:$8 sps:$4 sm:$0xff]  }
 0x11a   : > { %4133 = vmatprep.subr.bf16.mxu0 %v7336_v4  ;;  %v1538_v4 = vrot.slane %v1536_v56, 3  ;;  %v7456_v38 = vld [vmem:[%s10033_s1 + $0xe94] ss:$8 sps:$4 sm:$0xff]   ;;  %v7451_v56 = vld [vmem:[%s10033_s1 + $0x590] ss:$8 sps:$4 sm:$0xff]  }
 0x11c   : > { %1884 = vmatpush1.bf16.msra.mxu1 %v7331_v6  ;;  %v9075_v6 = vpack.c.bf16 %v9064_v61, %v9061_v39 }
 0x11d   : > { %4134 = vmatpush1.bf16.msra.mxu0 %v7334_v52  ;;  %1885 = vmatprep.subr.bf16.mxu1 %v7339_v1  ;;  %v9077_v52 = vpack.c.bf16 %v6511_v62, %v6511_v62  ;;  %v7391_v1 = vld [vmem:[%s10033_s1 + $0x4f0] ss:$8 sps:$4 sm:$0xff]   ;;  %v7462_v62 = vld [vmem:[%s10033_s1 + $0xea4] ss:$8 sps:$4 sm:$0xff]  }
 0x11e   : > { %4135 = vmatprep.subr.bf16.mxu0 %v7342_v9  ;;  %v7394_v9 = vld [vmem:[%s10033_s1 + $0xdf0] ss:$8 sps:$4 sm:$0xff]  }
 0x120   : > { %1886 = vmatpush1.bf16.msra.mxu1 %v7337_v37  ;;  %v3729_v37 = vor.u32 %v3728_v60, %v3725_v59  ;;  %v7454_v59 = vld [vmem:[%s10033_s1 + $0xe90] ss:$8 sps:$4 sm:$0xff]   ;;  %v7459_v60 = vld [vmem:[%s10033_s1 + $0x5a4] ss:$8 sps:$4 sm:$0xff]  }
 0x121   : > { %4136 = vmatpush1.bf16.msra.mxu0 %v7340_v11  ;;  %1887 = vmatprep.subr.bf16.mxu1 %v7345_v10  ;;  %v7399_v11 = vld [vmem:[%s10033_s1 + $0x504] ss:$8 sps:$4 sm:$0xff]  }
 0x122   : > { %4137 = vmatprep.subr.bf16.mxu0 %v7348_v40  ;;  %v7402_v10 = vld [vmem:[%s10033_s1 + $0xe04] ss:$8 sps:$4 sm:$0xff]   ;;  %v1539_v40 = vor.u32 %v1538_v4, %v1535_v3  ;;  %v7463_v3 = vld [vmem:[%s10033_s1 + $0x5b0] ss:$8 sps:$4 sm:$0xff]  }
 0x123   : > { %v7466_v4 = vld [vmem:[%s10033_s1 + $0xeb0] ss:$8 sps:$4 sm:$0xff]  }
 0x124   : > { %1888 = vmatpush1.bf16.msra.mxu1 %v7343_v14  ;;  %v1547_v14 = vor.u32 %v1546_v2, %v1543_v0  ;;  %v7465_v0 = vld [vmem:[%s10033_s1 + $0x5b4] ss:$8 sps:$4 sm:$0xff]  }
 0x125   : > { %4138 = vmatpush1.bf16.msra.mxu0 %v7346_v50  ;;  %1889 = vmatprep.subr.bf16.mxu1 %v7351_v15  ;;  %v4274_v50 = vrot.slane %v9075_v6, 2  ;;  %v4275_v15 = vrot.slane %v9077_v52, 2  ;;  %v7468_v2 = vld [vmem:[%s10033_s1 + $0xeb4] ss:$8 sps:$4 sm:$0xff]  }
 0x126   : > { %4139 = vmatprep.subr.bf16.mxu0 %v7354_v16  ;;  %v7397_v16 = vld [vmem:[%s10033_s1 + $0x500] ss:$8 sps:$4 sm:$0xff]  }
 0x128   : > { %1890 = vmatpush1.bf16.msra.mxu1 %v7349_v23  ;;  %v7400_v23 = vld [vmem:[%s10033_s1 + $0xe00] ss:$8 sps:$4 sm:$0xff]  }
 0x129   : > { %4140 = vmatpush1.bf16.msra.mxu0 %v7352_v13  ;;  %1891 = vmatprep.subr.bf16.mxu1 %v7357_v24  ;;  %v3738_v13 = vsel %vm376_vm0, %v3729_v37, %v3737_v58  ;;  %v7405_v24 = vld [vmem:[%s10033_s1 + $0x514] ss:$8 sps:$4 sm:$0xff]   ;;  %v7411_v58 = vld [vmem:[%s10033_s1 + $0x524] ss:$8 sps:$4 sm:$0xff]  }
 0x12a   : > { %4141 = vmatprep.subr.bf16.mxu0 %v7360_v18  ;;  %v7408_v18 = vld [vmem:[%s10033_s1 + $0xe14] ss:$8 sps:$4 sm:$0xff]  }
 0x12b   : > { %v9245_v37 = vld [vmem:[%s8020_s12 + $0x50] sm:$0xff] }
 0x12c   : > { %1892 = vmatpush1.bf16.msra.mxu1 %v7355_v25  ;;  %v1548_v25 = vsel %vm1480_vm3, %v1539_v40, %v1547_v14  ;;  %v1409_v40 = vpack.c.bf16 %v8834_v19, %v9245_v37  ;;  %v7477_v14 = vld [vmem:[%s10033_s1 + $0x5d4] ss:$8 sps:$4 sm:$0xff]   ;;  %v7478_v19 = vld [vmem:[%s10033_s1 + $0xed0] ss:$8 sps:$4 sm:$0xff]  }
 0x12d   : > { %4142 = vmatpush1.bf16.msra.mxu0 %v7358_v26  ;;  %1893 = vmatprep.subr.bf16.mxu1 %v7363_v27  ;;  %v4276_v26 = vsel %vm960_vm1, %v4274_v50, %v4275_v15  ;;  %v7409_v27 = vld [vmem:[%s10033_s1 + $0x520] ss:$8 sps:$4 sm:$0xff]   ;;  %v7480_v50 = vld [vmem:[%s10033_s1 + $0xed4] ss:$8 sps:$4 sm:$0xff]   ;;  %v7475_v15 = vld [vmem:[%s10033_s1 + $0x5d0] ss:$8 sps:$4 sm:$0xff]  }
 0x12e   : > { %4143 = vmatprep.subr.bf16.mxu0 %v7366_v28  ;;  %v7412_v28 = vld [vmem:[%s10033_s1 + $0xe20] ss:$8 sps:$4 sm:$0xff]  }
 0x130   : > { %1894 = vmatpush1.bf16.msra.mxu1 %v7361_v29  ;;  %v7417_v29 = vld [vmem:[%s10033_s1 + $0x534] ss:$8 sps:$4 sm:$0xff]  }
 0x131   : > { %4144 = vmatpush1.bf16.msra.mxu0 %v7364_v30  ;;  %1895 = vmatprep.subr.bf16.mxu1 %v7369_v31  ;;  %v7420_v30 = vld [vmem:[%s10033_s1 + $0xe34] ss:$8 sps:$4 sm:$0xff]   ;;  %v7415_v31 = vld [vmem:[%s10033_s1 + $0x530] ss:$8 sps:$4 sm:$0xff]  }
 0x132   : > { %4145 = vmatprep.subr.bf16.mxu0 %v7372_v33  ;;  %v7418_v33 = vld [vmem:[%s10033_s1 + $0xe30] ss:$8 sps:$4 sm:$0xff]  }
 0x134   : > { %1896 = vmatpush1.bf16.msra.mxu1 %v7367_v55  ;;  %v7423_v55 = vld [vmem:[%s10033_s1 + $0x544] ss:$8 sps:$4 sm:$0xff]  }
 0x135   : > { %4146 = vmatpush1.bf16.msra.mxu0 %v7370_v34  ;;  %1897 = vmatprep.subr.bf16.mxu1 %v7375_v8  ;;  %v7426_v34 = vld [vmem:[%s10033_s1 + $0xe44] ss:$8 sps:$4 sm:$0xff]   ;;  %v7421_v8 = vld [vmem:[%s10033_s1 + $0x540] ss:$8 sps:$4 sm:$0xff]  }
 0x136   : > { %4147 = vmatprep.subr.bf16.mxu0 %v7378_v35  ;;  %v7424_v35 = vld [vmem:[%s10033_s1 + $0xe40] ss:$8 sps:$4 sm:$0xff]  }
 0x138   : > { %1898 = vmatpush1.bf16.msra.mxu1 %v7373_v57  ;;  %v7429_v57 = vld [vmem:[%s10033_s1 + $0x554] ss:$8 sps:$4 sm:$0xff]  }
 0x139   : > { %4148 = vmatpush1.bf16.msra.mxu0 %v7376_v42  ;;  %1899 = vmatprep.subr.bf16.mxu1 %v7381_v7  ;;  %v7432_v42 = vld [vmem:[%s10033_s1 + $0xe54] ss:$8 sps:$4 sm:$0xff]   ;;  %v7430_v7 = vld [vmem:[%s10033_s1 + $0xe50] ss:$8 sps:$4 sm:$0xff]  }
 0x13a   : > { %4149 = vmatprep.subr.bf16.mxu0 %v7384_v41  ;;  %v7438_v41 = vld [vmem:[%s10033_s1 + $0xe64] ss:$8 sps:$4 sm:$0xff]  }
 0x13c   : > { %1900 = vmatpush1.bf16.msra.mxu1 %v7379_v21  ;;  %v7441_v21 = vld [vmem:[%s10033_s1 + $0x574] ss:$8 sps:$4 sm:$0xff]  }
 0x13d   : > { %4150 = vmatpush1.bf16.msra.mxu0 %v7382_v32  ;;  %1901 = vmatprep.subr.bf16.mxu1 %v7387_v53  ;;  %v7444_v32 = vld [vmem:[%s10033_s1 + $0xe74] ss:$8 sps:$4 sm:$0xff]   ;;  %v7442_v53 = vld [vmem:[%s10033_s1 + $0xe70] ss:$8 sps:$4 sm:$0xff]  }
 0x13e   : > { %4151 = vmatprep.subr.bf16.mxu0 %v7390_v36  ;;  %v7447_v36 = vld [vmem:[%s10033_s1 + $0x584] ss:$8 sps:$4 sm:$0xff]  }
 0x140   : > { %1902 = vmatpush1.bf16.msra.mxu1 %v7385_v44  ;;  %v7450_v44 = vld [vmem:[%s10033_s1 + $0xe84] ss:$8 sps:$4 sm:$0xff]  }
 0x141   : > { %4152 = vmatpush1.bf16.msra.mxu0 %v7388_v45  ;;  %1903 = vmatprep.subr.bf16.mxu1 %v7393_v63  ;;  %v7445_v45 = vld [vmem:[%s10033_s1 + $0x580] ss:$8 sps:$4 sm:$0xff]  }
 0x142   : > { %4153 = vmatprep.subr.bf16.mxu0 %v7396_v17  ;;  %v7457_v63 = vld [vmem:[%s10033_s1 + $0x5a0] ss:$8 sps:$4 sm:$0xff]  }
 0x143   : > { %v7460_v17 = vld [vmem:[%s10033_s1 + $0xea0] ss:$8 sps:$4 sm:$0xff]  }
 0x144   : > { %1904 = vmatpush1.bf16.msra.mxu1 %v7391_v1  ;;  %v7471_v1 = vld [vmem:[%s10033_s1 + $0x5c4] ss:$8 sps:$4 sm:$0xff]  }
 0x145   : > { %4154 = vmatpush1.bf16.msra.mxu0 %v7394_v9  ;;  %1916 = vmatprep.subr.bf16.mxu1 %v7399_v11  ;;  %v7474_v9 = vld [vmem:[%s10033_s1 + $0xec4] ss:$8 sps:$4 sm:$0xff]   ;;  %v7469_v11 = vld [vmem:[%s10033_s1 + $0x5c0] ss:$8 sps:$4 sm:$0xff]  }
 0x146   : > { %4607 = vmatprep.subr.bf16.mxu0 %v7402_v10  ;;  %v7472_v10 = vld [vmem:[%s10033_s1 + $0xec0] ss:$8 sps:$4 sm:$0xff]  }
 0x147   : > { %1906 = vmatmul.mubr.bf16.vlgmr.msra.gmra.mrb[0].mxu1 %v8804_v5  ;;  %v7414_v5 = vld [vmem:[%s10033_s1 + $0xe24] ss:$8 sps:$4 sm:$0xff]  }
 0x148   : > { %4156 = vmatmul.mubr.bf16.vlgmr.msra.gmra.mrb[0].mxu0 %v3738_v13  ;;  %1917 = vmatpush1.bf16.msra.mxu1 %v7397_v16  ;;  %v1524_v16 = vshrl.u32 %v8849_v20, 16 }
 0x149   : > { %4608 = vmatpush1.bf16.msra.mxu0 %v7400_v23  ;;  %1918 = vmatprep.subr.bf16.mxu1 %v7405_v24  ;;  %v7798_v23 = vld [vmem:[%s8020_s12 + $0x48] sm:$0xff] }
 0x14a   : > { %4609 = vmatprep.subr.bf16.mxu0 %v7408_v18  ;;  %1948 = vmatprep.mubr.bf16.mxu1 %v1548_v25  ;;  %v1984_v13 = vpack.c.bf16 %v9061_v39, %v7798_v23  ;;  %v7483_v24 = vld [vmem:[%s10033_s1 + $0x5e4] ss:$8 sps:$4 sm:$0xff]   ;;  %v1527_v18 = vshll.u32 %v8849_v20, 16  ;;  %v1988_v25 = vpack.c.bf16 %v9064_v61, %v9064_v61  ;;  %v7481_v20 = vld [vmem:[%s10033_s1 + $0x5e0] ss:$8 sps:$4 sm:$0xff]  }
 0x14b   : > { %4639 = vmatprep.mubr.bf16.mxu0 %v4276_v26  ;;  %v7486_v26 = vld [vmem:[%s10033_s1 + $0xee4] ss:$8 sps:$4 sm:$0xff]   ;;  %v7484_v61 = vld [vmem:[%s10033_s1 + $0xee0] ss:$8 sps:$4 sm:$0xff]   ;;  %v7516_v23 = vld [vmem:[%s10033_s1 + $0xf34] ss:$8 sps:$4 sm:$0xff]  }
 0x14c   : > { %1919 = vmatpush1.bf16.msra.mxu1 %v7403_v48  ;;  %v1516_v48 = vshrl.u32 %v1409_v40, 16  ;;  %v9283_v39 = vld [vmem:[%s8020_s12 + $0x80] sm:$0xff] }
 0x14d   : > { %4610 = vmatpush1.bf16.msra.mxu0 %v7406_v49  ;;  %1920 = vmatprep.subr.bf16.mxu1 %v7411_v58  ;;  %v1519_v49 = vshll.u32 %v1409_v40, 16  ;;  %v9280_v58 = vld [vmem:[%s8020_s12 + $0x60] sm:$0xff]  ;;  %v7502_v40 = vld [vmem:[%s10033_s1 + $0xf10] ss:$8 sps:$4 sm:$0xff]  }
 0x14e   : > { %4611 = vmatprep.subr.bf16.mxu0 %v7414_v5  ;;  %v6510_v5 = vld [vmem:[%s8020_s12 + $0xa0] sm:$0xff] }
 0x150   : > { %1921 = vmatpush1.bf16.msra.mxu1 %v7409_v27  ;;  %v1526_v27 = vrot.slane %v1524_v16, 2  ;;  %v7513_v16 = vld [vmem:[%s10033_s1 + $0x634] ss:$8 sps:$4 sm:$0xff]  }
 0x151   : > { %4612 = vmatpush1.bf16.msra.mxu0 %v7412_v28  ;;  %1922 = vmatprep.subr.bf16.mxu1 %v7417_v29  ;;  %v2075_v28 = vshrl.u32 %v1984_v13, 16  ;;  %v2078_v29 = vshll.u32 %v1984_v13, 16  ;;  %v7511_v13 = vld [vmem:[%s10033_s1 + $0x630] ss:$8 sps:$4 sm:$0xff]  }
 0x152   : > { %4613 = vmatprep.subr.bf16.mxu0 %v7420_v30  ;;  %v9293_v30 = vld [vmem:[%s8020_s12 + $0x78] sm:$0xff] }
 0x154   : > { %1923 = vmatpush1.bf16.msra.mxu1 %v7415_v31  ;;  %v1529_v31 = vrot.slane %v1527_v18, 3  ;;  %v7519_v18 = vld [vmem:[%s10033_s1 + $0x644] ss:$8 sps:$4 sm:$0xff]  }
 0x155   : > { %4614 = vmatpush1.bf16.msra.mxu0 %v7418_v33  ;;  %1924 = vmatprep.subr.bf16.mxu1 %v7423_v55  ;;  %v2083_v33 = vshrl.u32 %v1988_v25, 16  ;;  %v2086_v55 = vshll.u32 %v1988_v25, 16  ;;  %v7522_v25 = vld [vmem:[%s10033_s1 + $0xf44] ss:$8 sps:$4 sm:$0xff]  }
 0x156   : > { %4615 = vmatprep.subr.bf16.mxu0 %v7426_v34  ;;  %v1518_v34 = vrot.slane %v1516_v48, 2  ;;  %v7520_v48 = vld [vmem:[%s10033_s1 + $0xf40] ss:$8 sps:$4 sm:$0xff]  }
 0x158   : > { %1925 = vmatpush1.bf16.msra.mxu1 %v7421_v8  ;;  %v1521_v8 = vrot.slane %v1519_v49, 3  ;;  %v7525_v49 = vld [vmem:[%s10033_s1 + $0x654] ss:$8 sps:$4 sm:$0xff]  }
 0x159   : > { %4616 = vmatpush1.bf16.msra.mxu0 %v7424_v35  ;;  %1926 = vmatprep.subr.bf16.mxu1 %v7429_v57  ;;  %v9297_v35 = vpack.c.bf16 %v9283_v39, %v9280_v58  ;;  %v9299_v57 = vpack.c.bf16 %v6510_v5, %v6510_v5  ;;  %v7528_v5 = vld [vmem:[%s10033_s1 + $0xf54] ss:$8 sps:$4 sm:$0xff]  }
 0x15a   : > { %4617 = vmatprep.subr.bf16.mxu0 %v7432_v42  ;;  %v9302_v42 = vld [vmem:[%s8020_s12 + $0x98] sm:$0xff] }
 0x15c   : > { %1927 = vmatpush1.bf16.msra.mxu1 %v7427_v43  ;;  %v6513_v43 = vld [vmem:[%s8020_s12 + $0xb8] sm:$0xff] }
 0x15d   : > { %4618 = vmatpush1.bf16.msra.mxu0 %v7430_v7  ;;  %1928 = vmatprep.subr.bf16.mxu1 %v7435_v12  ;;  %v7489_v7 = vld [vmem:[%s10033_s1 + $0x5f4] ss:$8 sps:$4 sm:$0xff]  }
 0x15e   : > { %4619 = vmatprep.subr.bf16.mxu0 %v7438_v41  ;;  %v7492_v12 = vld [vmem:[%s10033_s1 + $0xef4] ss:$8 sps:$4 sm:$0xff]   ;;  %v2077_v41 = vrot.slane %v2075_v28, 3  ;;  %v7534_v28 = vld [vmem:[%s10033_s1 + $0xf64] ss:$8 sps:$4 sm:$0xff]  }
 0x160   : > { %1929 = vmatpush1.bf16.msra.mxu1 %v7433_v46  ;;  %v2080_v46 = vrot.slane %v2078_v29, 4  ;;  %v7529_v29 = vld [vmem:[%s10033_s1 + $0x660] ss:$8 sps:$4 sm:$0xff]  }
 0x161   : > { %4620 = vmatpush1.bf16.msra.mxu0 %v7436_v47  ;;  %1930 = vmatprep.subr.bf16.mxu1 %v7441_v21  ;;  %v2085_v47 = vrot.slane %v2083_v33, 3  ;;  %v2088_v21 = vrot.slane %v2086_v55, 4  ;;  %v7537_v33 = vld [vmem:[%s10033_s1 + $0x674] ss:$8 sps:$4 sm:$0xff]  }
 0x162   : > { %4621 = vmatprep.subr.bf16.mxu0 %v7444_v32  ;;  %v9313_v32 = vpack.c.bf16 %v9302_v42, %v9293_v30  ;;  %v7540_v55 = vld [vmem:[%s10033_s1 + $0xf74] ss:$8 sps:$4 sm:$0xff]  }
 0x164   : > { %1931 = vmatpush1.bf16.msra.mxu1 %v7439_v51  ;;  %v9315_v51 = vpack.c.bf16 %v6513_v43, %v6513_v43  ;;  %v7543_v43 = vld [vmem:[%s10033_s1 + $0x684] ss:$8 sps:$4 sm:$0xff]  }
 0x165   : > { %4622 = vmatpush1.bf16.msra.mxu0 %v7442_v53  ;;  %1932 = vmatprep.subr.bf16.mxu1 %v7447_v36  ;;  %v7487_v53 = vld [vmem:[%s10033_s1 + $0x5f0] ss:$8 sps:$4 sm:$0xff]  }
 0x166   : > { %4623 = vmatprep.subr.bf16.mxu0 %v7450_v44  ;;  %v7490_v36 = vld [vmem:[%s10033_s1 + $0xef0] ss:$8 sps:$4 sm:$0xff]   ;;  %v1522_v44 = vor.u32 %v1521_v8, %v1518_v34 }
 0x167   : > { %v7535_v34 = vld [vmem:[%s10033_s1 + $0x670] ss:$8 sps:$4 sm:$0xff]  }
 0x168   : > { %1933 = vmatpush1.bf16.msra.mxu1 %v7445_v45  ;;  %v1530_v45 = vor.u32 %v1529_v31, %v1526_v27  ;;  %v7531_v27 = vld [vmem:[%s10033_s1 + $0x664] ss:$8 sps:$4 sm:$0xff]   ;;  %v7532_v31 = vld [vmem:[%s10033_s1 + $0xf60] ss:$8 sps:$4 sm:$0xff]   ;;  %v7538_v8 = vld [vmem:[%s10033_s1 + $0xf70] ss:$8 sps:$4 sm:$0xff]  }
 0x169   : > { %4624 = vmatpush1.bf16.msra.mxu0 %v7448_v54  ;;  %1934 = vmatprep.subr.bf16.mxu1 %v7453_v22  ;;  %v4271_v54 = vrot.slane %v9297_v35, 2  ;;  %v4272_v22 = vrot.slane %v9299_v57, 2 }
 0x16a   : > { %4625 = vmatprep.subr.bf16.mxu0 %v7456_v38  ;;  %v7495_v38 = vld [vmem:[%s10033_s1 + $0x604] ss:$8 sps:$4 sm:$0xff]  }
 0x16c   : > { %1935 = vmatpush1.bf16.msra.mxu1 %v7451_v56  ;;  %v7498_v56 = vld [vmem:[%s10033_s1 + $0xf04] ss:$8 sps:$4 sm:$0xff]  }
 0x16d   : > { %4626 = vmatpush1.bf16.msra.mxu0 %v7454_v59  ;;  %1936 = vmatprep.subr.bf16.mxu1 %v7459_v60  ;;  %v2081_v59 = vor.u32 %v2080_v46, %v2077_v41  ;;  %v2089_v60 = vor.u32 %v2088_v21, %v2085_v47  ;;  %v7544_v41 = vld [vmem:[%s10033_s1 + $0xf80] ss:$8 sps:$4 sm:$0xff]   ;;  %v7549_v46 = vld [vmem:[%s10033_s1 + $0x694] ss:$8 sps:$4 sm:$0xff]   ;;  %v7547_v21 = vld [vmem:[%s10033_s1 + $0x690] ss:$8 sps:$4 sm:$0xff]  }
 0x16e   : > { %4627 = vmatprep.subr.bf16.mxu0 %v7462_v62  ;;  %v4280_v62 = vrot.slane %v9313_v32, 2  ;;  %v7552_v47 = vld [vmem:[%s10033_s1 + $0xf94] ss:$8 sps:$4 sm:$0xff]  }
 0x170   : > { %1937 = vmatpush1.bf16.msra.mxu1 %v7457_v63  ;;  %v4281_v63 = vrot.slane %v9315_v51, 2 }
 0x171   : > { %4628 = vmatpush1.bf16.msra.mxu0 %v7460_v17  ;;  %1938 = vmatprep.subr.bf16.mxu1 %v7465_v0  ;;  %v7493_v17 = vld [vmem:[%s10033_s1 + $0x600] ss:$8 sps:$4 sm:$0xff]  }
 0x172   : > { %4629 = vmatprep.subr.bf16.mxu0 %v7468_v2  ;;  %v7496_v0 = vld [vmem:[%s10033_s1 + $0xf00] ss:$8 sps:$4 sm:$0xff]   ;;  %v1531_v2 = vsel %vm1480_vm3, %v1522_v44, %v1530_v45  ;;  %v7558_v44 = vld [vmem:[%s10033_s1 + $0xfa4] ss:$8 sps:$4 sm:$0xff]  }
 0x173   : > { %v7553_v45 = vld [vmem:[%s10033_s1 + $0x6a0] ss:$8 sps:$4 sm:$0xff]  }
 0x174   : > { %1939 = vmatpush1.bf16.msra.mxu1 %v7463_v3  ;;  %v4273_v3 = vsel %vm960_vm1, %v4271_v54, %v4272_v22  ;;  %v7556_v54 = vld [vmem:[%s10033_s1 + $0xfa0] ss:$8 sps:$4 sm:$0xff]   ;;  %v7561_v22 = vld [vmem:[%s10033_s1 + $0x6b4] ss:$8 sps:$4 sm:$0xff]  }
 0x175   : > { %4630 = vmatpush1.bf16.msra.mxu0 %v7466_v4  ;;  %1940 = vmatprep.subr.bf16.mxu1 %v7471_v1  ;;  %v7501_v4 = vld [vmem:[%s10033_s1 + $0x614] ss:$8 sps:$4 sm:$0xff]  }
 0x176   : > { %4631 = vmatprep.subr.bf16.mxu0 %v7474_v9  ;;  %v7504_v1 = vld [vmem:[%s10033_s1 + $0xf14] ss:$8 sps:$4 sm:$0xff]   ;;  %v2090_v9 = vsel %vm2056_vm4, %v2081_v59, %v2089_v60  ;;  %v7562_v59 = vld [vmem:[%s10033_s1 + $0xfb0] ss:$8 sps:$4 sm:$0xff]   ;;  %v7567_v60 = vld [vmem:[%s10033_s1 + $0x6c4] ss:$8 sps:$4 sm:$0xff]  }
 0x178   : > { %1941 = vmatpush1.bf16.msra.mxu1 %v7469_v11  ;;  %v4282_v11 = vsel %vm960_vm1, %v4280_v62, %v4281_v63  ;;  %v7570_v62 = vld [vmem:[%s10033_s1 + $0xfc4] ss:$8 sps:$4 sm:$0xff]   ;;  %v7565_v63 = vld [vmem:[%s10033_s1 + $0x6c0] ss:$8 sps:$4 sm:$0xff]  }
 0x179   : > { %4632 = vmatpush1.bf16.msra.mxu0 %v7472_v10  ;;  %1942 = vmatprep.subr.bf16.mxu1 %v7477_v14  ;;  %v7499_v10 = vld [vmem:[%s10033_s1 + $0x610] ss:$8 sps:$4 sm:$0xff]   ;;  %v7507_v14 = vld [vmem:[%s10033_s1 + $0x624] ss:$8 sps:$4 sm:$0xff]  }
 0x17a   : > { %4633 = vmatprep.subr.bf16.mxu0 %v7480_v50  ;;  %v7510_v50 = vld [vmem:[%s10033_s1 + $0xf24] ss:$8 sps:$4 sm:$0xff]  }
 0x17c   : > { %1943 = vmatpush1.bf16.msra.mxu1 %v7475_v15  ;;  %v7505_v15 = vld [vmem:[%s10033_s1 + $0x620] ss:$8 sps:$4 sm:$0xff]  }
 0x17d   : > { %4634 = vmatpush1.bf16.msra.mxu0 %v7478_v19  ;;  %1944 = vmatprep.subr.bf16.mxu1 %v7483_v24  ;;  %v7508_v19 = vld [vmem:[%s10033_s1 + $0xf20] ss:$8 sps:$4 sm:$0xff]   ;;  %v7514_v24 = vld [vmem:[%s10033_s1 + $0xf30] ss:$8 sps:$4 sm:$0xff]  }
 0x17e   : > { %4635 = vmatprep.subr.bf16.mxu0 %v7486_v26  ;;  %v7517_v26 = vld [vmem:[%s10033_s1 + $0x640] ss:$8 sps:$4 sm:$0xff]  }
 0x180   : > { %1945 = vmatpush1.bf16.msra.mxu1 %v7481_v20  ;;  %v7523_v20 = vld [vmem:[%s10033_s1 + $0x650] ss:$8 sps:$4 sm:$0xff]  }
 0x181   : > { %4636 = vmatpush1.bf16.msra.mxu0 %v7484_v61  ;;  %1946 = vmatprep.subr.bf16.mxu1 %v7489_v7  ;;  %v7526_v61 = vld [vmem:[%s10033_s1 + $0xf50] ss:$8 sps:$4 sm:$0xff]   ;;  %v7546_v7 = vld [vmem:[%s10033_s1 + $0xf84] ss:$8 sps:$4 sm:$0xff]  }
 0x182   : > { %4637 = vmatprep.subr.bf16.mxu0 %v7492_v12  ;;  %v7541_v12 = vld [vmem:[%s10033_s1 + $0x680] ss:$8 sps:$4 sm:$0xff]  }
 0x184   : > { %1947 = vmatpush1.bf16.msra.mxu1 %v7487_v53  ;;  %v7550_v53 = vld [vmem:[%s10033_s1 + $0xf90] ss:$8 sps:$4 sm:$0xff]  }
 0x185   : > { %4638 = vmatpush1.bf16.msra.mxu0 %v7490_v36  ;;  %2449 = vmatprep.subr.bf16.mxu1 %v7495_v38  ;;  %v7555_v36 = vld [vmem:[%s10033_s1 + $0x6a4] ss:$8 sps:$4 sm:$0xff]   ;;  %v7564_v38 = vld [vmem:[%s10033_s1 + $0xfb4] ss:$8 sps:$4 sm:$0xff]  }
 0x186   : > { %4650 = vmatprep.subr.bf16.mxu0 %v7498_v56  ;;  %v7559_v56 = vld [vmem:[%s10033_s1 + $0x6b0] ss:$8 sps:$4 sm:$0xff]  }
 0x187   : > { %1949 = vmatmul.mubr.bf16.vlgmr.msra.gmra.mrb[0].mxu1 %v1531_v2 }
 0x188   : > { %4640 = vmatmul.mubr.bf16.vlgmr.msra.gmra.mrb[0].mxu0 %v4273_v3  ;;  %2450 = vmatpush1.bf16.msra.mxu1 %v7493_v17  ;;  %v7568_v17 = vld [vmem:[%s10033_s1 + $0xfc0] ss:$8 sps:$4 sm:$0xff]   ;;  %v1987_v3 = vpack.c.bf16 %v9283_v39, %v9283_v39  ;;  %v1990_v39 = vpack.c.bf16 %v9302_v42, %v9302_v42  ;;  %v7582_v42 = vld [vmem:[%s10033_s1 + $0xfe4] ss:$8 sps:$4 sm:$0xff]  }
 0x189   : > { %4651 = vmatpush1.bf16.msra.mxu0 %v7496_v0  ;;  %2451 = vmatprep.subr.bf16.mxu1 %v7501_v4  ;;  %v7799_v0 = vld [vmem:[%s8020_s12 + $0x40] sm:$0xff]  ;;  %v7573_v4 = vld [vmem:[%s10033_s1 + $0x6d4] ss:$8 sps:$4 sm:$0xff]  }
 0x18a   : > { %4652 = vmatprep.subr.bf16.mxu0 %v7504_v1  ;;  %2481 = vmatprep.mubr.bf16.mxu1 %v2090_v9  ;;  %v1983_v2 = vpack.c.bf16 %v9280_v58, %v7799_v0  ;;  %v7576_v1 = vld [vmem:[%s10033_s1 + $0xfd4] ss:$8 sps:$4 sm:$0xff]  }
 0x18b   : > { %4682 = vmatprep.mubr.bf16.mxu0 %v4282_v11  ;;  %v9498_v9 = vld [vmem:[%s8020_s12 + $0x70] sm:$0xff] }
 0x18c   : > { %2452 = vmatpush1.bf16.msra.mxu1 %v7499_v10  ;;  %v9501_v11 = vld [vmem:[%s8020_s12 + $0x90] sm:$0xff] }
 0x18d   : > { %4653 = vmatpush1.bf16.msra.mxu0 %v7502_v40  ;;  %2453 = vmatprep.subr.bf16.mxu1 %v7507_v14  ;;  %v6512_v10 = vld [vmem:[%s8020_s12 + $0xb0] sm:$0xff]  ;;  %v7800_v40 = vld [vmem:[%s8020_s12 + $0x58] sm:$0xff] }
 0x18e   : > { %4654 = vmatprep.subr.bf16.mxu0 %v7510_v50  ;;  %v1986_v58 = vpack.c.bf16 %v9293_v30, %v7800_v40  ;;  %v7571_v14 = vld [vmem:[%s10033_s1 + $0x6d0] ss:$8 sps:$4 sm:$0xff]   ;;  %v7579_v30 = vld [vmem:[%s10033_s1 + $0x6e4] ss:$8 sps:$4 sm:$0xff]  }
 0x18f   : > { %v7574_v50 = vld [vmem:[%s10033_s1 + $0xfd0] ss:$8 sps:$4 sm:$0xff]  }
 0x190   : > { %2454 = vmatpush1.bf16.msra.mxu1 %v7505_v15  ;;  %v2058_v15 = vshrl.u32 %v1983_v2, 16  ;;  %v7595_v40 = vld [vmem:[%s10033_s1 + $0x710] ss:$8 sps:$4 sm:$0xff]  }
 0x191   : > { %4655 = vmatpush1.bf16.msra.mxu0 %v7508_v19  ;;  %2455 = vmatprep.subr.bf16.mxu1 %v7513_v16  ;;  %v2061_v19 = vshll.u32 %v1983_v2, 16  ;;  %v2066_v16 = vshrl.u32 %v1987_v3, 16 }
 0x192   : > { %4656 = vmatprep.subr.bf16.mxu0 %v7516_v23  ;;  %v2069_v23 = vshll.u32 %v1987_v3, 16  ;;  %v7597_v3 = vld [vmem:[%s10033_s1 + $0x714] ss:$8 sps:$4 sm:$0xff]  }
 0x194   : > { %2456 = vmatpush1.bf16.msra.mxu1 %v7511_v13  ;;  %v9522_v13 = vpack.c.bf16 %v9501_v11, %v9498_v9 }
 0x195   : > { %4657 = vmatpush1.bf16.msra.mxu0 %v7514_v24  ;;  %2457 = vmatprep.subr.bf16.mxu1 %v7519_v18  ;;  %v9524_v24 = vpack.c.bf16 %v6512_v10, %v6512_v10  ;;  %v2109_v18 = vshrl.u32 %v1986_v58, 16 }
 0x196   : > { %4658 = vmatprep.subr.bf16.mxu0 %v7522_v25  ;;  %v2112_v25 = vshll.u32 %v1986_v58, 16  ;;  %v7598_v58 = vld [vmem:[%s10033_s1 + $0x1010] ss:$8 sps:$4 sm:$0xff]  }
 0x198   : > { %2458 = vmatpush1.bf16.msra.mxu1 %v7517_v26  ;;  %v2117_v26 = vshrl.u32 %v1990_v39, 16 }
 0x199   : > { %4659 = vmatpush1.bf16.msra.mxu0 %v7520_v48  ;;  %2459 = vmatprep.subr.bf16.mxu1 %v7525_v49  ;;  %v2120_v48 = vshll.u32 %v1990_v39, 16  ;;  %v7577_v49 = vld [vmem:[%s10033_s1 + $0x6e0] ss:$8 sps:$4 sm:$0xff]   ;;  %v7603_v39 = vld [vmem:[%s10033_s1 + $0x724] ss:$8 sps:$4 sm:$0xff]  }
 0x19a   : > { %4660 = vmatprep.subr.bf16.mxu0 %v7528_v5  ;;  %v4808_v5 = vshrl.u32 %v9075_v6, 16 }
 0x19c   : > { %2460 = vmatpush1.bf16.msra.mxu1 %v7523_v20  ;;  %v4811_v20 = vshll.u32 %v9075_v6, 16  ;;  %v7585_v6 = vld [vmem:[%s10033_s1 + $0x6f4] ss:$8 sps:$4 sm:$0xff]  }
 0x19d   : > { %4661 = vmatpush1.bf16.msra.mxu0 %v7526_v61  ;;  %2461 = vmatprep.subr.bf16.mxu1 %v7531_v27  ;;  %v4816_v61 = vshrl.u32 %v9077_v52, 16  ;;  %v4819_v27 = vshll.u32 %v9077_v52, 16  ;;  %v7588_v52 = vld [vmem:[%s10033_s1 + $0xff4] ss:$8 sps:$4 sm:$0xff]  }
 0x19e   : > { %4662 = vmatprep.subr.bf16.mxu0 %v7534_v28  ;;  %v7580_v28 = vld [vmem:[%s10033_s1 + $0xfe0] ss:$8 sps:$4 sm:$0xff]  }
 0x1a0   : > { %2462 = vmatpush1.bf16.msra.mxu1 %v7529_v29  ;;  %v2060_v29 = vrot.slane %v2058_v15, 3  ;;  %v7604_v15 = vld [vmem:[%s10033_s1 + $0x1020] ss:$8 sps:$4 sm:$0xff]  }
 0x1a1   : > { %4663 = vmatpush1.bf16.msra.mxu0 %v7532_v31  ;;  %2463 = vmatprep.subr.bf16.mxu1 %v7537_v33  ;;  %v2063_v31 = vrot.slane %v2061_v19, 4  ;;  %v2068_v33 = vrot.slane %v2066_v16, 3  ;;  %v7609_v19 = vld [vmem:[%s10033_s1 + $0x734] ss:$8 sps:$4 sm:$0xff]  }
 0x1a2   : > { %4664 = vmatprep.subr.bf16.mxu0 %v7540_v55  ;;  %v2071_v55 = vrot.slane %v2069_v23, 4  ;;  %v7612_v16 = vld [vmem:[%s10033_s1 + $0x1034] ss:$8 sps:$4 sm:$0xff]   ;;  %v7607_v23 = vld [vmem:[%s10033_s1 + $0x730] ss:$8 sps:$4 sm:$0xff]  }
 0x1a4   : > { %2464 = vmatpush1.bf16.msra.mxu1 %v7535_v34  ;;  %v2111_v34 = vrot.slane %v2109_v18, 3  ;;  %v7618_v18 = vld [vmem:[%s10033_s1 + $0x1044] ss:$8 sps:$4 sm:$0xff]  }
 0x1a5   : > { %4665 = vmatpush1.bf16.msra.mxu0 %v7538_v8  ;;  %2465 = vmatprep.subr.bf16.mxu1 %v7543_v43  ;;  %v2114_v8 = vrot.slane %v2112_v25, 4  ;;  %v2119_v43 = vrot.slane %v2117_v26, 3  ;;  %v7613_v25 = vld [vmem:[%s10033_s1 + $0x740] ss:$8 sps:$4 sm:$0xff]  }
 0x1a6   : > { %4666 = vmatprep.subr.bf16.mxu0 %v7546_v7  ;;  %v2122_v7 = vrot.slane %v2120_v48, 4  ;;  %v7616_v26 = vld [vmem:[%s10033_s1 + $0x1040] ss:$8 sps:$4 sm:$0xff]   ;;  %v7621_v48 = vld [vmem:[%s10033_s1 + $0x754] ss:$8 sps:$4 sm:$0xff]  }
 0x1a8   : > { %2466 = vmatpush1.bf16.msra.mxu1 %v7541_v12  ;;  %v4810_v12 = vrot.slane %v4808_v5, 2  ;;  %v7619_v5 = vld [vmem:[%s10033_s1 + $0x750] ss:$8 sps:$4 sm:$0xff]  }
 0x1a9   : > { %4667 = vmatpush1.bf16.msra.mxu0 %v7544_v41  ;;  %2467 = vmatprep.subr.bf16.mxu1 %v7549_v46  ;;  %v4813_v41 = vrot.slane %v4811_v20, 3  ;;  %v4818_v46 = vrot.slane %v4816_v61, 2  ;;  %v7622_v20 = vld [vmem:[%s10033_s1 + $0x1050] ss:$8 sps:$4 sm:$0xff]   ;;  %v7627_v61 = vld [vmem:[%s10033_s1 + $0x764] ss:$8 sps:$4 sm:$0xff]  }
 0x1aa   : > { %4668 = vmatprep.subr.bf16.mxu0 %v7552_v47  ;;  %v4821_v47 = vrot.slane %v4819_v27, 3  ;;  %v7630_v27 = vld [vmem:[%s10033_s1 + $0x1064] ss:$8 sps:$4 sm:$0xff]  }
 0x1ac   : > { %2468 = vmatpush1.bf16.msra.mxu1 %v7547_v21  ;;  %v7583_v21 = vld [vmem:[%s10033_s1 + $0x6f0] ss:$8 sps:$4 sm:$0xff]  }
 0x1ad   : > { %4669 = vmatpush1.bf16.msra.mxu0 %v7550_v53  ;;  %2469 = vmatprep.subr.bf16.mxu1 %v7555_v36  ;;  %v7586_v53 = vld [vmem:[%s10033_s1 + $0xff0] ss:$8 sps:$4 sm:$0xff]   ;;  %v2064_v36 = vor.u32 %v2063_v31, %v2060_v29  ;;  %v7628_v29 = vld [vmem:[%s10033_s1 + $0x1060] ss:$8 sps:$4 sm:$0xff]   ;;  %v7633_v31 = vld [vmem:[%s10033_s1 + $0x774] ss:$8 sps:$4 sm:$0xff]  }
 0x1ae   : > { %4670 = vmatprep.subr.bf16.mxu0 %v7558_v44  ;;  %v2072_v44 = vor.u32 %v2071_v55, %v2068_v33  ;;  %v7636_v33 = vld [vmem:[%s10033_s1 + $0x1074] ss:$8 sps:$4 sm:$0xff]   ;;  %v7631_v55 = vld [vmem:[%s10033_s1 + $0x770] ss:$8 sps:$4 sm:$0xff]  }
 0x1b0   : > { %2470 = vmatpush1.bf16.msra.mxu1 %v7553_v45  ;;  %v4277_v45 = vrot.slane %v9522_v13, 2  ;;  %v2073_v0 = vsel %vm2056_vm4, %v2064_v36, %v2072_v44  ;;  %v7652_v36 = vld [vmem:[%s10033_s1 + $0x10a0] ss:$8 sps:$4 sm:$0xff]   ;;  %v7657_v44 = vld [vmem:[%s10033_s1 + $0x7b4] ss:$8 sps:$4 sm:$0xff]  }
 0x1b1   : > { %4671 = vmatpush1.bf16.msra.mxu0 %v7556_v54  ;;  %2471 = vmatprep.subr.bf16.mxu1 %v7561_v22  ;;  %v4278_v54 = vrot.slane %v9524_v24, 2  ;;  %v7591_v22 = vld [vmem:[%s10033_s1 + $0x704] ss:$8 sps:$4 sm:$0xff]  }
 0x1b2   : > { %4672 = vmatprep.subr.bf16.mxu0 %v7564_v38  ;;  %v7594_v38 = vld [vmem:[%s10033_s1 + $0x1004] ss:$8 sps:$4 sm:$0xff]  }
 0x1b3   : > { %v4279_v2 = vsel %vm960_vm1, %v4277_v45, %v4278_v54  ;;  %v7660_v45 = vld [vmem:[%s10033_s1 + $0x10b4] ss:$8 sps:$4 sm:$0xff]   ;;  %v7655_v54 = vld [vmem:[%s10033_s1 + $0x7b0] ss:$8 sps:$4 sm:$0xff]  }
 0x1b4   : > { %2472 = vmatpush1.bf16.msra.mxu1 %v7559_v56  ;;  %v2115_v56 = vor.u32 %v2114_v8, %v2111_v34  ;;  %v7642_v34 = vld [vmem:[%s10033_s1 + $0x1084] ss:$8 sps:$4 sm:$0xff]   ;;  %v7637_v8 = vld [vmem:[%s10033_s1 + $0x780] ss:$8 sps:$4 sm:$0xff]  }
 0x1b5   : > { %4673 = vmatpush1.bf16.msra.mxu0 %v7562_v59  ;;  %2473 = vmatprep.subr.bf16.mxu1 %v7567_v60  ;;  %v2123_v59 = vor.u32 %v2122_v7, %v2119_v43  ;;  %v4814_v60 = vor.u32 %v4813_v41, %v4810_v12  ;;  %v7640_v43 = vld [vmem:[%s10033_s1 + $0x1080] ss:$8 sps:$4 sm:$0xff]   ;;  %v7645_v7 = vld [vmem:[%s10033_s1 + $0x794] ss:$8 sps:$4 sm:$0xff]   ;;  %v7643_v41 = vld [vmem:[%s10033_s1 + $0x790] ss:$8 sps:$4 sm:$0xff]  }
 0x1b6   : > { %4674 = vmatprep.subr.bf16.mxu0 %v7570_v62  ;;  %v4822_v62 = vor.u32 %v4821_v47, %v4818_v46  ;;  %v7648_v12 = vld [vmem:[%s10033_s1 + $0x1094] ss:$8 sps:$4 sm:$0xff]   ;;  %v7646_v46 = vld [vmem:[%s10033_s1 + $0x1090] ss:$8 sps:$4 sm:$0xff]   ;;  %v7651_v47 = vld [vmem:[%s10033_s1 + $0x7a4] ss:$8 sps:$4 sm:$0xff]  }
 0x1b8   : > { %2474 = vmatpush1.bf16.msra.mxu1 %v7565_v63  ;;  %v7589_v63 = vld [vmem:[%s10033_s1 + $0x700] ss:$8 sps:$4 sm:$0xff]   ;;  %v4823_v10 = vsel %vm1480_vm3, %v4814_v60, %v4822_v62  ;;  %v1989_v60 = vpack.c.bf16 %v9501_v11, %v9501_v11 }
 0x1b9   : > { %4675 = vmatpush1.bf16.msra.mxu0 %v7568_v17  ;;  %2475 = vmatprep.subr.bf16.mxu1 %v7573_v4  ;;  %v7592_v17 = vld [vmem:[%s10033_s1 + $0x1000] ss:$8 sps:$4 sm:$0xff]   ;;  %v7600_v4 = vld [vmem:[%s10033_s1 + $0x1014] ss:$8 sps:$4 sm:$0xff]  }
 0x1ba   : > { %4676 = vmatprep.subr.bf16.mxu0 %v7576_v1  ;;  %v2124_v1 = vsel %vm2056_vm4, %v2115_v56, %v2123_v59  ;;  %v7666_v56 = vld [vmem:[%s10033_s1 + $0x10c4] ss:$8 sps:$4 sm:$0xff]   ;;  %v1985_v59 = vpack.c.bf16 %v9498_v9, %v9245_v37  ;;  %v7661_v62 = vld [vmem:[%s10033_s1 + $0x7c0] ss:$8 sps:$4 sm:$0xff]   ;;  %v7672_v37 = vld [vmem:[%s10033_s1 + $0x10d4] ss:$8 sps:$4 sm:$0xff]  }
 0x1bc   : > { %2476 = vmatpush1.bf16.msra.mxu1 %v7571_v14  ;;  %v7606_v14 = vld [vmem:[%s10033_s1 + $0x1024] ss:$8 sps:$4 sm:$0xff]   ;;  %v2092_v9 = vshrl.u32 %v1985_v59, 16  ;;  %v2095_v11 = vshll.u32 %v1985_v59, 16  ;;  %v7697_v59 = vld [vmem:[%s10033_s1 + $0x820] ss:$8 sps:$4 sm:$0xff]  }
 0x1bd   : > { %4677 = vmatpush1.bf16.msra.mxu0 %v7574_v50  ;;  %2477 = vmatprep.subr.bf16.mxu1 %v7579_v30  ;;  %v7601_v50 = vld [vmem:[%s10033_s1 + $0x720] ss:$8 sps:$4 sm:$0xff]   ;;  %v7610_v30 = vld [vmem:[%s10033_s1 + $0x1030] ss:$8 sps:$4 sm:$0xff]  }
 0x1be   : > { %4678 = vmatprep.subr.bf16.mxu0 %v7582_v42  ;;  %v7615_v42 = vld [vmem:[%s10033_s1 + $0x744] ss:$8 sps:$4 sm:$0xff]  }
 0x1c0   : > { %2478 = vmatpush1.bf16.msra.mxu1 %v7577_v49  ;;  %v7624_v49 = vld [vmem:[%s10033_s1 + $0x1054] ss:$8 sps:$4 sm:$0xff]  }
 0x1c1   : > { %4679 = vmatpush1.bf16.msra.mxu0 %v7580_v28  ;;  %2479 = vmatprep.subr.bf16.mxu1 %v7585_v6  ;;  %v7625_v28 = vld [vmem:[%s10033_s1 + $0x760] ss:$8 sps:$4 sm:$0xff]   ;;  %v7634_v6 = vld [vmem:[%s10033_s1 + $0x1070] ss:$8 sps:$4 sm:$0xff]  }
 0x1c2   : > { %4680 = vmatprep.subr.bf16.mxu0 %v7588_v52  ;;  %v7639_v52 = vld [vmem:[%s10033_s1 + $0x784] ss:$8 sps:$4 sm:$0xff]  }
 0x1c4   : > { %2480 = vmatpush1.bf16.msra.mxu1 %v7583_v21  ;;  %v7654_v21 = vld [vmem:[%s10033_s1 + $0x10a4] ss:$8 sps:$4 sm:$0xff]  }
 0x1c5   : > { %4681 = vmatpush1.bf16.msra.mxu0 %v7586_v53  ;;  %2492 = vmatprep.subr.bf16.mxu1 %v7591_v22  ;;  %v7649_v53 = vld [vmem:[%s10033_s1 + $0x7a0] ss:$8 sps:$4 sm:$0xff]   ;;  %v7658_v22 = vld [vmem:[%s10033_s1 + $0x10b0] ss:$8 sps:$4 sm:$0xff]  }
 0x1c6   : > { %5182 = vmatprep.subr.bf16.mxu0 %v7594_v38  ;;  %v7663_v38 = vld [vmem:[%s10033_s1 + $0x7c4] ss:$8 sps:$4 sm:$0xff]  }
 0x1c7   : > { %2482 = vmatmul.mubr.bf16.vlgmr.msra.gmra.mrb[0].mxu1 %v2073_v0  ;;  %v2100_v0 = vshrl.u32 %v1989_v60, 16 }
 0x1c8   : > { %4683 = vmatmul.mubr.bf16.vlgmr.msra.gmra.mrb[0].mxu0 %v4279_v2  ;;  %2493 = vmatpush1.bf16.msra.mxu1 %v7589_v63  ;;  %v7664_v63 = vld [vmem:[%s10033_s1 + $0x10c0] ss:$8 sps:$4 sm:$0xff]   ;;  %v2103_v2 = vshll.u32 %v1989_v60, 16 }
 0x1c9   : > { %5183 = vmatpush1.bf16.msra.mxu0 %v7592_v17  ;;  %2494 = vmatprep.subr.bf16.mxu1 %v7597_v3  ;;  %v7669_v17 = vld [vmem:[%s10033_s1 + $0x7d4] ss:$8 sps:$4 sm:$0xff]   ;;  %v7667_v3 = vld [vmem:[%s10033_s1 + $0x7d0] ss:$8 sps:$4 sm:$0xff]   ;;  %v7700_v60 = vld [vmem:[%s10033_s1 + $0x1120] ss:$8 sps:$4 sm:$0xff]  }
 0x1ca   : > { %5184 = vmatprep.subr.bf16.mxu0 %v7600_v4  ;;  %2524 = vmatprep.mubr.bf16.mxu1 %v2124_v1  ;;  %v7670_v4 = vld [vmem:[%s10033_s1 + $0x10d0] ss:$8 sps:$4 sm:$0xff]   ;;  %v4791_v1 = vshrl.u32 %v9297_v35, 16 }
 0x1cb   : > { %5214 = vmatprep.mubr.bf16.mxu0 %v4823_v10  ;;  %v4794_v10 = vshll.u32 %v9297_v35, 16  ;;  %v7673_v35 = vld [vmem:[%s10033_s1 + $0x7e0] ss:$8 sps:$4 sm:$0xff]  }
 0x1cc   : > { %2495 = vmatpush1.bf16.msra.mxu1 %v7595_v40  ;;  %v4799_v40 = vshrl.u32 %v9299_v57, 16 }
 0x1cd   : > { %5185 = vmatpush1.bf16.msra.mxu0 %v7598_v58  ;;  %2496 = vmatprep.subr.bf16.mxu1 %v7603_v39  ;;  %v4802_v58 = vshll.u32 %v9299_v57, 16  ;;  %v7675_v39 = vld [vmem:[%s10033_s1 + $0x7e4] ss:$8 sps:$4 sm:$0xff]   ;;  %v4842_v57 = vshrl.u32 %v9313_v32, 16 }
 0x1ce   : > { %5186 = vmatprep.subr.bf16.mxu0 %v7606_v14  ;;  %v7678_v14 = vld [vmem:[%s10033_s1 + $0x10e4] ss:$8 sps:$4 sm:$0xff]  }
 0x1d0   : > { %2497 = vmatpush1.bf16.msra.mxu1 %v7601_v50  ;;  %v2094_v50 = vrot.slane %v2092_v9, 3  ;;  %v7711_v9 = vld [vmem:[%s10033_s1 + $0x844] ss:$8 sps:$4 sm:$0xff]  }
 0x1d1   : > { %5187 = vmatpush1.bf16.msra.mxu0 %v7604_v15  ;;  %2498 = vmatprep.subr.bf16.mxu1 %v7609_v19  ;;  %v2097_v15 = vrot.slane %v2095_v11, 4  ;;  %v2102_v19 = vrot.slane %v2100_v0, 3  ;;  %v7714_v11 = vld [vmem:[%s10033_s1 + $0x1144] ss:$8 sps:$4 sm:$0xff]   ;;  %v7709_v0 = vld [vmem:[%s10033_s1 + $0x840] ss:$8 sps:$4 sm:$0xff]  }
 0x1d2   : > { %5188 = vmatprep.subr.bf16.mxu0 %v7612_v16  ;;  %v2105_v16 = vrot.slane %v2103_v2, 4  ;;  %v7712_v2 = vld [vmem:[%s10033_s1 + $0x1140] ss:$8 sps:$4 sm:$0xff]  }
 0x1d4   : > { %2499 = vmatpush1.bf16.msra.mxu1 %v7607_v23  ;;  %v4845_v23 = vshll.u32 %v9313_v32, 16  ;;  %v7681_v32 = vld [vmem:[%s10033_s1 + $0x7f4] ss:$8 sps:$4 sm:$0xff]  }
 0x1d5   : > { %5189 = vmatpush1.bf16.msra.mxu0 %v7610_v30  ;;  %2500 = vmatprep.subr.bf16.mxu1 %v7615_v42  ;;  %v4850_v30 = vshrl.u32 %v9315_v51, 16  ;;  %v4853_v42 = vshll.u32 %v9315_v51, 16  ;;  %v7684_v51 = vld [vmem:[%s10033_s1 + $0x10f4] ss:$8 sps:$4 sm:$0xff]  }
 0x1d6   : > { %5190 = vmatprep.subr.bf16.mxu0 %v7618_v18  ;;  %v7676_v18 = vld [vmem:[%s10033_s1 + $0x10e0] ss:$8 sps:$4 sm:$0xff]  }
 0x1d8   : > { %2501 = vmatpush1.bf16.msra.mxu1 %v7613_v25  ;;  %v4793_v25 = vrot.slane %v4791_v1, 2  ;;  %v7715_v1 = vld [vmem:[%s10033_s1 + $0x850] ss:$8 sps:$4 sm:$0xff]  }
 0x1d9   : > { %5191 = vmatpush1.bf16.msra.mxu0 %v7616_v26  ;;  %2502 = vmatprep.subr.bf16.mxu1 %v7621_v48  ;;  %v4796_v26 = vrot.slane %v4794_v10, 3  ;;  %v4801_v48 = vrot.slane %v4799_v40, 2  ;;  %v7718_v10 = vld [vmem:[%s10033_s1 + $0x1150] ss:$8 sps:$4 sm:$0xff]   ;;  %v7723_v40 = vld [vmem:[%s10033_s1 + $0x864] ss:$8 sps:$4 sm:$0xff]  }
 0x1da   : > { %5192 = vmatprep.subr.bf16.mxu0 %v7624_v49  ;;  %v4804_v49 = vrot.slane %v4802_v58, 3  ;;  %v7726_v58 = vld [vmem:[%s10033_s1 + $0x1164] ss:$8 sps:$4 sm:$0xff]  }
 0x1dc   : > { %2503 = vmatpush1.bf16.msra.mxu1 %v7619_v5  ;;  %v2098_v5 = vor.u32 %v2097_v15, %v2094_v50  ;;  %v7729_v50 = vld [vmem:[%s10033_s1 + $0x874] ss:$8 sps:$4 sm:$0xff]  }
 0x1dd   : > { %5193 = vmatpush1.bf16.msra.mxu0 %v7622_v20  ;;  %2504 = vmatprep.subr.bf16.mxu1 %v7627_v61  ;;  %v4844_v20 = vrot.slane %v4842_v57, 2  ;;  %v4847_v61 = vrot.slane %v4845_v23, 3  ;;  %v7732_v15 = vld [vmem:[%s10033_s1 + $0x1174] ss:$8 sps:$4 sm:$0xff]   ;;  %v7738_v57 = vld [vmem:[%s10033_s1 + $0x1184] ss:$8 sps:$4 sm:$0xff]  }
 0x1de   : > { %5194 = vmatprep.subr.bf16.mxu0 %v7630_v27  ;;  %v4852_v27 = vrot.slane %v4850_v30, 2  ;;  %v7733_v23 = vld [vmem:[%s10033_s1 + $0x880] ss:$8 sps:$4 sm:$0xff]  }
 0x1df   : > { %v7736_v30 = vld [vmem:[%s10033_s1 + $0x1180] ss:$8 sps:$4 sm:$0xff]  }
 0x1e0   : > { %2505 = vmatpush1.bf16.msra.mxu1 %v7625_v28  ;;  %v4855_v28 = vrot.slane %v4853_v42, 3  ;;  %v7741_v42 = vld [vmem:[%s10033_s1 + $0x894] ss:$8 sps:$4 sm:$0xff]  }
 0x1e1   : > { %5195 = vmatpush1.bf16.msra.mxu0 %v7628_v29  ;;  %2506 = vmatprep.subr.bf16.mxu1 %v7633_v31  ;;  %v7679_v29 = vld [vmem:[%s10033_s1 + $0x7f0] ss:$8 sps:$4 sm:$0xff]  }
 0x1e2   : > { %5196 = vmatprep.subr.bf16.mxu0 %v7636_v33  ;;  %v7682_v31 = vld [vmem:[%s10033_s1 + $0x10f0] ss:$8 sps:$4 sm:$0xff]   ;;  %v2106_v33 = vor.u32 %v2105_v16, %v2102_v19 }
 0x1e3   : > { %v7727_v19 = vld [vmem:[%s10033_s1 + $0x870] ss:$8 sps:$4 sm:$0xff]  }
 0x1e4   : > { %2507 = vmatpush1.bf16.msra.mxu1 %v7631_v55  ;;  %v4797_v55 = vor.u32 %v4796_v26, %v4793_v25  ;;  %v7730_v16 = vld [vmem:[%s10033_s1 + $0x1170] ss:$8 sps:$4 sm:$0xff]  }
 0x1e5   : > { %5197 = vmatpush1.bf16.msra.mxu0 %v7634_v6  ;;  %2508 = vmatprep.subr.bf16.mxu1 %v7639_v52  ;;  %v4805_v6 = vor.u32 %v4804_v49, %v4801_v48  ;;  %v7687_v52 = vld [vmem:[%s10033_s1 + $0x804] ss:$8 sps:$4 sm:$0xff]   ;;  %v7739_v25 = vld [vmem:[%s10033_s1 + $0x890] ss:$8 sps:$4 sm:$0xff]  }
 0x1e6   : > { %5198 = vmatprep.subr.bf16.mxu0 %v7642_v34  ;;  %v7690_v34 = vld [vmem:[%s10033_s1 + $0x1104] ss:$8 sps:$4 sm:$0xff]   ;;  %v7742_v26 = vld [vmem:[%s10033_s1 + $0x1190] ss:$8 sps:$4 sm:$0xff]  }
 0x1e7   : > { %v7747_v48 = vld [vmem:[%s10033_s1 + $0x8a4] ss:$8 sps:$4 sm:$0xff]  }
 0x1e8   : > { %2509 = vmatpush1.bf16.msra.mxu1 %v7637_v8  ;;  %v6087_v8 = vld [vmem:[%s8020_s12 + $0x68] sm:$0xff] }
 0x1e9   : > { %5199 = vmatpush1.bf16.msra.mxu0 %v7640_v43  ;;  %2510 = vmatprep.subr.bf16.mxu1 %v7645_v7  ;;  %v6091_v43 = vld [vmem:[%s8020_s12 + $0x88] sm:$0xff]  ;;  %v4848_v7 = vor.u32 %v4847_v61, %v4844_v20  ;;  %v7756_v20 = vld [vmem:[%s10033_s1 + $0x11b4] ss:$8 sps:$4 sm:$0xff]   ;;  %v7751_v61 = vld [vmem:[%s10033_s1 + $0x8b0] ss:$8 sps:$4 sm:$0xff]  }
 0x1ea   : > { %5200 = vmatprep.subr.bf16.mxu0 %v7648_v12  ;;  %v4856_v12 = vor.u32 %v4855_v28, %v4852_v27  ;;  %v7750_v49 = vld [vmem:[%s10033_s1 + $0x11a4] ss:$8 sps:$4 sm:$0xff]   ;;  %v7754_v27 = vld [vmem:[%s10033_s1 + $0x11b0] ss:$8 sps:$4 sm:$0xff]  }
 0x1eb   : > { %v7759_v28 = vld [vmem:[%s10033_s1 + $0x8c4] ss:$8 sps:$4 sm:$0xff]  }
 0x1ec   : > { %2511 = vmatpush1.bf16.msra.mxu1 %v7643_v41  ;;  %v7685_v41 = vld [vmem:[%s10033_s1 + $0x800] ss:$8 sps:$4 sm:$0xff]  }
 0x1ed   : > { %5201 = vmatpush1.bf16.msra.mxu0 %v7646_v46  ;;  %2512 = vmatprep.subr.bf16.mxu1 %v7651_v47  ;;  %v7688_v46 = vld [vmem:[%s10033_s1 + $0x1100] ss:$8 sps:$4 sm:$0xff]   ;;  %v2107_v47 = vsel %vm2056_vm4, %v2098_v5, %v2106_v33  ;;  %v7753_v5 = vld [vmem:[%s10033_s1 + $0x8b4] ss:$8 sps:$4 sm:$0xff]  }
 0x1ee   : > { %5202 = vmatprep.subr.bf16.mxu0 %v7654_v21  ;;  %v4806_v21 = vsel %vm1480_vm3, %v4797_v55, %v4805_v6  ;;  %v7760_v33 = vld [vmem:[%s10033_s1 + $0x11c0] ss:$8 sps:$4 sm:$0xff]   ;;  %v7765_v55 = vld [vmem:[%s10033_s1 + $0x8d4] ss:$8 sps:$4 sm:$0xff]  }
 0x1ef   : > { %v7768_v6 = vld [vmem:[%s10033_s1 + $0x11d4] ss:$8 sps:$4 sm:$0xff]  }
 0x1f0   : > { %2513 = vmatpush1.bf16.msra.mxu1 %v7649_v53  ;;  %v7693_v53 = vld [vmem:[%s10033_s1 + $0x814] ss:$8 sps:$4 sm:$0xff]  }
 0x1f1   : > { %5203 = vmatpush1.bf16.msra.mxu0 %v7652_v36  ;;  %2514 = vmatprep.subr.bf16.mxu1 %v7657_v44  ;;  %v7696_v36 = vld [vmem:[%s10033_s1 + $0x1114] ss:$8 sps:$4 sm:$0xff]   ;;  %v2561_v44 = vpack.c.bf16 %v6091_v43, %v6087_v8  ;;  %v4825_v8 = vshrl.u32 %v9522_v13, 16  ;;  %v4828_v43 = vshll.u32 %v9522_v13, 16  ;;  %v7772_v13 = vld [vmem:[%s10033_s1 + $0x11e0] ss:$8 sps:$4 sm:$0xff]  }
 0x1f2   : > { %5204 = vmatprep.subr.bf16.mxu0 %v7660_v45  ;;  %v4857_v45 = vsel %vm1480_vm3, %v4848_v7, %v4856_v12  ;;  %v4833_v7 = vshrl.u32 %v9524_v24, 16  ;;  %v4836_v12 = vshll.u32 %v9524_v24, 16 }
 0x1f3   : > { %v4827_v24 = vrot.slane %v4825_v8, 2 }
 0x1f4   : > { %2515 = vmatpush1.bf16.msra.mxu1 %v7655_v54  ;;  %v7691_v54 = vld [vmem:[%s10033_s1 + $0x810] ss:$8 sps:$4 sm:$0xff]  }
 0x1f5   : > { %5205 = vmatpush1.bf16.msra.mxu0 %v7658_v22  ;;  %2516 = vmatprep.subr.bf16.mxu1 %v7663_v38  ;;  %v7694_v22 = vld [vmem:[%s10033_s1 + $0x1110] ss:$8 sps:$4 sm:$0xff]   ;;  %v7699_v38 = vld [vmem:[%s10033_s1 + $0x824] ss:$8 sps:$4 sm:$0xff]  }
 0x1f6   : > { %5206 = vmatprep.subr.bf16.mxu0 %v7666_v56  ;;  %v7702_v56 = vld [vmem:[%s10033_s1 + $0x1124] ss:$8 sps:$4 sm:$0xff]  }
 0x1f8   : > { %2517 = vmatpush1.bf16.msra.mxu1 %v7661_v62  ;;  %v7705_v62 = vld [vmem:[%s10033_s1 + $0x834] ss:$8 sps:$4 sm:$0xff]  }
 0x1f9   : > { %5207 = vmatpush1.bf16.msra.mxu0 %v7664_v63  ;;  %2518 = vmatprep.subr.bf16.mxu1 %v7669_v17  ;;  %v7708_v63 = vld [vmem:[%s10033_s1 + $0x1134] ss:$8 sps:$4 sm:$0xff]   ;;  %v7703_v17 = vld [vmem:[%s10033_s1 + $0x830] ss:$8 sps:$4 sm:$0xff]  }
 0x1fa   : > { %5208 = vmatprep.subr.bf16.mxu0 %v7672_v37  ;;  %v7706_v37 = vld [vmem:[%s10033_s1 + $0x1130] ss:$8 sps:$4 sm:$0xff]  }
 0x1fc   : > { %2519 = vmatpush1.bf16.msra.mxu1 %v7667_v3  ;;  %v7717_v3 = vld [vmem:[%s10033_s1 + $0x854] ss:$8 sps:$4 sm:$0xff]  }
 0x1fd   : > { %5209 = vmatpush1.bf16.msra.mxu0 %v7670_v4  ;;  %2520 = vmatprep.subr.bf16.mxu1 %v7675_v39  ;;  %v7720_v4 = vld [vmem:[%s10033_s1 + $0x1154] ss:$8 sps:$4 sm:$0xff]   ;;  %v7721_v39 = vld [vmem:[%s10033_s1 + $0x860] ss:$8 sps:$4 sm:$0xff]  }
 0x1fe   : > { %5210 = vmatprep.subr.bf16.mxu0 %v7678_v14  ;;  %v7724_v14 = vld [vmem:[%s10033_s1 + $0x1160] ss:$8 sps:$4 sm:$0xff]  }
 0x200   : > { %2521 = vmatpush1.bf16.msra.mxu1 %v7673_v35  ;;  %v7735_v35 = vld [vmem:[%s10033_s1 + $0x884] ss:$8 sps:$4 sm:$0xff]  }
 0x201   : > { %5211 = vmatpush1.bf16.msra.mxu0 %v7676_v18  ;;  %2522 = vmatprep.subr.bf16.mxu1 %v7681_v32  ;;  %v7744_v18 = vld [vmem:[%s10033_s1 + $0x1194] ss:$8 sps:$4 sm:$0xff]   ;;  %v7745_v32 = vld [vmem:[%s10033_s1 + $0x8a0] ss:$8 sps:$4 sm:$0xff]  }
 0x202   : > { %5212 = vmatprep.subr.bf16.mxu0 %v7684_v51  ;;  %v7748_v51 = vld [vmem:[%s10033_s1 + $0x11a0] ss:$8 sps:$4 sm:$0xff]  }
 0x204   : > { %2523 = vmatpush1.bf16.msra.mxu1 %v7679_v29  ;;  %v7762_v29 = vld [vmem:[%s10033_s1 + $0x11c4] ss:$8 sps:$4 sm:$0xff]  }
 0x205   : > { %5213 = vmatpush1.bf16.msra.mxu0 %v7682_v31  ;;  %2949 = vmatprep.subr.bf16.mxu1 %v7687_v52  ;;  %v7757_v31 = vld [vmem:[%s10033_s1 + $0x8c0] ss:$8 sps:$4 sm:$0xff]   ;;  %v7763_v52 = vld [vmem:[%s10033_s1 + $0x8d0] ss:$8 sps:$4 sm:$0xff]  }
 0x206   : > { %5225 = vmatprep.subr.bf16.mxu0 %v7690_v34  ;;  %v7766_v34 = vld [vmem:[%s10033_s1 + $0x11d0] ss:$8 sps:$4 sm:$0xff]  }
 0x207   : > { %2525 = vmatmul.mubr.bf16.vlgmr.msra.gmra.mrb[0].mxu1 %v2107_v47  ;;  %v7769_v47 = vld [vmem:[%s10033_s1 + $0x8e0] ss:$8 sps:$4 sm:$0xff]  }
 0x208   : > { %5215 = vmatmul.mubr.bf16.vlgmr.msra.gmra.mrb[0].mxu0 %v4806_v21  ;;  %2950 = vmatpush1.bf16.msra.mxu1 %v7685_v41  ;;  %v7771_v41 = vld [vmem:[%s10033_s1 + $0x8e4] ss:$8 sps:$4 sm:$0xff]   ;;  %v4830_v21 = vrot.slane %v4828_v43, 3 }
 0x209   : > { %5226 = vmatpush1.bf16.msra.mxu0 %v7688_v46  ;;  %2951 = vmatprep.subr.bf16.mxu1 %v7693_v53  ;;  %v7774_v46 = vld [vmem:[%s10033_s1 + $0x11e4] ss:$8 sps:$4 sm:$0xff]   ;;  %v4835_v53 = vrot.slane %v4833_v7, 2 }
 0x20a   : > { %5227 = vmatprep.subr.bf16.mxu0 %v7696_v36  ;;  %2981 = vmatprep.mubr.bf16.mxu1 %v2561_v44  ;;  %v4838_v36 = vrot.slane %v4836_v12, 3  ;;  %v7777_v44 = vld [vmem:[%s10033_s1 + $0x8f4] ss:$8 sps:$4 sm:$0xff]  }
 0x20b   : > { %5257 = vmatprep.mubr.bf16.mxu0 %v4857_v45  ;;  %v7780_v45 = vld [vmem:[%s10033_s1 + $0x11f4] ss:$8 sps:$4 sm:$0xff]  }
 0x20c   : > { %2952 = vmatpush1.bf16.msra.mxu1 %v7691_v54  ;;  %v7775_v54 = vld [vmem:[%s10033_s1 + $0x8f0] ss:$8 sps:$4 sm:$0xff]  }
 0x20d   : > { %5228 = vmatpush1.bf16.msra.mxu0 %v7694_v22  ;;  %2953 = vmatprep.subr.bf16.mxu1 %v7699_v38  ;;  %v7778_v22 = vld [vmem:[%s10033_s1 + $0x11f0] ss:$8 sps:$4 sm:$0xff]   ;;  %v6086_v38 = vld [vmem:[%s8020_s12 + $0x60] sm:$0xff] }
 0x20e   : > { %5229 = vmatprep.subr.bf16.mxu0 %v7702_v56  ;;  %v6090_v56 = vld [vmem:[%s8020_s12 + $0x80] sm:$0xff] }
 0x210   : > { %2954 = vmatpush1.bf16.msra.mxu1 %v7697_v59  ;;  %v4831_v59 = vor.u32 %v4830_v21, %v4827_v24 }
 0x211   : > { %5230 = vmatpush1.bf16.msra.mxu0 %v7700_v60  ;;  %2955 = vmatprep.subr.bf16.mxu1 %v7705_v62  ;;  %v4839_v60 = vor.u32 %v4838_v36, %v4835_v53  ;;  %v7781_v62 = vld [vmem:[%s10036_s4 + $0x40] sm:$0xff]  }
 0x212   : > { %5231 = vmatprep.subr.bf16.mxu0 %v7708_v63  ;;  %v2560_v63 = vpack.c.bf16 %v6090_v56, %v6086_v38  ;;  %v6782_v36 = vld [vmem:[%s10037_s5] ss:$0 sm:$0xff] }
 0x214   : > { %2956 = vmatpush1.bf16.msra.mxu1 %v7703_v17  ;;  %v4840_v17 = vsel %vm1480_vm3, %v4831_v59, %v4839_v60 }
 0x215   : > { %5232 = vmatpush1.bf16.msra.mxu0 %v7706_v37  ;;  %2957 = vmatprep.subr.bf16.mxu1 %v7711_v9  ;;  %v7782_v37 = vld [vmem:[%s10036_s4] sm:$0xff]   ;;  %v7783_v9 = vld [vmem:[%s10036_s4 + $0x48] sm:$0xff]  }
 0x216   : > { %5233 = vmatprep.subr.bf16.mxu0 %v7714_v11  ;;  %v7784_v11 = vld [vmem:[%s10036_s4 + $0x8] sm:$0xff]  }
 0x218   : > { %2958 = vmatpush1.bf16.msra.mxu1 %v7709_v0  ;;  %v7785_v0 = vld [vmem:[%s10036_s4 + $0x50] sm:$0xff]  }
 0x219   : > { %5234 = vmatpush1.bf16.msra.mxu0 %v7712_v2  ;;  %2959 = vmatprep.subr.bf16.mxu1 %v7717_v3  ;;  %v7786_v2 = vld [vmem:[%s10036_s4 + $0x10] sm:$0xff]   ;;  %v7787_v3 = vld [vmem:[%s10036_s4 + $0x58] sm:$0xff]  }
 0x21a   : > { %5235 = vmatprep.subr.bf16.mxu0 %v7720_v4  ;;  %v7788_v4 = vld [vmem:[%s10036_s4 + $0x18] sm:$0xff]  }
 0x21c   : > { %2960 = vmatpush1.bf16.msra.mxu1 %v7715_v1  ;;  %v7789_v1 = vld [vmem:[%s10036_s4 + $0x60] sm:$0xff]  }
 0x21d   : > { %5236 = vmatpush1.bf16.msra.mxu0 %v7718_v10  ;;  %2961 = vmatprep.subr.bf16.mxu1 %v7723_v40  ;;  %v7790_v10 = vld [vmem:[%s10036_s4 + $0x20] sm:$0xff]   ;;  %v7791_v40 = vld [vmem:[%s10036_s4 + $0x68] sm:$0xff]  }
 0x21e   : > { %5237 = vmatprep.subr.bf16.mxu0 %v7726_v58  ;;  %v7792_v58 = vld [vmem:[%s10036_s4 + $0x28] sm:$0xff]  }
 0x220   : > { %2962 = vmatpush1.bf16.msra.mxu1 %v7721_v39  ;;  %v7793_v39 = vld [vmem:[%s10036_s4 + $0x70] sm:$0xff]  }
 0x221   : > { %5238 = vmatpush1.bf16.msra.mxu0 %v7724_v14  ;;  %2963 = vmatprep.subr.bf16.mxu1 %v7729_v50  ;;  %v7794_v14 = vld [vmem:[%s10036_s4 + $0x30] sm:$0xff]   ;;  %v7795_v50 = vld [vmem:[%s10036_s4 + $0x78] sm:$0xff]  }
 0x222   : > { %5239 = vmatprep.subr.bf16.mxu0 %v7732_v15  ;;  %v7796_v15 = vld [vmem:[%s10036_s4 + $0x38] sm:$0xff]  }
 0x224   : > { %2964 = vmatpush1.bf16.msra.mxu1 %v7727_v19  ;;  %v5282_v19 = vlaneseq }
 0x225   : > { %5240 = vmatpush1.bf16.msra.mxu0 %v7730_v16  ;;  %2965 = vmatprep.subr.bf16.mxu1 %v7735_v35 }
 0x226   : > { %5241 = vmatprep.subr.bf16.mxu0 %v7738_v57  ;;  %v5283_v16 = vshrl.u32 %v5282_v19, 7  ;;  %v5280_v57 = vld [vmem:[%s10034_s2] sm:$0x3] }
 0x228   : > { %2966 = vmatpush1.bf16.msra.mxu1 %v7733_v23  ;;  %v5284_v35 = vsub.s32 0, %v5283_v16  ;;  %v5288_v23 = vsub.s32 1, %v5283_v16 }
 0x229   : > { %5242 = vmatpush1.bf16.msra.mxu0 %v7736_v30  ;;  %2967 = vmatprep.subr.bf16.mxu1 %v7741_v42  ;;  %v5296_v30 = vld [vmem:[%s10035_s3] sm:$0x3] }
 0x22a   : > { %5243 = vmatprep.subr.bf16.mxu0 %v7744_v18  ;;  %v5285_v42 = vrot.slane %v5280_v57, %v5284_v35 }
 0x22c   : > { %2968 = vmatpush1.bf16.msra.mxu1 %v7739_v25 }
 0x22d   : > { %5244 = vmatpush1.bf16.msra.mxu0 %v7742_v26  ;;  %2969 = vmatprep.subr.bf16.mxu1 %v7747_v48  ;;  %v5289_v26 = vrot.slane %v5280_v57, %v5288_v23 }
 0x22e   : > { %5245 = vmatprep.subr.bf16.mxu0 %v7750_v49  ;;  %v5301_v49 = vrot.slane %v5296_v30, %v5284_v35 }
 0x230   : > { %2970 = vmatpush1.bf16.msra.mxu1 %v7745_v32 }
 0x231   : > { %5246 = vmatpush1.bf16.msra.mxu0 %v7748_v51  ;;  %2971 = vmatprep.subr.bf16.mxu1 %v7753_v5 }
 0x232   : > { %5247 = vmatprep.subr.bf16.mxu0 %v7756_v20  ;;  %v5305_v20 = vrot.slane %v5296_v30, %v5288_v23 }
 0x234   : > { %2972 = vmatpush1.bf16.msra.mxu1 %v7751_v61 }
 0x235   : > { %5248 = vmatpush1.bf16.msra.mxu0 %v7754_v27  ;;  %2973 = vmatprep.subr.bf16.mxu1 %v7759_v28 }
 0x236   : > { %5249 = vmatprep.subr.bf16.mxu0 %v7762_v29 }
 0x238   : > { %2974 = vmatpush1.bf16.msra.mxu1 %v7757_v31 }
 0x239   : > { %5250 = vmatpush1.bf16.msra.mxu0 %v7760_v33  ;;  %2975 = vmatprep.subr.bf16.mxu1 %v7765_v55 }
 0x23a   : > { %5251 = vmatprep.subr.bf16.mxu0 %v7768_v6 }
 0x23c   : > { %2976 = vmatpush1.bf16.msra.mxu1 %v7763_v52 }
 0x23d   : > { %5252 = vmatpush1.bf16.msra.mxu0 %v7766_v34  ;;  %2977 = vmatprep.subr.bf16.mxu1 %v7771_v41 }
 0x23e   : > { %5253 = vmatprep.subr.bf16.mxu0 %v7774_v46 }
 0x240   : > { %2978 = vmatpush1.bf16.msra.mxu1 %v7769_v47 }
 0x241   : > { %5254 = vmatpush1.bf16.msra.mxu0 %v7772_v13  ;;  %2979 = vmatprep.subr.bf16.mxu1 %v7777_v44 }
 0x242   : > { %5255 = vmatprep.subr.bf16.mxu0 %v7780_v45 }
 0x244   : > { %2980 = vmatpush1.bf16.msra.mxu1 %v7775_v54 }
 0x245   : > { %5256 = vmatpush1.bf16.msra.mxu0 %v7778_v22  ;;  %6803 = vmatprep.subr.bf16.mxu1 %v7781_v62 }
 0x247   : > { %2982 = vmatmul.mubr.bf16.vlgmr.msra.gmra.mrb[0].mxu1 %v2560_v63 }
 0x248   : > { %5258 = vmatmul.mubr.bf16.vlgmr.msra.gmra.mrb[0].mxu0 %v4840_v17  ;;  %6804 = vmatpush3.bf16.msra.mxu1 %v7782_v37 }
 0x249   : > { %6805 = vmatprep.subr.bf16.mxu1 %v7783_v9 }
 0x24c   : > { %6806 = vmatpush3.bf16.msra.mxu1 %v7784_v11 }
 0x24d   : > { %6807 = vmatprep.subr.bf16.mxu1 %v7785_v0 }
 0x250   : > { %6808 = vmatpush3.bf16.msra.mxu1 %v7786_v2 }
 0x251   : > { %6809 = vmatprep.subr.bf16.mxu1 %v7787_v3 }
 0x254   : > { %6810 = vmatpush3.bf16.msra.mxu1 %v7788_v4 }
 0x255   : > { %6811 = vmatprep.subr.bf16.mxu1 %v7789_v1 }
 0x258   : > { %6812 = vmatpush3.bf16.msra.mxu1 %v7790_v10 }
 0x259   : > { %6813 = vmatprep.subr.bf16.mxu1 %v7791_v40 }
 0x25c   : > { %6814 = vmatpush3.bf16.msra.mxu1 %v7792_v58 }
 0x25d   : > { %6815 = vmatprep.subr.bf16.mxu1 %v7793_v39 }
 0x260   : > { %6816 = vmatpush3.bf16.msra.mxu1 %v7794_v14 }
 0x261   : > { %6817 = vmatprep.subr.bf16.mxu1 %v7795_v50 }
 0x264   : > { %6818 = vmatpush3.bf16.msra.mxu1 %v7796_v15 }
 0x31a   : > { %v2983_v18 = vpop.f32.mrb[0].mxu1 }
 0x31b   : > { %v5259_v25 = vpop.f32.mrb[0].mxu0  ;;  %v2985_v32 = vpop.f32.mrb[1].mxu1 }
 0x31c   : > { %v6825_v48 = vadd.f32 %v5259_v25, %v2983_v18  ;;  %v5261_v51 = vpop.f32.mrb[1].mxu0  ;;  %v2987_v61 = vpop.f32.mrb[2].mxu1 }
 0x31d   : > { %v6826_v5 = vadd.f32 %v5261_v51, %v2985_v32  ;;  %v5263_v27 = vpop.f32.mrb[2].mxu0  ;;  %v2989_v31 = vpop.f32.mrb[3].mxu1 }
 0x31e   : > { %v5292_v28 = vmul.f32 %v6825_v48, %v5285_v42  ;;  %v6827_v29 = vadd.f32 %v5263_v27, %v2987_v61  ;;  %v5265_v33 = vpop.f32.mrb[3].mxu0 }
 0x31f   : > { %v5293_v55 = vmul.f32 %v6826_v5, %v5289_v26  ;;  %v6828_v6 = vadd.f32 %v5265_v33, %v2989_v31 }
 0x320   : > { %v5308_v52 = vadd.f32 %v5301_v49, %v5292_v28  ;;  %v5294_v34 = vmul.f32 %v6827_v29, %v5285_v42 }
 0x321   : > { %v5309_v8 = vadd.f32 %v5305_v20, %v5293_v55  ;;  %v5295_v43 = vmul.f32 %v6828_v6, %v5289_v26 }
 0x322   : > { %v5310_v7 = vadd.f32 %v5301_v49, %v5294_v34  ;;  %v5312_v41 = vmax.f32 %v5308_v52, 0.0 }
 0x323   : > { %v5311_v12 = vadd.f32 %v5305_v20, %v5295_v43  ;;  %v5313_v47 = vmax.f32 %v5309_v8, 0.0 }
 0x324   : > { %v5314_v46 = vmax.f32 %v5310_v7, 0.0 }
 0x325   : > { %v5315_v13 = vmax.f32 %v5311_v12, 0.0 }
 0x326   : > { %v5316_v24 = vpack.c.bf16 %v5314_v46, %v5312_v41 }
 0x327   : > { %v5317_v21 = vpack.c.bf16 %v5315_v13, %v5313_v47 }
 0x329   : > { %5485 = vmatprep.mubr.bf16.mxu1 %v5317_v21 }
 0x32a   : > { %5486 = vmatmul.mubr.bf16.vlgmr.msra.gmra.mrb[4].mxu1 %v5316_v24 }
 0x3fd   : > { %v6819_v53 = vpop.f32.mrb[4].mxu1 }
 0x3fe   : > { %v6820_v44 = vpop.f32.mrb[5].mxu1 }
 0x3ff   : > { %v6821_v45 = vadd.f32 %v6820_v44, %v6819_v53  ;;  %v6822_v54 = vpop.f32.mrb[6].mxu1 }
 0x400   : > { %v6823_v22 = vpop.f32.mrb[7].mxu1 }
 0x401   : > { %v5488_v38 = vadd.f32 %v6821_v45, %v6782_v36  ;;  %v6824_v56 = vadd.f32 %v6823_v22, %v6822_v54 }
 0x403   : > { %5494 = vst [vmem:[%s273_s14] sm:$0xff] %v5488_v38  ;;  %v5491_v59 = vadd.f32 %v6824_v56, %v6782_v36 }
 0x405   : > { %5495 = vst [vmem:[%s273_s14 + $0x8] sm:$0xff] %v5491_v59 }
 0x406 PF: > { %s16_s23 = sadd.s32 1, %s7823_s23   ;;  %s10039_s21 = smov %s7819_s22 }
 0x407   : > { %p13_p5 = scmp.ge.s32.totalorder %s16_s23, 4   ;;  %s10040_s22 = smov %s10042_s24 }
 0x409   :  { %15 = sbr.rel (!%p13_p5) target bundleno = 2 (0x2), region = 84 }

</bundles_post_ra>
